<compile_context>
chip_gen: v7x
topology: tpu7x:2x2x1
jax: 0.10.0
libtpu: 0.0.40
codegen_flags: <defaults>
</compile_context>

<pallas_src>
import functools
import jax
import jax.numpy as jnp
from jax.experimental import pallas as pl
from jax.experimental.pallas import tpu as pltpu

NUM_HEADS = 4
NEG_SLOPE = 0.2  # DGL GATConv default leaky_relu slope


def _vmem():
    return pl.BlockSpec(memory_space=pltpu.MemorySpace.VMEM)


# ----------------------------------------------------------------------------
# One GATConv layer (traced inline inside the fused kernel)
# ----------------------------------------------------------------------------
def _gat_layer_compute(h, w_ref, alT_ref, ar_ref, bias_ref, adj_ref,
                       n_dst, num_heads, head_dim):
    HD = num_heads * head_dim
    # fc: (n_src, F_in) @ (F_in, H*D) - bf16 operands, f32 accumulation
    feat = jnp.dot(h.astype(jnp.bfloat16), w_ref[...],
                   preferred_element_type=jnp.float32)            # (n_src, HD) f32
    featT = feat.T                                                 # (HD, n_src) - one XLU transpose
    feat_bf = feat.astype(jnp.bfloat16)
    feat_dst = feat[:n_dst, :]                                     # DGL: dst = first n_dst src rows
    # adj arrives as int8 {0,1}; rebuild the boolean mask in-kernel.
    adj_mask = adj_ref[...].astype(jnp.float32) > 0.0              # (n_dst, n_src)
    alT = alT_ref[...]                                             # (D, H)
    ar = ar_ref[...]                                               # (H, D)
    bias = bias_ref[...]                                           # (1, HD)

    lane = jax.lax.broadcasted_iota(jnp.int32, (1, HD), 1)
    acc = jnp.zeros((n_dst, HD), jnp.float32)

    for hd in range(num_heads):
        sl = slice(hd * head_dim, (hd + 1) * head_dim)
        # er: dst on sublanes - VPU mul + lane reduce              -> (n_dst, 1)
        er_h = jnp.sum(feat_dst[:, sl] * ar[hd:hd + 1, :], axis=1, keepdims=True)
        # el: src on lanes (lane-dense) - VPU mul + sublane reduce -> (1, n_src)
        el_h = jnp.sum(featT[sl, :] * alT[:, hd:hd + 1], axis=0, keepdims=True)

        e = er_h + el_h                                            # (n_dst, n_src) f32
        e = jnp.where(e > 0, e, NEG_SLOPE * e)                     # LeakyReLU(0.2)
        e = jnp.where(adj_mask, e, -1e30)                          # safe: e stays f32
        m = jnp.max(e, axis=-1, keepdims=True)
        p = jnp.where(adj_mask, jnp.exp(e - m), 0.0)
        denom = jnp.sum(p, axis=-1, keepdims=True)
        # zero in-degree nodes (allow_zero_in_degree=True) -> all-zero weights;
        # exact divide for parity with an f32 DGL/PyTorch reference.
        a = (p / jnp.where(denom > 0, denom, 1.0)).astype(jnp.bfloat16)

        # Full 128-lane-wide aggregation matmul, masked to this head's slice.
        head_out = jnp.dot(a, feat_bf, preferred_element_type=jnp.float32)  # (n_dst, HD)
        head_mask = (lane >= hd * head_dim) & (lane < (hd + 1) * head_dim)
        acc = jnp.where(head_mask, head_out, acc)                  # disjoint head lanes

    out = acc + bias
    # F.elu fused (applied right after .flatten(1) in the reference model)
    return jnp.where(out > 0, out, jnp.exp(jnp.minimum(out, 0.0)) - 1.0)


# ----------------------------------------------------------------------------
# Fully fused forward kernel: 3 GAT layers + projection + batched predictor
# ----------------------------------------------------------------------------
def _gat_forward_kernel(
        x_ref,
        w0_ref, alT0_ref, ar0_ref, b0_ref, adj0_ref,
        w1_ref, alT1_ref, ar1_ref, b1_ref, adj1_ref,
        w2_ref, alT2_ref, ar2_ref, b2_ref, adj2_ref,
        pw_ref, pb_ref,
        mw1T_ref, mb1_ref, mw2T_ref, mb2_ref, mw3_ref, mb3_ref,
        idx_ref,
        out_ref, *, num_heads, head_dim, n_dsts):
    h = x_ref[...]                                                 # (n0, F_in) f32
    layer_refs = ((w0_ref, alT0_ref, ar0_ref, b0_ref, adj0_ref),
                  (w1_ref, alT1_ref, ar1_ref, b1_ref, adj1_ref),
                  (w2_ref, alT2_ref, ar2_ref, b2_ref, adj2_ref))
    for (w_r, alT_r, ar_r, b_r, adj_r), n_dst in zip(layer_refs, n_dsts):
        h = _gat_layer_compute(h, w_r, alT_r, ar_r, b_r, adj_r,
                               n_dst, num_heads, head_dim)

    # projection Linear: (n3, H*D) @ (H*D, hid)
    h = jnp.dot(h.astype(jnp.bfloat16), pw_ref[...],
                preferred_element_type=jnp.float32) + pb_ref[...]  # (n3, hid) f32

    # ---- predictor, transposed orientation: hid on sublanes, edges on lanes --
    hT = h.T.astype(jnp.bfloat16)                                  # (hid, n3)
    n_out = hT.shape[1]
    idx = idx_ref[...]                                             # (2, E) int32
    E = idx.shape[1]

    # In-kernel one-hot gather (bf16 one-hot is exact); h never leaves VMEM.
    row = jax.lax.broadcasted_iota(jnp.int32, (n_out, E), 0)
    sel_s = jnp.where(row == idx[0:1, :], 1.0, 0.0).astype(jnp.bfloat16)
    sel_d = jnp.where(row == idx[1:2, :], 1.0, 0.0).astype(jnp.bfloat16)
    hsT = jnp.dot(hT, sel_s, preferred_element_type=jnp.float32)   # (hid, E)
    hdT = jnp.dot(hT, sel_d, preferred_element_type=jnp.float32)   # (hid, E)

    zT = (hsT * hdT).astype(jnp.bfloat16)                          # (hid, E)
    z1 = jnp.maximum(jnp.dot(mw1T_ref[...], zT,
                             preferred_element_type=jnp.float32) + mb1_ref[...], 0.0)
    z2 = jnp.maximum(jnp.dot(mw2T_ref[...], z1.astype(jnp.bfloat16),
                             preferred_element_type=jnp.float32) + mb2_ref[...], 0.0)
    # final (hid -> 1): VPU multiply + sublane reduce -> lane-dense (1, E) row
    score = jnp.sum(z2 * mw3_ref[...], axis=0, keepdims=True) + mb3_ref[...]
    out_ref[...] = score                                           # (1, E)


# ----------------------------------------------------------------------------
# Wrapper: parameter plumbing, cost estimate, single pallas_call
# ----------------------------------------------------------------------------
def gat_forward(params, adjs, x, pos_src, pos_dst, neg_src, neg_dst):
    # DGL block convention check: dst nodes are the first n_dst src rows, and
    # the next layer's src count equals this layer's dst count.
    assert x.shape[0] == adjs[0].shape[1]
    for i in range(1, len(adjs)):
        assert adjs[i].shape[1] == adjs[i - 1].shape[0]
    for a in adjs:
        assert a.shape[0] <= a.shape[1]

    num_heads, head_dim = params["layers"][0]["attn_l"].shape
    HD = num_heads * head_dim
    hid = int(params["proj_w"].shape[1])
    n_dsts = tuple(int(a.shape[0]) for a in adjs)
    n_srcs = tuple(int(a.shape[1]) for a in adjs)
    n_out = n_dsts[-1]
    e_pos = int(pos_src.shape[0])
    e_neg = int(neg_src.shape[0])
    E = e_pos + e_neg

    # Edge endpoints as one tiny int32 tensor; one-hot built in-kernel.
    # NOTE: out-of-range indices would gather zero rows - validate upstream.
    idx = jnp.stack([jnp.concatenate([pos_src, neg_src]),
                     jnp.concatenate([pos_dst, neg_dst])]).astype(jnp.int32)

    inputs = [x]
    for layer, adj in zip(params["layers"], adjs):
        inputs += [layer["w"],                       # (F_in, H*D) bf16
                   layer["attn_l"].T,                # (D, H)     f32
                   layer["attn_r"],                  # (H, D)     f32
                   layer["bias"].reshape(1, -1),     # (1, H*D)   f32
                   adj.astype(jnp.int8)]             # (n_dst, n_src) int8 {0,1}
    inputs += [params["proj_w"], params["proj_b"].reshape(1, -1)]
    inputs += [params["pred_w1"].T, params["pred_b1"].reshape(-1, 1),
               params["pred_w2"].T, params["pred_b2"].reshape(-1, 1),
               params["pred_w3"],                    # (hid, 1) f32 column
               params["pred_b3"].reshape(1, 1)]      # (1, 1)   f32
    inputs += [idx]

    # Advisory cost estimate so XLA schedules the fused call against
    # surrounding ops when this runs inside a larger jitted graph.
    flops = 0
    transc = 0
    f_ins = (int(x.shape[1]), HD, HD)
    for n_src, n_dst, f_in in zip(n_srcs, n_dsts, f_ins):
        flops += 2 * n_src * f_in * HD                       # fc matmul
        flops += num_heads * 2 * n_dst * n_src * HD          # aggregation matmuls
        flops += num_heads * 8 * n_dst * n_src               # softmax / mask chain
        transc += num_heads * n_dst * n_src + n_dst * HD     # exp (softmax + ELU)
    flops += 2 * n_out * HD * hid                            # projection
    flops += 2 * 2 * hid * n_out * E                         # one-hot gathers
    flops += 2 * 2 * hid * hid * E + 2 * hid * E             # predictor MLP
    bytes_accessed = sum(int(a.size) * a.dtype.itemsize for a in inputs) + E * 4

    kern = functools.partial(_gat_forward_kernel,
                             num_heads=num_heads, head_dim=head_dim,
                             n_dsts=n_dsts)
    scores = pl.pallas_call(
        kern,
        out_shape=jax.ShapeDtypeStruct((1, E), jnp.float32),
        in_specs=[_vmem() for _ in inputs],
        out_specs=_vmem(),
        cost_estimate=pl.CostEstimate(flops=int(flops), transcendentals=int(transc),
                                      bytes_accessed=int(bytes_accessed)),
    )(*inputs)

    # pos/neg split is a free host slice (handles any e_pos alignment).
    h_pos = scores[0, :e_pos].reshape(e_pos, 1)
    h_neg = scores[0, e_pos:].reshape(e_neg, 1)
    return h_pos, h_neg


# ----------------------------------------------------------------------------
# Parameter init (weight matrices in bf16; attention vectors / biases in f32)
# ----------------------------------------------------------------------------
def init_params(key, in_size, hid_size):
    H = NUM_HEADS
    keys = jax.random.split(key, 32)
    ki = iter(range(32))

    def dense(fan_in, fan_out, dtype=jnp.bfloat16):
        k = keys[next(ki)]
        w = jax.random.normal(k, (fan_in, fan_out), jnp.float32) / jnp.sqrt(fan_in)
        return w.astype(dtype)

    layers = []
    dims = [in_size, hid_size * H, hid_size * H]
    for l in range(3):
        layers.append(dict(
            w=dense(dims[l], hid_size * H),
            attn_l=0.1 * jax.random.normal(keys[next(ki)], (H, hid_size), jnp.float32),
            attn_r=0.1 * jax.random.normal(keys[next(ki)], (H, hid_size), jnp.float32),
            bias=0.01 * jax.random.normal(keys[next(ki)], (hid_size * H,), jnp.float32),
        ))
    return dict(
        layers=layers,
        proj_w=dense(hid_size * H, hid_size),
        proj_b=jnp.zeros((hid_size,), jnp.float32),
        pred_w1=dense(hid_size, hid_size),
        pred_b1=jnp.zeros((hid_size,), jnp.float32),
        pred_w2=dense(hid_size, hid_size),
        pred_b2=jnp.zeros((hid_size,), jnp.float32),
        pred_w3=dense(hid_size, 1, dtype=jnp.float32),   # used as VPU mul+reduce column
        pred_b3=jnp.zeros((1,), jnp.float32),
    )


if __name__ == "__main__":
    in_size, hid_size = 16, 32
    n0, n1, n2, n3 = 64, 32, 16, 8          # node counts per sampled block level
    e_pos, e_neg = 8, 8                     # pair / negative-pair graph edges

    key = jax.random.PRNGKey(0)
    (k_feat, k_a0, k_a1, k_a2, k_e0, k_e1, k_e2, k_e3, k_param) = jax.random.split(key, 9)

    x = jax.random.normal(k_feat, (n0, in_size), jnp.float32)
    adj0 = jax.random.bernoulli(k_a0, 0.3, (n1, n0)).astype(jnp.float32)
    adj1 = jax.random.bernoulli(k_a1, 0.3, (n2, n1)).astype(jnp.float32)
    adj2 = jax.random.bernoulli(k_a2, 0.3, (n3, n2)).astype(jnp.float32)

    pos_src = jax.random.randint(k_e0, (e_pos,), 0, n3)
    pos_dst = jax.random.randint(k_e1, (e_pos,), 0, n3)
    neg_src = jax.random.randint(k_e2, (e_neg,), 0, n3)
    neg_dst = jax.random.randint(k_e3, (e_neg,), 0, n3)

    # Validate edge indices while they are concrete (OOB would gather zeros).
    for name, ids in (("pos_src", pos_src), ("pos_dst", pos_dst),
                      ("neg_src", neg_src), ("neg_dst", neg_dst)):
        assert int(jnp.min(ids)) >= 0 and int(jnp.max(ids)) < n3, name

    params = init_params(k_param, in_size, hid_size)

    h_pos, h_neg = gat_forward(params, [adj0, adj1, adj2], x,
                               pos_src, pos_dst, neg_src, neg_dst)
    jax.block_until_ready((h_pos, h_neg))
    assert h_pos.shape == (e_pos, 1) and h_neg.shape == (e_neg, 1)
    assert bool(jnp.all(jnp.isfinite(h_pos))) and bool(jnp.all(jnp.isfinite(h_neg)))
    print("KERNEL_OK")
</pallas_src>

<mosaic_0001>
module attributes {stable_mosaic.version = 11 : i64} {
  func.func @_gat_forward_kernel(%arg0: memref<64x16xf32, #tpu.memory_space<vmem>>, %arg1: memref<16x128xbf16, #tpu.memory_space<vmem>>, %arg2: memref<32x4xf32, #tpu.memory_space<vmem>>, %arg3: memref<4x32xf32, #tpu.memory_space<vmem>>, %arg4: memref<1x128xf32, #tpu.memory_space<vmem>>, %arg5: memref<32x64xi8, #tpu.memory_space<vmem>>, %arg6: memref<128x128xbf16, #tpu.memory_space<vmem>>, %arg7: memref<32x4xf32, #tpu.memory_space<vmem>>, %arg8: memref<4x32xf32, #tpu.memory_space<vmem>>, %arg9: memref<1x128xf32, #tpu.memory_space<vmem>>, %arg10: memref<16x32xi8, #tpu.memory_space<vmem>>, %arg11: memref<128x128xbf16, #tpu.memory_space<vmem>>, %arg12: memref<32x4xf32, #tpu.memory_space<vmem>>, %arg13: memref<4x32xf32, #tpu.memory_space<vmem>>, %arg14: memref<1x128xf32, #tpu.memory_space<vmem>>, %arg15: memref<8x16xi8, #tpu.memory_space<vmem>>, %arg16: memref<128x32xbf16, #tpu.memory_space<vmem>>, %arg17: memref<1x32xf32, #tpu.memory_space<vmem>>, %arg18: memref<32x32xbf16, #tpu.memory_space<vmem>>, %arg19: memref<32x1xf32, #tpu.memory_space<vmem>>, %arg20: memref<32x32xbf16, #tpu.memory_space<vmem>>, %arg21: memref<32x1xf32, #tpu.memory_space<vmem>>, %arg22: memref<32x1xf32, #tpu.memory_space<vmem>>, %arg23: memref<1x1xf32, #tpu.memory_space<vmem>>, %arg24: memref<2x16xi32, #tpu.memory_space<vmem>>, %arg25: memref<1x16xf32, #tpu.memory_space<vmem>>) attributes {dimension_semantics = [], scalar_prefetch = 0 : i64, scratch_operands = 0 : i64, tpu.core_type = #tpu.core_type<tc>} {
    %c0 = arith.constant 0 : index
    %c0_0 = arith.constant 0 : index
    %0 = vector.load %arg0[%c0, %c0_0] : memref<64x16xf32, #tpu.memory_space<vmem>>, vector<64x16xf32>
    %1 = arith.truncf %0 : vector<64x16xf32> to vector<64x16xbf16>
    %c0_1 = arith.constant 0 : index
    %c0_2 = arith.constant 0 : index
    %2 = vector.load %arg1[%c0_1, %c0_2] : memref<16x128xbf16, #tpu.memory_space<vmem>>, vector<16x128xbf16>
    %cst = arith.constant dense<0.000000e+00> : vector<64x128xf32>
    %3 = tpu.matmul %1, %2, %cst {dimension_numbers = #tpu.dot_dimension_numbers<[1], [0], [0], [1], [0, 0, 1, 1], [], []>} : vector<64x16xbf16>, vector<16x128xbf16>, vector<64x128xf32> -> vector<64x128xf32>
    %4 = tpu.transpose %3, [1, 0] : vector<64x128xf32> -> vector<128x64xf32>
    %5 = arith.truncf %3 : vector<64x128xf32> to vector<64x128xbf16>
    %6 = vector.extract_strided_slice %3 {offsets = [0, 0], sizes = [32, 128], strides = [1, 1]} : vector<64x128xf32> to vector<32x128xf32>
    %c0_3 = arith.constant 0 : index
    %c0_4 = arith.constant 0 : index
    %7 = vector.load %arg5[%c0_3, %c0_4] : memref<32x64xi8, #tpu.memory_space<vmem>>, vector<32x64xi8>
    %8 = arith.sitofp %7 : vector<32x64xi8> to vector<32x64xf32>
    %cst_5 = arith.constant 0.000000e+00 : f32
    %9 = vector.broadcast %cst_5 : f32 to vector<32x64xf32>
    %10 = arith.cmpf ogt, %8, %9 : vector<32x64xf32>
    %c0_6 = arith.constant 0 : index
    %c0_7 = arith.constant 0 : index
    %11 = vector.load %arg2[%c0_6, %c0_7] : memref<32x4xf32, #tpu.memory_space<vmem>>, vector<32x4xf32>
    %c0_8 = arith.constant 0 : index
    %c0_9 = arith.constant 0 : index
    %12 = vector.load %arg3[%c0_8, %c0_9] : memref<4x32xf32, #tpu.memory_space<vmem>>, vector<4x32xf32>
    %c0_10 = arith.constant 0 : index
    %c0_11 = arith.constant 0 : index
    %13 = vector.load %arg4[%c0_10, %c0_11] : memref<1x128xf32, #tpu.memory_space<vmem>>, vector<1x128xf32>
    %14 = tpu.iota {dimensions = array<i32: 1>} : vector<1x128xi32>
    %cst_12 = arith.constant 0.000000e+00 : f32
    %15 = vector.broadcast %cst_12 : f32 to vector<32x128xf32>
    %16 = vector.extract_strided_slice %6 {offsets = [0, 0], sizes = [32, 32], strides = [1, 1]} : vector<32x128xf32> to vector<32x32xf32>
    %17 = vector.extract_strided_slice %12 {offsets = [0, 0], sizes = [1, 32], strides = [1, 1]} : vector<4x32xf32> to vector<1x32xf32>
    %18 = vector.broadcast %17 : vector<1x32xf32> to vector<32x32xf32>
    %19 = arith.mulf %16, %18 : vector<32x32xf32>
    %cst_13 = arith.constant dense<0.000000e+00> : vector<32xf32>
    %20 = vector.multi_reduction <add>, %19, %cst_13 [1] : vector<32x32xf32> to vector<32xf32>
    %21 = vector.shape_cast %20 : vector<32xf32> to vector<32x1xf32>
    %22 = vector.extract_strided_slice %4 {offsets = [0, 0], sizes = [32, 64], strides = [1, 1]} : vector<128x64xf32> to vector<32x64xf32>
    %23 = vector.extract_strided_slice %11 {offsets = [0, 0], sizes = [32, 1], strides = [1, 1]} : vector<32x4xf32> to vector<32x1xf32>
    %24 = vector.broadcast %23 : vector<32x1xf32> to vector<32x64xf32>
    %25 = arith.mulf %22, %24 : vector<32x64xf32>
    %cst_14 = arith.constant dense<0.000000e+00> : vector<64xf32>
    %26 = vector.multi_reduction <add>, %25, %cst_14 [0] : vector<32x64xf32> to vector<64xf32>
    %27 = vector.shape_cast %26 : vector<64xf32> to vector<1x64xf32>
    %28 = vector.broadcast %21 : vector<32x1xf32> to vector<32x64xf32>
    %29 = vector.broadcast %27 : vector<1x64xf32> to vector<32x64xf32>
    %30 = arith.addf %28, %29 : vector<32x64xf32>
    %cst_15 = arith.constant 0.000000e+00 : f32
    %31 = vector.broadcast %cst_15 : f32 to vector<32x64xf32>
    %32 = arith.cmpf ogt, %30, %31 : vector<32x64xf32>
    %cst_16 = arith.constant 2.000000e-01 : f32
    %33 = vector.broadcast %cst_16 : f32 to vector<32x64xf32>
    %34 = arith.mulf %33, %30 : vector<32x64xf32>
    %35 = arith.select %32, %30, %34 : vector<32x64xi1>, vector<32x64xf32>
    %cst_17 = arith.constant -1.000000e+30 : f32
    %36 = vector.broadcast %cst_17 : f32 to vector<32x64xf32>
    %37 = arith.select %10, %35, %36 : vector<32x64xi1>, vector<32x64xf32>
    %cst_18 = arith.constant dense<0xFF800000> : vector<32xf32>
    %38 = vector.multi_reduction <maximumf>, %37, %cst_18 [1] : vector<32x64xf32> to vector<32xf32>
    %39 = vector.shape_cast %38 : vector<32xf32> to vector<32x1xf32>
    %40 = vector.broadcast %39 : vector<32x1xf32> to vector<32x64xf32>
    %41 = arith.subf %37, %40 : vector<32x64xf32>
    %42 = math.exp %41 : vector<32x64xf32>
    %cst_19 = arith.constant 0.000000e+00 : f32
    %43 = vector.broadcast %cst_19 : f32 to vector<32x64xf32>
    %44 = arith.select %10, %42, %43 : vector<32x64xi1>, vector<32x64xf32>
    %cst_20 = arith.constant dense<0.000000e+00> : vector<32xf32>
    %45 = vector.multi_reduction <add>, %44, %cst_20 [1] : vector<32x64xf32> to vector<32xf32>
    %46 = vector.shape_cast %45 : vector<32xf32> to vector<32x1xf32>
    %cst_21 = arith.constant 0.000000e+00 : f32
    %47 = vector.broadcast %cst_21 : f32 to vector<32x1xf32>
    %48 = arith.cmpf ogt, %46, %47 : vector<32x1xf32>
    %cst_22 = arith.constant 1.000000e+00 : f32
    %49 = vector.broadcast %cst_22 : f32 to vector<32x1xf32>
    %50 = arith.select %48, %46, %49 : vector<32x1xi1>, vector<32x1xf32>
    %51 = vector.broadcast %50 : vector<32x1xf32> to vector<32x64xf32>
    %52 = arith.divf %44, %51 : vector<32x64xf32>
    %53 = arith.truncf %52 : vector<32x64xf32> to vector<32x64xbf16>
    %cst_23 = arith.constant dense<0.000000e+00> : vector<32x128xf32>
    %54 = tpu.matmul %53, %5, %cst_23 {dimension_numbers = #tpu.dot_dimension_numbers<[1], [0], [0], [1], [0, 0, 1, 1], [], []>} : vector<32x64xbf16>, vector<64x128xbf16>, vector<32x128xf32> -> vector<32x128xf32>
    %c0_i32 = arith.constant 0 : i32
    %55 = vector.broadcast %c0_i32 : i32 to vector<1x128xi32>
    %56 = arith.cmpi sge, %14, %55 : vector<1x128xi32>
    %c32_i32 = arith.constant 32 : i32
    %57 = vector.broadcast %c32_i32 : i32 to vector<1x128xi32>
    %58 = arith.cmpi slt, %14, %57 : vector<1x128xi32>
    %59 = arith.andi %56, %58 : vector<1x128xi1>
    %60 = vector.shape_cast %59 : vector<1x128xi1> to vector<1x128xi1>
    %61 = vector.broadcast %60 : vector<1x128xi1> to vector<32x128xi1>
    %62 = arith.select %61, %54, %15 : vector<32x128xi1>, vector<32x128xf32>
    %63 = vector.extract_strided_slice %6 {offsets = [0, 32], sizes = [32, 32], strides = [1, 1]} : vector<32x128xf32> to vector<32x32xf32>
    %64 = vector.extract_strided_slice %12 {offsets = [1, 0], sizes = [1, 32], strides = [1, 1]} : vector<4x32xf32> to vector<1x32xf32>
    %65 = vector.broadcast %64 : vector<1x32xf32> to vector<32x32xf32>
    %66 = arith.mulf %63, %65 : vector<32x32xf32>
    %cst_24 = arith.constant dense<0.000000e+00> : vector<32xf32>
    %67 = vector.multi_reduction <add>, %66, %cst_24 [1] : vector<32x32xf32> to vector<32xf32>
    %68 = vector.shape_cast %67 : vector<32xf32> to vector<32x1xf32>
    %69 = vector.extract_strided_slice %4 {offsets = [32, 0], sizes = [32, 64], strides = [1, 1]} : vector<128x64xf32> to vector<32x64xf32>
    %70 = vector.extract_strided_slice %11 {offsets = [0, 1], sizes = [32, 1], strides = [1, 1]} : vector<32x4xf32> to vector<32x1xf32>
    %71 = vector.broadcast %70 : vector<32x1xf32> to vector<32x64xf32>
    %72 = arith.mulf %69, %71 : vector<32x64xf32>
    %cst_25 = arith.constant dense<0.000000e+00> : vector<64xf32>
    %73 = vector.multi_reduction <add>, %72, %cst_25 [0] : vector<32x64xf32> to vector<64xf32>
    %74 = vector.shape_cast %73 : vector<64xf32> to vector<1x64xf32>
    %75 = vector.broadcast %68 : vector<32x1xf32> to vector<32x64xf32>
    %76 = vector.broadcast %74 : vector<1x64xf32> to vector<32x64xf32>
    %77 = arith.addf %75, %76 : vector<32x64xf32>
    %cst_26 = arith.constant 0.000000e+00 : f32
    %78 = vector.broadcast %cst_26 : f32 to vector<32x64xf32>
    %79 = arith.cmpf ogt, %77, %78 : vector<32x64xf32>
    %cst_27 = arith.constant 2.000000e-01 : f32
    %80 = vector.broadcast %cst_27 : f32 to vector<32x64xf32>
    %81 = arith.mulf %80, %77 : vector<32x64xf32>
    %82 = arith.select %79, %77, %81 : vector<32x64xi1>, vector<32x64xf32>
    %cst_28 = arith.constant -1.000000e+30 : f32
    %83 = vector.broadcast %cst_28 : f32 to vector<32x64xf32>
    %84 = arith.select %10, %82, %83 : vector<32x64xi1>, vector<32x64xf32>
    %cst_29 = arith.constant dense<0xFF800000> : vector<32xf32>
    %85 = vector.multi_reduction <maximumf>, %84, %cst_29 [1] : vector<32x64xf32> to vector<32xf32>
    %86 = vector.shape_cast %85 : vector<32xf32> to vector<32x1xf32>
    %87 = vector.broadcast %86 : vector<32x1xf32> to vector<32x64xf32>
    %88 = arith.subf %84, %87 : vector<32x64xf32>
    %89 = math.exp %88 : vector<32x64xf32>
    %cst_30 = arith.constant 0.000000e+00 : f32
    %90 = vector.broadcast %cst_30 : f32 to vector<32x64xf32>
    %91 = arith.select %10, %89, %90 : vector<32x64xi1>, vector<32x64xf32>
    %cst_31 = arith.constant dense<0.000000e+00> : vector<32xf32>
    %92 = vector.multi_reduction <add>, %91, %cst_31 [1] : vector<32x64xf32> to vector<32xf32>
    %93 = vector.shape_cast %92 : vector<32xf32> to vector<32x1xf32>
    %cst_32 = arith.constant 0.000000e+00 : f32
    %94 = vector.broadcast %cst_32 : f32 to vector<32x1xf32>
    %95 = arith.cmpf ogt, %93, %94 : vector<32x1xf32>
    %cst_33 = arith.constant 1.000000e+00 : f32
    %96 = vector.broadcast %cst_33 : f32 to vector<32x1xf32>
    %97 = arith.select %95, %93, %96 : vector<32x1xi1>, vector<32x1xf32>
    %98 = vector.broadcast %97 : vector<32x1xf32> to vector<32x64xf32>
    %99 = arith.divf %91, %98 : vector<32x64xf32>
    %100 = arith.truncf %99 : vector<32x64xf32> to vector<32x64xbf16>
    %cst_34 = arith.constant dense<0.000000e+00> : vector<32x128xf32>
    %101 = tpu.matmul %100, %5, %cst_34 {dimension_numbers = #tpu.dot_dimension_numbers<[1], [0], [0], [1], [0, 0, 1, 1], [], []>} : vector<32x64xbf16>, vector<64x128xbf16>, vector<32x128xf32> -> vector<32x128xf32>
    %c32_i32_35 = arith.constant 32 : i32
    %102 = vector.broadcast %c32_i32_35 : i32 to vector<1x128xi32>
    %103 = arith.cmpi sge, %14, %102 : vector<1x128xi32>
    %c64_i32 = arith.constant 64 : i32
    %104 = vector.broadcast %c64_i32 : i32 to vector<1x128xi32>
    %105 = arith.cmpi slt, %14, %104 : vector<1x128xi32>
    %106 = arith.andi %103, %105 : vector<1x128xi1>
    %107 = vector.shape_cast %106 : vector<1x128xi1> to vector<1x128xi1>
    %108 = vector.broadcast %107 : vector<1x128xi1> to vector<32x128xi1>
    %109 = arith.select %108, %101, %62 : vector<32x128xi1>, vector<32x128xf32>
    %110 = vector.extract_strided_slice %6 {offsets = [0, 64], sizes = [32, 32], strides = [1, 1]} : vector<32x128xf32> to vector<32x32xf32>
    %111 = vector.extract_strided_slice %12 {offsets = [2, 0], sizes = [1, 32], strides = [1, 1]} : vector<4x32xf32> to vector<1x32xf32>
    %112 = vector.broadcast %111 : vector<1x32xf32> to vector<32x32xf32>
    %113 = arith.mulf %110, %112 : vector<32x32xf32>
    %cst_36 = arith.constant dense<0.000000e+00> : vector<32xf32>
    %114 = vector.multi_reduction <add>, %113, %cst_36 [1] : vector<32x32xf32> to vector<32xf32>
    %115 = vector.shape_cast %114 : vector<32xf32> to vector<32x1xf32>
    %116 = vector.extract_strided_slice %4 {offsets = [64, 0], sizes = [32, 64], strides = [1, 1]} : vector<128x64xf32> to vector<32x64xf32>
    %117 = vector.extract_strided_slice %11 {offsets = [0, 2], sizes = [32, 1], strides = [1, 1]} : vector<32x4xf32> to vector<32x1xf32>
    %118 = vector.broadcast %117 : vector<32x1xf32> to vector<32x64xf32>
    %119 = arith.mulf %116, %118 : vector<32x64xf32>
    %cst_37 = arith.constant dense<0.000000e+00> : vector<64xf32>
    %120 = vector.multi_reduction <add>, %119, %cst_37 [0] : vector<32x64xf32> to vector<64xf32>
    %121 = vector.shape_cast %120 : vector<64xf32> to vector<1x64xf32>
    %122 = vector.broadcast %115 : vector<32x1xf32> to vector<32x64xf32>
    %123 = vector.broadcast %121 : vector<1x64xf32> to vector<32x64xf32>
    %124 = arith.addf %122, %123 : vector<32x64xf32>
    %cst_38 = arith.constant 0.000000e+00 : f32
    %125 = vector.broadcast %cst_38 : f32 to vector<32x64xf32>
    %126 = arith.cmpf ogt, %124, %125 : vector<32x64xf32>
    %cst_39 = arith.constant 2.000000e-01 : f32
    %127 = vector.broadcast %cst_39 : f32 to vector<32x64xf32>
    %128 = arith.mulf %127, %124 : vector<32x64xf32>
    %129 = arith.select %126, %124, %128 : vector<32x64xi1>, vector<32x64xf32>
    %cst_40 = arith.constant -1.000000e+30 : f32
    %130 = vector.broadcast %cst_40 : f32 to vector<32x64xf32>
    %131 = arith.select %10, %129, %130 : vector<32x64xi1>, vector<32x64xf32>
    %cst_41 = arith.constant dense<0xFF800000> : vector<32xf32>
    %132 = vector.multi_reduction <maximumf>, %131, %cst_41 [1] : vector<32x64xf32> to vector<32xf32>
    %133 = vector.shape_cast %132 : vector<32xf32> to vector<32x1xf32>
    %134 = vector.broadcast %133 : vector<32x1xf32> to vector<32x64xf32>
    %135 = arith.subf %131, %134 : vector<32x64xf32>
    %136 = math.exp %135 : vector<32x64xf32>
    %cst_42 = arith.constant 0.000000e+00 : f32
    %137 = vector.broadcast %cst_42 : f32 to vector<32x64xf32>
    %138 = arith.select %10, %136, %137 : vector<32x64xi1>, vector<32x64xf32>
    %cst_43 = arith.constant dense<0.000000e+00> : vector<32xf32>
    %139 = vector.multi_reduction <add>, %138, %cst_43 [1] : vector<32x64xf32> to vector<32xf32>
    %140 = vector.shape_cast %139 : vector<32xf32> to vector<32x1xf32>
    %cst_44 = arith.constant 0.000000e+00 : f32
    %141 = vector.broadcast %cst_44 : f32 to vector<32x1xf32>
    %142 = arith.cmpf ogt, %140, %141 : vector<32x1xf32>
    %cst_45 = arith.constant 1.000000e+00 : f32
    %143 = vector.broadcast %cst_45 : f32 to vector<32x1xf32>
    %144 = arith.select %142, %140, %143 : vector<32x1xi1>, vector<32x1xf32>
    %145 = vector.broadcast %144 : vector<32x1xf32> to vector<32x64xf32>
    %146 = arith.divf %138, %145 : vector<32x64xf32>
    %147 = arith.truncf %146 : vector<32x64xf32> to vector<32x64xbf16>
    %cst_46 = arith.constant dense<0.000000e+00> : vector<32x128xf32>
    %148 = tpu.matmul %147, %5, %cst_46 {dimension_numbers = #tpu.dot_dimension_numbers<[1], [0], [0], [1], [0, 0, 1, 1], [], []>} : vector<32x64xbf16>, vector<64x128xbf16>, vector<32x128xf32> -> vector<32x128xf32>
    %c64_i32_47 = arith.constant 64 : i32
    %149 = vector.broadcast %c64_i32_47 : i32 to vector<1x128xi32>
    %150 = arith.cmpi sge, %14, %149 : vector<1x128xi32>
    %c96_i32 = arith.constant 96 : i32
    %151 = vector.broadcast %c96_i32 : i32 to vector<1x128xi32>
    %152 = arith.cmpi slt, %14, %151 : vector<1x128xi32>
    %153 = arith.andi %150, %152 : vector<1x128xi1>
    %154 = vector.shape_cast %153 : vector<1x128xi1> to vector<1x128xi1>
    %155 = vector.broadcast %154 : vector<1x128xi1> to vector<32x128xi1>
    %156 = arith.select %155, %148, %109 : vector<32x128xi1>, vector<32x128xf32>
    %157 = vector.extract_strided_slice %6 {offsets = [0, 96], sizes = [32, 32], strides = [1, 1]} : vector<32x128xf32> to vector<32x32xf32>
    %158 = vector.extract_strided_slice %12 {offsets = [3, 0], sizes = [1, 32], strides = [1, 1]} : vector<4x32xf32> to vector<1x32xf32>
    %159 = vector.broadcast %158 : vector<1x32xf32> to vector<32x32xf32>
    %160 = arith.mulf %157, %159 : vector<32x32xf32>
    %cst_48 = arith.constant dense<0.000000e+00> : vector<32xf32>
    %161 = vector.multi_reduction <add>, %160, %cst_48 [1] : vector<32x32xf32> to vector<32xf32>
    %162 = vector.shape_cast %161 : vector<32xf32> to vector<32x1xf32>
    %163 = vector.extract_strided_slice %4 {offsets = [96, 0], sizes = [32, 64], strides = [1, 1]} : vector<128x64xf32> to vector<32x64xf32>
    %164 = vector.extract_strided_slice %11 {offsets = [0, 3], sizes = [32, 1], strides = [1, 1]} : vector<32x4xf32> to vector<32x1xf32>
    %165 = vector.broadcast %164 : vector<32x1xf32> to vector<32x64xf32>
    %166 = arith.mulf %163, %165 : vector<32x64xf32>
    %cst_49 = arith.constant dense<0.000000e+00> : vector<64xf32>
    %167 = vector.multi_reduction <add>, %166, %cst_49 [0] : vector<32x64xf32> to vector<64xf32>
    %168 = vector.shape_cast %167 : vector<64xf32> to vector<1x64xf32>
    %169 = vector.broadcast %162 : vector<32x1xf32> to vector<32x64xf32>
    %170 = vector.broadcast %168 : vector<1x64xf32> to vector<32x64xf32>
    %171 = arith.addf %169, %170 : vector<32x64xf32>
    %cst_50 = arith.constant 0.000000e+00 : f32
    %172 = vector.broadcast %cst_50 : f32 to vector<32x64xf32>
    %173 = arith.cmpf ogt, %171, %172 : vector<32x64xf32>
    %cst_51 = arith.constant 2.000000e-01 : f32
    %174 = vector.broadcast %cst_51 : f32 to vector<32x64xf32>
    %175 = arith.mulf %174, %171 : vector<32x64xf32>
    %176 = arith.select %173, %171, %175 : vector<32x64xi1>, vector<32x64xf32>
    %cst_52 = arith.constant -1.000000e+30 : f32
    %177 = vector.broadcast %cst_52 : f32 to vector<32x64xf32>
    %178 = arith.select %10, %176, %177 : vector<32x64xi1>, vector<32x64xf32>
    %cst_53 = arith.constant dense<0xFF800000> : vector<32xf32>
    %179 = vector.multi_reduction <maximumf>, %178, %cst_53 [1] : vector<32x64xf32> to vector<32xf32>
    %180 = vector.shape_cast %179 : vector<32xf32> to vector<32x1xf32>
    %181 = vector.broadcast %180 : vector<32x1xf32> to vector<32x64xf32>
    %182 = arith.subf %178, %181 : vector<32x64xf32>
    %183 = math.exp %182 : vector<32x64xf32>
    %cst_54 = arith.constant 0.000000e+00 : f32
    %184 = vector.broadcast %cst_54 : f32 to vector<32x64xf32>
    %185 = arith.select %10, %183, %184 : vector<32x64xi1>, vector<32x64xf32>
    %cst_55 = arith.constant dense<0.000000e+00> : vector<32xf32>
    %186 = vector.multi_reduction <add>, %185, %cst_55 [1] : vector<32x64xf32> to vector<32xf32>
    %187 = vector.shape_cast %186 : vector<32xf32> to vector<32x1xf32>
    %cst_56 = arith.constant 0.000000e+00 : f32
    %188 = vector.broadcast %cst_56 : f32 to vector<32x1xf32>
    %189 = arith.cmpf ogt, %187, %188 : vector<32x1xf32>
    %cst_57 = arith.constant 1.000000e+00 : f32
    %190 = vector.broadcast %cst_57 : f32 to vector<32x1xf32>
    %191 = arith.select %189, %187, %190 : vector<32x1xi1>, vector<32x1xf32>
    %192 = vector.broadcast %191 : vector<32x1xf32> to vector<32x64xf32>
    %193 = arith.divf %185, %192 : vector<32x64xf32>
    %194 = arith.truncf %193 : vector<32x64xf32> to vector<32x64xbf16>
    %cst_58 = arith.constant dense<0.000000e+00> : vector<32x128xf32>
    %195 = tpu.matmul %194, %5, %cst_58 {dimension_numbers = #tpu.dot_dimension_numbers<[1], [0], [0], [1], [0, 0, 1, 1], [], []>} : vector<32x64xbf16>, vector<64x128xbf16>, vector<32x128xf32> -> vector<32x128xf32>
    %c96_i32_59 = arith.constant 96 : i32
    %196 = vector.broadcast %c96_i32_59 : i32 to vector<1x128xi32>
    %197 = arith.cmpi sge, %14, %196 : vector<1x128xi32>
    %c128_i32 = arith.constant 128 : i32
    %198 = vector.broadcast %c128_i32 : i32 to vector<1x128xi32>
    %199 = arith.cmpi slt, %14, %198 : vector<1x128xi32>
    %200 = arith.andi %197, %199 : vector<1x128xi1>
    %201 = vector.shape_cast %200 : vector<1x128xi1> to vector<1x128xi1>
    %202 = vector.broadcast %201 : vector<1x128xi1> to vector<32x128xi1>
    %203 = arith.select %202, %195, %156 : vector<32x128xi1>, vector<32x128xf32>
    %204 = vector.broadcast %13 : vector<1x128xf32> to vector<32x128xf32>
    %205 = arith.addf %203, %204 : vector<32x128xf32>
    %cst_60 = arith.constant 0.000000e+00 : f32
    %206 = vector.broadcast %cst_60 : f32 to vector<32x128xf32>
    %207 = arith.cmpf ogt, %205, %206 : vector<32x128xf32>
    %cst_61 = arith.constant 0.000000e+00 : f32
    %208 = vector.broadcast %cst_61 : f32 to vector<32x128xf32>
    %209 = arith.minimumf %205, %208 : vector<32x128xf32>
    %210 = math.exp %209 : vector<32x128xf32>
    %cst_62 = arith.constant 1.000000e+00 : f32
    %211 = vector.broadcast %cst_62 : f32 to vector<32x128xf32>
    %212 = arith.subf %210, %211 : vector<32x128xf32>
    %213 = arith.select %207, %205, %212 : vector<32x128xi1>, vector<32x128xf32>
    %214 = arith.truncf %213 : vector<32x128xf32> to vector<32x128xbf16>
    %c0_63 = arith.constant 0 : index
    %c0_64 = arith.constant 0 : index
    %215 = vector.load %arg6[%c0_63, %c0_64] : memref<128x128xbf16, #tpu.memory_space<vmem>>, vector<128x128xbf16>
    %cst_65 = arith.constant dense<0.000000e+00> : vector<32x128xf32>
    %216 = tpu.matmul %214, %215, %cst_65 {dimension_numbers = #tpu.dot_dimension_numbers<[1], [0], [0], [1], [0, 0, 1, 1], [], []>} : vector<32x128xbf16>, vector<128x128xbf16>, vector<32x128xf32> -> vector<32x128xf32>
    %217 = tpu.transpose %216, [1, 0] : vector<32x128xf32> -> vector<128x32xf32>
    %218 = arith.truncf %216 : vector<32x128xf32> to vector<32x128xbf16>
    %219 = vector.extract_strided_slice %216 {offsets = [0, 0], sizes = [16, 128], strides = [1, 1]} : vector<32x128xf32> to vector<16x128xf32>
    %c0_66 = arith.constant 0 : index
    %c0_67 = arith.constant 0 : index
    %220 = vector.load %arg10[%c0_66, %c0_67] : memref<16x32xi8, #tpu.memory_space<vmem>>, vector<16x32xi8>
    %221 = arith.sitofp %220 : vector<16x32xi8> to vector<16x32xf32>
    %cst_68 = arith.constant 0.000000e+00 : f32
    %222 = vector.broadcast %cst_68 : f32 to vector<16x32xf32>
    %223 = arith.cmpf ogt, %221, %222 : vector<16x32xf32>
    %c0_69 = arith.constant 0 : index
    %c0_70 = arith.constant 0 : index
    %224 = vector.load %arg7[%c0_69, %c0_70] : memref<32x4xf32, #tpu.memory_space<vmem>>, vector<32x4xf32>
    %c0_71 = arith.constant 0 : index
    %c0_72 = arith.constant 0 : index
    %225 = vector.load %arg8[%c0_71, %c0_72] : memref<4x32xf32, #tpu.memory_space<vmem>>, vector<4x32xf32>
    %c0_73 = arith.constant 0 : index
    %c0_74 = arith.constant 0 : index
    %226 = vector.load %arg9[%c0_73, %c0_74] : memref<1x128xf32, #tpu.memory_space<vmem>>, vector<1x128xf32>
    %227 = tpu.iota {dimensions = array<i32: 1>} : vector<1x128xi32>
    %cst_75 = arith.constant 0.000000e+00 : f32
    %228 = vector.broadcast %cst_75 : f32 to vector<16x128xf32>
    %229 = vector.extract_strided_slice %219 {offsets = [0, 0], sizes = [16, 32], strides = [1, 1]} : vector<16x128xf32> to vector<16x32xf32>
    %230 = vector.extract_strided_slice %225 {offsets = [0, 0], sizes = [1, 32], strides = [1, 1]} : vector<4x32xf32> to vector<1x32xf32>
    %231 = vector.broadcast %230 : vector<1x32xf32> to vector<16x32xf32>
    %232 = arith.mulf %229, %231 : vector<16x32xf32>
    %cst_76 = arith.constant dense<0.000000e+00> : vector<16xf32>
    %233 = vector.multi_reduction <add>, %232, %cst_76 [1] : vector<16x32xf32> to vector<16xf32>
    %234 = vector.shape_cast %233 : vector<16xf32> to vector<16x1xf32>
    %235 = vector.extract_strided_slice %217 {offsets = [0, 0], sizes = [32, 32], strides = [1, 1]} : vector<128x32xf32> to vector<32x32xf32>
    %236 = vector.extract_strided_slice %224 {offsets = [0, 0], sizes = [32, 1], strides = [1, 1]} : vector<32x4xf32> to vector<32x1xf32>
    %237 = vector.broadcast %236 : vector<32x1xf32> to vector<32x32xf32>
    %238 = arith.mulf %235, %237 : vector<32x32xf32>
    %cst_77 = arith.constant dense<0.000000e+00> : vector<32xf32>
    %239 = vector.multi_reduction <add>, %238, %cst_77 [0] : vector<32x32xf32> to vector<32xf32>
    %240 = vector.shape_cast %239 : vector<32xf32> to vector<1x32xf32>
    %241 = vector.broadcast %234 : vector<16x1xf32> to vector<16x32xf32>
    %242 = vector.broadcast %240 : vector<1x32xf32> to vector<16x32xf32>
    %243 = arith.addf %241, %242 : vector<16x32xf32>
    %cst_78 = arith.constant 0.000000e+00 : f32
    %244 = vector.broadcast %cst_78 : f32 to vector<16x32xf32>
    %245 = arith.cmpf ogt, %243, %244 : vector<16x32xf32>
    %cst_79 = arith.constant 2.000000e-01 : f32
    %246 = vector.broadcast %cst_79 : f32 to vector<16x32xf32>
    %247 = arith.mulf %246, %243 : vector<16x32xf32>
    %248 = arith.select %245, %243, %247 : vector<16x32xi1>, vector<16x32xf32>
    %cst_80 = arith.constant -1.000000e+30 : f32
    %249 = vector.broadcast %cst_80 : f32 to vector<16x32xf32>
    %250 = arith.select %223, %248, %249 : vector<16x32xi1>, vector<16x32xf32>
    %cst_81 = arith.constant dense<0xFF800000> : vector<16xf32>
    %251 = vector.multi_reduction <maximumf>, %250, %cst_81 [1] : vector<16x32xf32> to vector<16xf32>
    %252 = vector.shape_cast %251 : vector<16xf32> to vector<16x1xf32>
    %253 = vector.broadcast %252 : vector<16x1xf32> to vector<16x32xf32>
    %254 = arith.subf %250, %253 : vector<16x32xf32>
    %255 = math.exp %254 : vector<16x32xf32>
    %cst_82 = arith.constant 0.000000e+00 : f32
    %256 = vector.broadcast %cst_82 : f32 to vector<16x32xf32>
    %257 = arith.select %223, %255, %256 : vector<16x32xi1>, vector<16x32xf32>
    %cst_83 = arith.constant dense<0.000000e+00> : vector<16xf32>
    %258 = vector.multi_reduction <add>, %257, %cst_83 [1] : vector<16x32xf32> to vector<16xf32>
    %259 = vector.shape_cast %258 : vector<16xf32> to vector<16x1xf32>
    %cst_84 = arith.constant 0.000000e+00 : f32
    %260 = vector.broadcast %cst_84 : f32 to vector<16x1xf32>
    %261 = arith.cmpf ogt, %259, %260 : vector<16x1xf32>
    %cst_85 = arith.constant 1.000000e+00 : f32
    %262 = vector.broadcast %cst_85 : f32 to vector<16x1xf32>
    %263 = arith.select %261, %259, %262 : vector<16x1xi1>, vector<16x1xf32>
    %264 = vector.broadcast %263 : vector<16x1xf32> to vector<16x32xf32>
    %265 = arith.divf %257, %264 : vector<16x32xf32>
    %266 = arith.truncf %265 : vector<16x32xf32> to vector<16x32xbf16>
    %cst_86 = arith.constant dense<0.000000e+00> : vector<16x128xf32>
    %267 = tpu.matmul %266, %218, %cst_86 {dimension_numbers = #tpu.dot_dimension_numbers<[1], [0], [0], [1], [0, 0, 1, 1], [], []>} : vector<16x32xbf16>, vector<32x128xbf16>, vector<16x128xf32> -> vector<16x128xf32>
    %c0_i32_87 = arith.constant 0 : i32
    %268 = vector.broadcast %c0_i32_87 : i32 to vector<1x128xi32>
    %269 = arith.cmpi sge, %227, %268 : vector<1x128xi32>
    %c32_i32_88 = arith.constant 32 : i32
    %270 = vector.broadcast %c32_i32_88 : i32 to vector<1x128xi32>
    %271 = arith.cmpi slt, %227, %270 : vector<1x128xi32>
    %272 = arith.andi %269, %271 : vector<1x128xi1>
    %273 = vector.shape_cast %272 : vector<1x128xi1> to vector<1x128xi1>
    %274 = vector.broadcast %273 : vector<1x128xi1> to vector<16x128xi1>
    %275 = arith.select %274, %267, %228 : vector<16x128xi1>, vector<16x128xf32>
    %276 = vector.extract_strided_slice %219 {offsets = [0, 32], sizes = [16, 32], strides = [1, 1]} : vector<16x128xf32> to vector<16x32xf32>
    %277 = vector.extract_strided_slice %225 {offsets = [1, 0], sizes = [1, 32], strides = [1, 1]} : vector<4x32xf32> to vector<1x32xf32>
    %278 = vector.broadcast %277 : vector<1x32xf32> to vector<16x32xf32>
    %279 = arith.mulf %276, %278 : vector<16x32xf32>
    %cst_89 = arith.constant dense<0.000000e+00> : vector<16xf32>
    %280 = vector.multi_reduction <add>, %279, %cst_89 [1] : vector<16x32xf32> to vector<16xf32>
    %281 = vector.shape_cast %280 : vector<16xf32> to vector<16x1xf32>
    %282 = vector.extract_strided_slice %217 {offsets = [32, 0], sizes = [32, 32], strides = [1, 1]} : vector<128x32xf32> to vector<32x32xf32>
    %283 = vector.extract_strided_slice %224 {offsets = [0, 1], sizes = [32, 1], strides = [1, 1]} : vector<32x4xf32> to vector<32x1xf32>
    %284 = vector.broadcast %283 : vector<32x1xf32> to vector<32x32xf32>
    %285 = arith.mulf %282, %284 : vector<32x32xf32>
    %cst_90 = arith.constant dense<0.000000e+00> : vector<32xf32>
    %286 = vector.multi_reduction <add>, %285, %cst_90 [0] : vector<32x32xf32> to vector<32xf32>
    %287 = vector.shape_cast %286 : vector<32xf32> to vector<1x32xf32>
    %288 = vector.broadcast %281 : vector<16x1xf32> to vector<16x32xf32>
    %289 = vector.broadcast %287 : vector<1x32xf32> to vector<16x32xf32>
    %290 = arith.addf %288, %289 : vector<16x32xf32>
    %cst_91 = arith.constant 0.000000e+00 : f32
    %291 = vector.broadcast %cst_91 : f32 to vector<16x32xf32>
    %292 = arith.cmpf ogt, %290, %291 : vector<16x32xf32>
    %cst_92 = arith.constant 2.000000e-01 : f32
    %293 = vector.broadcast %cst_92 : f32 to vector<16x32xf32>
    %294 = arith.mulf %293, %290 : vector<16x32xf32>
    %295 = arith.select %292, %290, %294 : vector<16x32xi1>, vector<16x32xf32>
    %cst_93 = arith.constant -1.000000e+30 : f32
    %296 = vector.broadcast %cst_93 : f32 to vector<16x32xf32>
    %297 = arith.select %223, %295, %296 : vector<16x32xi1>, vector<16x32xf32>
    %cst_94 = arith.constant dense<0xFF800000> : vector<16xf32>
    %298 = vector.multi_reduction <maximumf>, %297, %cst_94 [1] : vector<16x32xf32> to vector<16xf32>
    %299 = vector.shape_cast %298 : vector<16xf32> to vector<16x1xf32>
    %300 = vector.broadcast %299 : vector<16x1xf32> to vector<16x32xf32>
    %301 = arith.subf %297, %300 : vector<16x32xf32>
    %302 = math.exp %301 : vector<16x32xf32>
    %cst_95 = arith.constant 0.000000e+00 : f32
    %303 = vector.broadcast %cst_95 : f32 to vector<16x32xf32>
    %304 = arith.select %223, %302, %303 : vector<16x32xi1>, vector<16x32xf32>
    %cst_96 = arith.constant dense<0.000000e+00> : vector<16xf32>
    %305 = vector.multi_reduction <add>, %304, %cst_96 [1] : vector<16x32xf32> to vector<16xf32>
    %306 = vector.shape_cast %305 : vector<16xf32> to vector<16x1xf32>
    %cst_97 = arith.constant 0.000000e+00 : f32
    %307 = vector.broadcast %cst_97 : f32 to vector<16x1xf32>
    %308 = arith.cmpf ogt, %306, %307 : vector<16x1xf32>
    %cst_98 = arith.constant 1.000000e+00 : f32
    %309 = vector.broadcast %cst_98 : f32 to vector<16x1xf32>
    %310 = arith.select %308, %306, %309 : vector<16x1xi1>, vector<16x1xf32>
    %311 = vector.broadcast %310 : vector<16x1xf32> to vector<16x32xf32>
    %312 = arith.divf %304, %311 : vector<16x32xf32>
    %313 = arith.truncf %312 : vector<16x32xf32> to vector<16x32xbf16>
    %cst_99 = arith.constant dense<0.000000e+00> : vector<16x128xf32>
    %314 = tpu.matmul %313, %218, %cst_99 {dimension_numbers = #tpu.dot_dimension_numbers<[1], [0], [0], [1], [0, 0, 1, 1], [], []>} : vector<16x32xbf16>, vector<32x128xbf16>, vector<16x128xf32> -> vector<16x128xf32>
    %c32_i32_100 = arith.constant 32 : i32
    %315 = vector.broadcast %c32_i32_100 : i32 to vector<1x128xi32>
    %316 = arith.cmpi sge, %227, %315 : vector<1x128xi32>
    %c64_i32_101 = arith.constant 64 : i32
    %317 = vector.broadcast %c64_i32_101 : i32 to vector<1x128xi32>
    %318 = arith.cmpi slt, %227, %317 : vector<1x128xi32>
    %319 = arith.andi %316, %318 : vector<1x128xi1>
    %320 = vector.shape_cast %319 : vector<1x128xi1> to vector<1x128xi1>
    %321 = vector.broadcast %320 : vector<1x128xi1> to vector<16x128xi1>
    %322 = arith.select %321, %314, %275 : vector<16x128xi1>, vector<16x128xf32>
    %323 = vector.extract_strided_slice %219 {offsets = [0, 64], sizes = [16, 32], strides = [1, 1]} : vector<16x128xf32> to vector<16x32xf32>
    %324 = vector.extract_strided_slice %225 {offsets = [2, 0], sizes = [1, 32], strides = [1, 1]} : vector<4x32xf32> to vector<1x32xf32>
    %325 = vector.broadcast %324 : vector<1x32xf32> to vector<16x32xf32>
    %326 = arith.mulf %323, %325 : vector<16x32xf32>
    %cst_102 = arith.constant dense<0.000000e+00> : vector<16xf32>
    %327 = vector.multi_reduction <add>, %326, %cst_102 [1] : vector<16x32xf32> to vector<16xf32>
    %328 = vector.shape_cast %327 : vector<16xf32> to vector<16x1xf32>
    %329 = vector.extract_strided_slice %217 {offsets = [64, 0], sizes = [32, 32], strides = [1, 1]} : vector<128x32xf32> to vector<32x32xf32>
    %330 = vector.extract_strided_slice %224 {offsets = [0, 2], sizes = [32, 1], strides = [1, 1]} : vector<32x4xf32> to vector<32x1xf32>
    %331 = vector.broadcast %330 : vector<32x1xf32> to vector<32x32xf32>
    %332 = arith.mulf %329, %331 : vector<32x32xf32>
    %cst_103 = arith.constant dense<0.000000e+00> : vector<32xf32>
    %333 = vector.multi_reduction <add>, %332, %cst_103 [0] : vector<32x32xf32> to vector<32xf32>
    %334 = vector.shape_cast %333 : vector<32xf32> to vector<1x32xf32>
    %335 = vector.broadcast %328 : vector<16x1xf32> to vector<16x32xf32>
    %336 = vector.broadcast %334 : vector<1x32xf32> to vector<16x32xf32>
    %337 = arith.addf %335, %336 : vector<16x32xf32>
    %cst_104 = arith.constant 0.000000e+00 : f32
    %338 = vector.broadcast %cst_104 : f32 to vector<16x32xf32>
    %339 = arith.cmpf ogt, %337, %338 : vector<16x32xf32>
    %cst_105 = arith.constant 2.000000e-01 : f32
    %340 = vector.broadcast %cst_105 : f32 to vector<16x32xf32>
    %341 = arith.mulf %340, %337 : vector<16x32xf32>
    %342 = arith.select %339, %337, %341 : vector<16x32xi1>, vector<16x32xf32>
    %cst_106 = arith.constant -1.000000e+30 : f32
    %343 = vector.broadcast %cst_106 : f32 to vector<16x32xf32>
    %344 = arith.select %223, %342, %343 : vector<16x32xi1>, vector<16x32xf32>
    %cst_107 = arith.constant dense<0xFF800000> : vector<16xf32>
    %345 = vector.multi_reduction <maximumf>, %344, %cst_107 [1] : vector<16x32xf32> to vector<16xf32>
    %346 = vector.shape_cast %345 : vector<16xf32> to vector<16x1xf32>
    %347 = vector.broadcast %346 : vector<16x1xf32> to vector<16x32xf32>
    %348 = arith.subf %344, %347 : vector<16x32xf32>
    %349 = math.exp %348 : vector<16x32xf32>
    %cst_108 = arith.constant 0.000000e+00 : f32
    %350 = vector.broadcast %cst_108 : f32 to vector<16x32xf32>
    %351 = arith.select %223, %349, %350 : vector<16x32xi1>, vector<16x32xf32>
    %cst_109 = arith.constant dense<0.000000e+00> : vector<16xf32>
    %352 = vector.multi_reduction <add>, %351, %cst_109 [1] : vector<16x32xf32> to vector<16xf32>
    %353 = vector.shape_cast %352 : vector<16xf32> to vector<16x1xf32>
    %cst_110 = arith.constant 0.000000e+00 : f32
    %354 = vector.broadcast %cst_110 : f32 to vector<16x1xf32>
    %355 = arith.cmpf ogt, %353, %354 : vector<16x1xf32>
    %cst_111 = arith.constant 1.000000e+00 : f32
    %356 = vector.broadcast %cst_111 : f32 to vector<16x1xf32>
    %357 = arith.select %355, %353, %356 : vector<16x1xi1>, vector<16x1xf32>
    %358 = vector.broadcast %357 : vector<16x1xf32> to vector<16x32xf32>
    %359 = arith.divf %351, %358 : vector<16x32xf32>
    %360 = arith.truncf %359 : vector<16x32xf32> to vector<16x32xbf16>
    %cst_112 = arith.constant dense<0.000000e+00> : vector<16x128xf32>
    %361 = tpu.matmul %360, %218, %cst_112 {dimension_numbers = #tpu.dot_dimension_numbers<[1], [0], [0], [1], [0, 0, 1, 1], [], []>} : vector<16x32xbf16>, vector<32x128xbf16>, vector<16x128xf32> -> vector<16x128xf32>
    %c64_i32_113 = arith.constant 64 : i32
    %362 = vector.broadcast %c64_i32_113 : i32 to vector<1x128xi32>
    %363 = arith.cmpi sge, %227, %362 : vector<1x128xi32>
    %c96_i32_114 = arith.constant 96 : i32
    %364 = vector.broadcast %c96_i32_114 : i32 to vector<1x128xi32>
    %365 = arith.cmpi slt, %227, %364 : vector<1x128xi32>
    %366 = arith.andi %363, %365 : vector<1x128xi1>
    %367 = vector.shape_cast %366 : vector<1x128xi1> to vector<1x128xi1>
    %368 = vector.broadcast %367 : vector<1x128xi1> to vector<16x128xi1>
    %369 = arith.select %368, %361, %322 : vector<16x128xi1>, vector<16x128xf32>
    %370 = vector.extract_strided_slice %219 {offsets = [0, 96], sizes = [16, 32], strides = [1, 1]} : vector<16x128xf32> to vector<16x32xf32>
    %371 = vector.extract_strided_slice %225 {offsets = [3, 0], sizes = [1, 32], strides = [1, 1]} : vector<4x32xf32> to vector<1x32xf32>
    %372 = vector.broadcast %371 : vector<1x32xf32> to vector<16x32xf32>
    %373 = arith.mulf %370, %372 : vector<16x32xf32>
    %cst_115 = arith.constant dense<0.000000e+00> : vector<16xf32>
    %374 = vector.multi_reduction <add>, %373, %cst_115 [1] : vector<16x32xf32> to vector<16xf32>
    %375 = vector.shape_cast %374 : vector<16xf32> to vector<16x1xf32>
    %376 = vector.extract_strided_slice %217 {offsets = [96, 0], sizes = [32, 32], strides = [1, 1]} : vector<128x32xf32> to vector<32x32xf32>
    %377 = vector.extract_strided_slice %224 {offsets = [0, 3], sizes = [32, 1], strides = [1, 1]} : vector<32x4xf32> to vector<32x1xf32>
    %378 = vector.broadcast %377 : vector<32x1xf32> to vector<32x32xf32>
    %379 = arith.mulf %376, %378 : vector<32x32xf32>
    %cst_116 = arith.constant dense<0.000000e+00> : vector<32xf32>
    %380 = vector.multi_reduction <add>, %379, %cst_116 [0] : vector<32x32xf32> to vector<32xf32>
    %381 = vector.shape_cast %380 : vector<32xf32> to vector<1x32xf32>
    %382 = vector.broadcast %375 : vector<16x1xf32> to vector<16x32xf32>
    %383 = vector.broadcast %381 : vector<1x32xf32> to vector<16x32xf32>
    %384 = arith.addf %382, %383 : vector<16x32xf32>
    %cst_117 = arith.constant 0.000000e+00 : f32
    %385 = vector.broadcast %cst_117 : f32 to vector<16x32xf32>
    %386 = arith.cmpf ogt, %384, %385 : vector<16x32xf32>
    %cst_118 = arith.constant 2.000000e-01 : f32
    %387 = vector.broadcast %cst_118 : f32 to vector<16x32xf32>
    %388 = arith.mulf %387, %384 : vector<16x32xf32>
    %389 = arith.select %386, %384, %388 : vector<16x32xi1>, vector<16x32xf32>
    %cst_119 = arith.constant -1.000000e+30 : f32
    %390 = vector.broadcast %cst_119 : f32 to vector<16x32xf32>
    %391 = arith.select %223, %389, %390 : vector<16x32xi1>, vector<16x32xf32>
    %cst_120 = arith.constant dense<0xFF800000> : vector<16xf32>
    %392 = vector.multi_reduction <maximumf>, %391, %cst_120 [1] : vector<16x32xf32> to vector<16xf32>
    %393 = vector.shape_cast %392 : vector<16xf32> to vector<16x1xf32>
    %394 = vector.broadcast %393 : vector<16x1xf32> to vector<16x32xf32>
    %395 = arith.subf %391, %394 : vector<16x32xf32>
    %396 = math.exp %395 : vector<16x32xf32>
    %cst_121 = arith.constant 0.000000e+00 : f32
    %397 = vector.broadcast %cst_121 : f32 to vector<16x32xf32>
    %398 = arith.select %223, %396, %397 : vector<16x32xi1>, vector<16x32xf32>
    %cst_122 = arith.constant dense<0.000000e+00> : vector<16xf32>
    %399 = vector.multi_reduction <add>, %398, %cst_122 [1] : vector<16x32xf32> to vector<16xf32>
    %400 = vector.shape_cast %399 : vector<16xf32> to vector<16x1xf32>
    %cst_123 = arith.constant 0.000000e+00 : f32
    %401 = vector.broadcast %cst_123 : f32 to vector<16x1xf32>
    %402 = arith.cmpf ogt, %400, %401 : vector<16x1xf32>
    %cst_124 = arith.constant 1.000000e+00 : f32
    %403 = vector.broadcast %cst_124 : f32 to vector<16x1xf32>
    %404 = arith.select %402, %400, %403 : vector<16x1xi1>, vector<16x1xf32>
    %405 = vector.broadcast %404 : vector<16x1xf32> to vector<16x32xf32>
    %406 = arith.divf %398, %405 : vector<16x32xf32>
    %407 = arith.truncf %406 : vector<16x32xf32> to vector<16x32xbf16>
    %cst_125 = arith.constant dense<0.000000e+00> : vector<16x128xf32>
    %408 = tpu.matmul %407, %218, %cst_125 {dimension_numbers = #tpu.dot_dimension_numbers<[1], [0], [0], [1], [0, 0, 1, 1], [], []>} : vector<16x32xbf16>, vector<32x128xbf16>, vector<16x128xf32> -> vector<16x128xf32>
    %c96_i32_126 = arith.constant 96 : i32
    %409 = vector.broadcast %c96_i32_126 : i32 to vector<1x128xi32>
    %410 = arith.cmpi sge, %227, %409 : vector<1x128xi32>
    %c128_i32_127 = arith.constant 128 : i32
    %411 = vector.broadcast %c128_i32_127 : i32 to vector<1x128xi32>
    %412 = arith.cmpi slt, %227, %411 : vector<1x128xi32>
    %413 = arith.andi %410, %412 : vector<1x128xi1>
    %414 = vector.shape_cast %413 : vector<1x128xi1> to vector<1x128xi1>
    %415 = vector.broadcast %414 : vector<1x128xi1> to vector<16x128xi1>
    %416 = arith.select %415, %408, %369 : vector<16x128xi1>, vector<16x128xf32>
    %417 = vector.broadcast %226 : vector<1x128xf32> to vector<16x128xf32>
    %418 = arith.addf %416, %417 : vector<16x128xf32>
    %cst_128 = arith.constant 0.000000e+00 : f32
    %419 = vector.broadcast %cst_128 : f32 to vector<16x128xf32>
    %420 = arith.cmpf ogt, %418, %419 : vector<16x128xf32>
    %cst_129 = arith.constant 0.000000e+00 : f32
    %421 = vector.broadcast %cst_129 : f32 to vector<16x128xf32>
    %422 = arith.minimumf %418, %421 : vector<16x128xf32>
    %423 = math.exp %422 : vector<16x128xf32>
    %cst_130 = arith.constant 1.000000e+00 : f32
    %424 = vector.broadcast %cst_130 : f32 to vector<16x128xf32>
    %425 = arith.subf %423, %424 : vector<16x128xf32>
    %426 = arith.select %420, %418, %425 : vector<16x128xi1>, vector<16x128xf32>
    %427 = arith.truncf %426 : vector<16x128xf32> to vector<16x128xbf16>
    %c0_131 = arith.constant 0 : index
    %c0_132 = arith.constant 0 : index
    %428 = vector.load %arg11[%c0_131, %c0_132] : memref<128x128xbf16, #tpu.memory_space<vmem>>, vector<128x128xbf16>
    %cst_133 = arith.constant dense<0.000000e+00> : vector<16x128xf32>
    %429 = tpu.matmul %427, %428, %cst_133 {dimension_numbers = #tpu.dot_dimension_numbers<[1], [0], [0], [1], [0, 0, 1, 1], [], []>} : vector<16x128xbf16>, vector<128x128xbf16>, vector<16x128xf32> -> vector<16x128xf32>
    %430 = tpu.transpose %429, [1, 0] : vector<16x128xf32> -> vector<128x16xf32>
    %431 = arith.truncf %429 : vector<16x128xf32> to vector<16x128xbf16>
    %432 = vector.extract_strided_slice %429 {offsets = [0, 0], sizes = [8, 128], strides = [1, 1]} : vector<16x128xf32> to vector<8x128xf32>
    %c0_134 = arith.constant 0 : index
    %c0_135 = arith.constant 0 : index
    %433 = vector.load %arg15[%c0_134, %c0_135] : memref<8x16xi8, #tpu.memory_space<vmem>>, vector<8x16xi8>
    %434 = arith.sitofp %433 : vector<8x16xi8> to vector<8x16xf32>
    %cst_136 = arith.constant 0.000000e+00 : f32
    %435 = vector.broadcast %cst_136 : f32 to vector<8x16xf32>
    %436 = arith.cmpf ogt, %434, %435 : vector<8x16xf32>
    %c0_137 = arith.constant 0 : index
    %c0_138 = arith.constant 0 : index
    %437 = vector.load %arg12[%c0_137, %c0_138] : memref<32x4xf32, #tpu.memory_space<vmem>>, vector<32x4xf32>
    %c0_139 = arith.constant 0 : index
    %c0_140 = arith.constant 0 : index
    %438 = vector.load %arg13[%c0_139, %c0_140] : memref<4x32xf32, #tpu.memory_space<vmem>>, vector<4x32xf32>
    %c0_141 = arith.constant 0 : index
    %c0_142 = arith.constant 0 : index
    %439 = vector.load %arg14[%c0_141, %c0_142] : memref<1x128xf32, #tpu.memory_space<vmem>>, vector<1x128xf32>
    %440 = tpu.iota {dimensions = array<i32: 1>} : vector<1x128xi32>
    %cst_143 = arith.constant 0.000000e+00 : f32
    %441 = vector.broadcast %cst_143 : f32 to vector<8x128xf32>
    %442 = vector.extract_strided_slice %432 {offsets = [0, 0], sizes = [8, 32], strides = [1, 1]} : vector<8x128xf32> to vector<8x32xf32>
    %443 = vector.extract_strided_slice %438 {offsets = [0, 0], sizes = [1, 32], strides = [1, 1]} : vector<4x32xf32> to vector<1x32xf32>
    %444 = vector.broadcast %443 : vector<1x32xf32> to vector<8x32xf32>
    %445 = arith.mulf %442, %444 : vector<8x32xf32>
    %cst_144 = arith.constant dense<0.000000e+00> : vector<8xf32>
    %446 = vector.multi_reduction <add>, %445, %cst_144 [1] : vector<8x32xf32> to vector<8xf32>
    %447 = vector.shape_cast %446 : vector<8xf32> to vector<8x1xf32>
    %448 = vector.extract_strided_slice %430 {offsets = [0, 0], sizes = [32, 16], strides = [1, 1]} : vector<128x16xf32> to vector<32x16xf32>
    %449 = vector.extract_strided_slice %437 {offsets = [0, 0], sizes = [32, 1], strides = [1, 1]} : vector<32x4xf32> to vector<32x1xf32>
    %450 = vector.broadcast %449 : vector<32x1xf32> to vector<32x16xf32>
    %451 = arith.mulf %448, %450 : vector<32x16xf32>
    %cst_145 = arith.constant dense<0.000000e+00> : vector<16xf32>
    %452 = vector.multi_reduction <add>, %451, %cst_145 [0] : vector<32x16xf32> to vector<16xf32>
    %453 = vector.shape_cast %452 : vector<16xf32> to vector<1x16xf32>
    %454 = vector.broadcast %447 : vector<8x1xf32> to vector<8x16xf32>
    %455 = vector.broadcast %453 : vector<1x16xf32> to vector<8x16xf32>
    %456 = arith.addf %454, %455 : vector<8x16xf32>
    %cst_146 = arith.constant 0.000000e+00 : f32
    %457 = vector.broadcast %cst_146 : f32 to vector<8x16xf32>
    %458 = arith.cmpf ogt, %456, %457 : vector<8x16xf32>
    %cst_147 = arith.constant 2.000000e-01 : f32
    %459 = vector.broadcast %cst_147 : f32 to vector<8x16xf32>
    %460 = arith.mulf %459, %456 : vector<8x16xf32>
    %461 = arith.select %458, %456, %460 : vector<8x16xi1>, vector<8x16xf32>
    %cst_148 = arith.constant -1.000000e+30 : f32
    %462 = vector.broadcast %cst_148 : f32 to vector<8x16xf32>
    %463 = arith.select %436, %461, %462 : vector<8x16xi1>, vector<8x16xf32>
    %cst_149 = arith.constant dense<0xFF800000> : vector<8xf32>
    %464 = vector.multi_reduction <maximumf>, %463, %cst_149 [1] : vector<8x16xf32> to vector<8xf32>
    %465 = vector.shape_cast %464 : vector<8xf32> to vector<8x1xf32>
    %466 = vector.broadcast %465 : vector<8x1xf32> to vector<8x16xf32>
    %467 = arith.subf %463, %466 : vector<8x16xf32>
    %468 = math.exp %467 : vector<8x16xf32>
    %cst_150 = arith.constant 0.000000e+00 : f32
    %469 = vector.broadcast %cst_150 : f32 to vector<8x16xf32>
    %470 = arith.select %436, %468, %469 : vector<8x16xi1>, vector<8x16xf32>
    %cst_151 = arith.constant dense<0.000000e+00> : vector<8xf32>
    %471 = vector.multi_reduction <add>, %470, %cst_151 [1] : vector<8x16xf32> to vector<8xf32>
    %472 = vector.shape_cast %471 : vector<8xf32> to vector<8x1xf32>
    %cst_152 = arith.constant 0.000000e+00 : f32
    %473 = vector.broadcast %cst_152 : f32 to vector<8x1xf32>
    %474 = arith.cmpf ogt, %472, %473 : vector<8x1xf32>
    %cst_153 = arith.constant 1.000000e+00 : f32
    %475 = vector.broadcast %cst_153 : f32 to vector<8x1xf32>
    %476 = arith.select %474, %472, %475 : vector<8x1xi1>, vector<8x1xf32>
    %477 = vector.broadcast %476 : vector<8x1xf32> to vector<8x16xf32>
    %478 = arith.divf %470, %477 : vector<8x16xf32>
    %479 = arith.truncf %478 : vector<8x16xf32> to vector<8x16xbf16>
    %cst_154 = arith.constant dense<0.000000e+00> : vector<8x128xf32>
    %480 = tpu.matmul %479, %431, %cst_154 {dimension_numbers = #tpu.dot_dimension_numbers<[1], [0], [0], [1], [0, 0, 1, 1], [], []>} : vector<8x16xbf16>, vector<16x128xbf16>, vector<8x128xf32> -> vector<8x128xf32>
    %c0_i32_155 = arith.constant 0 : i32
    %481 = vector.broadcast %c0_i32_155 : i32 to vector<1x128xi32>
    %482 = arith.cmpi sge, %440, %481 : vector<1x128xi32>
    %c32_i32_156 = arith.constant 32 : i32
    %483 = vector.broadcast %c32_i32_156 : i32 to vector<1x128xi32>
    %484 = arith.cmpi slt, %440, %483 : vector<1x128xi32>
    %485 = arith.andi %482, %484 : vector<1x128xi1>
    %486 = vector.shape_cast %485 : vector<1x128xi1> to vector<1x128xi1>
    %487 = vector.broadcast %486 : vector<1x128xi1> to vector<8x128xi1>
    %488 = arith.select %487, %480, %441 : vector<8x128xi1>, vector<8x128xf32>
    %489 = vector.extract_strided_slice %432 {offsets = [0, 32], sizes = [8, 32], strides = [1, 1]} : vector<8x128xf32> to vector<8x32xf32>
    %490 = vector.extract_strided_slice %438 {offsets = [1, 0], sizes = [1, 32], strides = [1, 1]} : vector<4x32xf32> to vector<1x32xf32>
    %491 = vector.broadcast %490 : vector<1x32xf32> to vector<8x32xf32>
    %492 = arith.mulf %489, %491 : vector<8x32xf32>
    %cst_157 = arith.constant dense<0.000000e+00> : vector<8xf32>
    %493 = vector.multi_reduction <add>, %492, %cst_157 [1] : vector<8x32xf32> to vector<8xf32>
    %494 = vector.shape_cast %493 : vector<8xf32> to vector<8x1xf32>
    %495 = vector.extract_strided_slice %430 {offsets = [32, 0], sizes = [32, 16], strides = [1, 1]} : vector<128x16xf32> to vector<32x16xf32>
    %496 = vector.extract_strided_slice %437 {offsets = [0, 1], sizes = [32, 1], strides = [1, 1]} : vector<32x4xf32> to vector<32x1xf32>
    %497 = vector.broadcast %496 : vector<32x1xf32> to vector<32x16xf32>
    %498 = arith.mulf %495, %497 : vector<32x16xf32>
    %cst_158 = arith.constant dense<0.000000e+00> : vector<16xf32>
    %499 = vector.multi_reduction <add>, %498, %cst_158 [0] : vector<32x16xf32> to vector<16xf32>
    %500 = vector.shape_cast %499 : vector<16xf32> to vector<1x16xf32>
    %501 = vector.broadcast %494 : vector<8x1xf32> to vector<8x16xf32>
    %502 = vector.broadcast %500 : vector<1x16xf32> to vector<8x16xf32>
    %503 = arith.addf %501, %502 : vector<8x16xf32>
    %cst_159 = arith.constant 0.000000e+00 : f32
    %504 = vector.broadcast %cst_159 : f32 to vector<8x16xf32>
    %505 = arith.cmpf ogt, %503, %504 : vector<8x16xf32>
    %cst_160 = arith.constant 2.000000e-01 : f32
    %506 = vector.broadcast %cst_160 : f32 to vector<8x16xf32>
    %507 = arith.mulf %506, %503 : vector<8x16xf32>
    %508 = arith.select %505, %503, %507 : vector<8x16xi1>, vector<8x16xf32>
    %cst_161 = arith.constant -1.000000e+30 : f32
    %509 = vector.broadcast %cst_161 : f32 to vector<8x16xf32>
    %510 = arith.select %436, %508, %509 : vector<8x16xi1>, vector<8x16xf32>
    %cst_162 = arith.constant dense<0xFF800000> : vector<8xf32>
    %511 = vector.multi_reduction <maximumf>, %510, %cst_162 [1] : vector<8x16xf32> to vector<8xf32>
    %512 = vector.shape_cast %511 : vector<8xf32> to vector<8x1xf32>
    %513 = vector.broadcast %512 : vector<8x1xf32> to vector<8x16xf32>
    %514 = arith.subf %510, %513 : vector<8x16xf32>
    %515 = math.exp %514 : vector<8x16xf32>
    %cst_163 = arith.constant 0.000000e+00 : f32
    %516 = vector.broadcast %cst_163 : f32 to vector<8x16xf32>
    %517 = arith.select %436, %515, %516 : vector<8x16xi1>, vector<8x16xf32>
    %cst_164 = arith.constant dense<0.000000e+00> : vector<8xf32>
    %518 = vector.multi_reduction <add>, %517, %cst_164 [1] : vector<8x16xf32> to vector<8xf32>
    %519 = vector.shape_cast %518 : vector<8xf32> to vector<8x1xf32>
    %cst_165 = arith.constant 0.000000e+00 : f32
    %520 = vector.broadcast %cst_165 : f32 to vector<8x1xf32>
    %521 = arith.cmpf ogt, %519, %520 : vector<8x1xf32>
    %cst_166 = arith.constant 1.000000e+00 : f32
    %522 = vector.broadcast %cst_166 : f32 to vector<8x1xf32>
    %523 = arith.select %521, %519, %522 : vector<8x1xi1>, vector<8x1xf32>
    %524 = vector.broadcast %523 : vector<8x1xf32> to vector<8x16xf32>
    %525 = arith.divf %517, %524 : vector<8x16xf32>
    %526 = arith.truncf %525 : vector<8x16xf32> to vector<8x16xbf16>
    %cst_167 = arith.constant dense<0.000000e+00> : vector<8x128xf32>
    %527 = tpu.matmul %526, %431, %cst_167 {dimension_numbers = #tpu.dot_dimension_numbers<[1], [0], [0], [1], [0, 0, 1, 1], [], []>} : vector<8x16xbf16>, vector<16x128xbf16>, vector<8x128xf32> -> vector<8x128xf32>
    %c32_i32_168 = arith.constant 32 : i32
    %528 = vector.broadcast %c32_i32_168 : i32 to vector<1x128xi32>
    %529 = arith.cmpi sge, %440, %528 : vector<1x128xi32>
    %c64_i32_169 = arith.constant 64 : i32
    %530 = vector.broadcast %c64_i32_169 : i32 to vector<1x128xi32>
    %531 = arith.cmpi slt, %440, %530 : vector<1x128xi32>
    %532 = arith.andi %529, %531 : vector<1x128xi1>
    %533 = vector.shape_cast %532 : vector<1x128xi1> to vector<1x128xi1>
    %534 = vector.broadcast %533 : vector<1x128xi1> to vector<8x128xi1>
    %535 = arith.select %534, %527, %488 : vector<8x128xi1>, vector<8x128xf32>
    %536 = vector.extract_strided_slice %432 {offsets = [0, 64], sizes = [8, 32], strides = [1, 1]} : vector<8x128xf32> to vector<8x32xf32>
    %537 = vector.extract_strided_slice %438 {offsets = [2, 0], sizes = [1, 32], strides = [1, 1]} : vector<4x32xf32> to vector<1x32xf32>
    %538 = vector.broadcast %537 : vector<1x32xf32> to vector<8x32xf32>
    %539 = arith.mulf %536, %538 : vector<8x32xf32>
    %cst_170 = arith.constant dense<0.000000e+00> : vector<8xf32>
    %540 = vector.multi_reduction <add>, %539, %cst_170 [1] : vector<8x32xf32> to vector<8xf32>
    %541 = vector.shape_cast %540 : vector<8xf32> to vector<8x1xf32>
    %542 = vector.extract_strided_slice %430 {offsets = [64, 0], sizes = [32, 16], strides = [1, 1]} : vector<128x16xf32> to vector<32x16xf32>
    %543 = vector.extract_strided_slice %437 {offsets = [0, 2], sizes = [32, 1], strides = [1, 1]} : vector<32x4xf32> to vector<32x1xf32>
    %544 = vector.broadcast %543 : vector<32x1xf32> to vector<32x16xf32>
    %545 = arith.mulf %542, %544 : vector<32x16xf32>
    %cst_171 = arith.constant dense<0.000000e+00> : vector<16xf32>
    %546 = vector.multi_reduction <add>, %545, %cst_171 [0] : vector<32x16xf32> to vector<16xf32>
    %547 = vector.shape_cast %546 : vector<16xf32> to vector<1x16xf32>
    %548 = vector.broadcast %541 : vector<8x1xf32> to vector<8x16xf32>
    %549 = vector.broadcast %547 : vector<1x16xf32> to vector<8x16xf32>
    %550 = arith.addf %548, %549 : vector<8x16xf32>
    %cst_172 = arith.constant 0.000000e+00 : f32
    %551 = vector.broadcast %cst_172 : f32 to vector<8x16xf32>
    %552 = arith.cmpf ogt, %550, %551 : vector<8x16xf32>
    %cst_173 = arith.constant 2.000000e-01 : f32
    %553 = vector.broadcast %cst_173 : f32 to vector<8x16xf32>
    %554 = arith.mulf %553, %550 : vector<8x16xf32>
    %555 = arith.select %552, %550, %554 : vector<8x16xi1>, vector<8x16xf32>
    %cst_174 = arith.constant -1.000000e+30 : f32
    %556 = vector.broadcast %cst_174 : f32 to vector<8x16xf32>
    %557 = arith.select %436, %555, %556 : vector<8x16xi1>, vector<8x16xf32>
    %cst_175 = arith.constant dense<0xFF800000> : vector<8xf32>
    %558 = vector.multi_reduction <maximumf>, %557, %cst_175 [1] : vector<8x16xf32> to vector<8xf32>
    %559 = vector.shape_cast %558 : vector<8xf32> to vector<8x1xf32>
    %560 = vector.broadcast %559 : vector<8x1xf32> to vector<8x16xf32>
    %561 = arith.subf %557, %560 : vector<8x16xf32>
    %562 = math.exp %561 : vector<8x16xf32>
    %cst_176 = arith.constant 0.000000e+00 : f32
    %563 = vector.broadcast %cst_176 : f32 to vector<8x16xf32>
    %564 = arith.select %436, %562, %563 : vector<8x16xi1>, vector<8x16xf32>
    %cst_177 = arith.constant dense<0.000000e+00> : vector<8xf32>
    %565 = vector.multi_reduction <add>, %564, %cst_177 [1] : vector<8x16xf32> to vector<8xf32>
    %566 = vector.shape_cast %565 : vector<8xf32> to vector<8x1xf32>
    %cst_178 = arith.constant 0.000000e+00 : f32
    %567 = vector.broadcast %cst_178 : f32 to vector<8x1xf32>
    %568 = arith.cmpf ogt, %566, %567 : vector<8x1xf32>
    %cst_179 = arith.constant 1.000000e+00 : f32
    %569 = vector.broadcast %cst_179 : f32 to vector<8x1xf32>
    %570 = arith.select %568, %566, %569 : vector<8x1xi1>, vector<8x1xf32>
    %571 = vector.broadcast %570 : vector<8x1xf32> to vector<8x16xf32>
    %572 = arith.divf %564, %571 : vector<8x16xf32>
    %573 = arith.truncf %572 : vector<8x16xf32> to vector<8x16xbf16>
    %cst_180 = arith.constant dense<0.000000e+00> : vector<8x128xf32>
    %574 = tpu.matmul %573, %431, %cst_180 {dimension_numbers = #tpu.dot_dimension_numbers<[1], [0], [0], [1], [0, 0, 1, 1], [], []>} : vector<8x16xbf16>, vector<16x128xbf16>, vector<8x128xf32> -> vector<8x128xf32>
    %c64_i32_181 = arith.constant 64 : i32
    %575 = vector.broadcast %c64_i32_181 : i32 to vector<1x128xi32>
    %576 = arith.cmpi sge, %440, %575 : vector<1x128xi32>
    %c96_i32_182 = arith.constant 96 : i32
    %577 = vector.broadcast %c96_i32_182 : i32 to vector<1x128xi32>
    %578 = arith.cmpi slt, %440, %577 : vector<1x128xi32>
    %579 = arith.andi %576, %578 : vector<1x128xi1>
    %580 = vector.shape_cast %579 : vector<1x128xi1> to vector<1x128xi1>
    %581 = vector.broadcast %580 : vector<1x128xi1> to vector<8x128xi1>
    %582 = arith.select %581, %574, %535 : vector<8x128xi1>, vector<8x128xf32>
    %583 = vector.extract_strided_slice %432 {offsets = [0, 96], sizes = [8, 32], strides = [1, 1]} : vector<8x128xf32> to vector<8x32xf32>
    %584 = vector.extract_strided_slice %438 {offsets = [3, 0], sizes = [1, 32], strides = [1, 1]} : vector<4x32xf32> to vector<1x32xf32>
    %585 = vector.broadcast %584 : vector<1x32xf32> to vector<8x32xf32>
    %586 = arith.mulf %583, %585 : vector<8x32xf32>
    %cst_183 = arith.constant dense<0.000000e+00> : vector<8xf32>
    %587 = vector.multi_reduction <add>, %586, %cst_183 [1] : vector<8x32xf32> to vector<8xf32>
    %588 = vector.shape_cast %587 : vector<8xf32> to vector<8x1xf32>
    %589 = vector.extract_strided_slice %430 {offsets = [96, 0], sizes = [32, 16], strides = [1, 1]} : vector<128x16xf32> to vector<32x16xf32>
    %590 = vector.extract_strided_slice %437 {offsets = [0, 3], sizes = [32, 1], strides = [1, 1]} : vector<32x4xf32> to vector<32x1xf32>
    %591 = vector.broadcast %590 : vector<32x1xf32> to vector<32x16xf32>
    %592 = arith.mulf %589, %591 : vector<32x16xf32>
    %cst_184 = arith.constant dense<0.000000e+00> : vector<16xf32>
    %593 = vector.multi_reduction <add>, %592, %cst_184 [0] : vector<32x16xf32> to vector<16xf32>
    %594 = vector.shape_cast %593 : vector<16xf32> to vector<1x16xf32>
    %595 = vector.broadcast %588 : vector<8x1xf32> to vector<8x16xf32>
    %596 = vector.broadcast %594 : vector<1x16xf32> to vector<8x16xf32>
    %597 = arith.addf %595, %596 : vector<8x16xf32>
    %cst_185 = arith.constant 0.000000e+00 : f32
    %598 = vector.broadcast %cst_185 : f32 to vector<8x16xf32>
    %599 = arith.cmpf ogt, %597, %598 : vector<8x16xf32>
    %cst_186 = arith.constant 2.000000e-01 : f32
    %600 = vector.broadcast %cst_186 : f32 to vector<8x16xf32>
    %601 = arith.mulf %600, %597 : vector<8x16xf32>
    %602 = arith.select %599, %597, %601 : vector<8x16xi1>, vector<8x16xf32>
    %cst_187 = arith.constant -1.000000e+30 : f32
    %603 = vector.broadcast %cst_187 : f32 to vector<8x16xf32>
    %604 = arith.select %436, %602, %603 : vector<8x16xi1>, vector<8x16xf32>
    %cst_188 = arith.constant dense<0xFF800000> : vector<8xf32>
    %605 = vector.multi_reduction <maximumf>, %604, %cst_188 [1] : vector<8x16xf32> to vector<8xf32>
    %606 = vector.shape_cast %605 : vector<8xf32> to vector<8x1xf32>
    %607 = vector.broadcast %606 : vector<8x1xf32> to vector<8x16xf32>
    %608 = arith.subf %604, %607 : vector<8x16xf32>
    %609 = math.exp %608 : vector<8x16xf32>
    %cst_189 = arith.constant 0.000000e+00 : f32
    %610 = vector.broadcast %cst_189 : f32 to vector<8x16xf32>
    %611 = arith.select %436, %609, %610 : vector<8x16xi1>, vector<8x16xf32>
    %cst_190 = arith.constant dense<0.000000e+00> : vector<8xf32>
    %612 = vector.multi_reduction <add>, %611, %cst_190 [1] : vector<8x16xf32> to vector<8xf32>
    %613 = vector.shape_cast %612 : vector<8xf32> to vector<8x1xf32>
    %cst_191 = arith.constant 0.000000e+00 : f32
    %614 = vector.broadcast %cst_191 : f32 to vector<8x1xf32>
    %615 = arith.cmpf ogt, %613, %614 : vector<8x1xf32>
    %cst_192 = arith.constant 1.000000e+00 : f32
    %616 = vector.broadcast %cst_192 : f32 to vector<8x1xf32>
    %617 = arith.select %615, %613, %616 : vector<8x1xi1>, vector<8x1xf32>
    %618 = vector.broadcast %617 : vector<8x1xf32> to vector<8x16xf32>
    %619 = arith.divf %611, %618 : vector<8x16xf32>
    %620 = arith.truncf %619 : vector<8x16xf32> to vector<8x16xbf16>
    %cst_193 = arith.constant dense<0.000000e+00> : vector<8x128xf32>
    %621 = tpu.matmul %620, %431, %cst_193 {dimension_numbers = #tpu.dot_dimension_numbers<[1], [0], [0], [1], [0, 0, 1, 1], [], []>} : vector<8x16xbf16>, vector<16x128xbf16>, vector<8x128xf32> -> vector<8x128xf32>
    %c96_i32_194 = arith.constant 96 : i32
    %622 = vector.broadcast %c96_i32_194 : i32 to vector<1x128xi32>
    %623 = arith.cmpi sge, %440, %622 : vector<1x128xi32>
    %c128_i32_195 = arith.constant 128 : i32
    %624 = vector.broadcast %c128_i32_195 : i32 to vector<1x128xi32>
    %625 = arith.cmpi slt, %440, %624 : vector<1x128xi32>
    %626 = arith.andi %623, %625 : vector<1x128xi1>
    %627 = vector.shape_cast %626 : vector<1x128xi1> to vector<1x128xi1>
    %628 = vector.broadcast %627 : vector<1x128xi1> to vector<8x128xi1>
    %629 = arith.select %628, %621, %582 : vector<8x128xi1>, vector<8x128xf32>
    %630 = vector.broadcast %439 : vector<1x128xf32> to vector<8x128xf32>
    %631 = arith.addf %629, %630 : vector<8x128xf32>
    %cst_196 = arith.constant 0.000000e+00 : f32
    %632 = vector.broadcast %cst_196 : f32 to vector<8x128xf32>
    %633 = arith.cmpf ogt, %631, %632 : vector<8x128xf32>
    %cst_197 = arith.constant 0.000000e+00 : f32
    %634 = vector.broadcast %cst_197 : f32 to vector<8x128xf32>
    %635 = arith.minimumf %631, %634 : vector<8x128xf32>
    %636 = math.exp %635 : vector<8x128xf32>
    %cst_198 = arith.constant 1.000000e+00 : f32
    %637 = vector.broadcast %cst_198 : f32 to vector<8x128xf32>
    %638 = arith.subf %636, %637 : vector<8x128xf32>
    %639 = arith.select %633, %631, %638 : vector<8x128xi1>, vector<8x128xf32>
    %640 = arith.truncf %639 : vector<8x128xf32> to vector<8x128xbf16>
    %c0_199 = arith.constant 0 : index
    %c0_200 = arith.constant 0 : index
    %641 = vector.load %arg16[%c0_199, %c0_200] : memref<128x32xbf16, #tpu.memory_space<vmem>>, vector<128x32xbf16>
    %cst_201 = arith.constant dense<0.000000e+00> : vector<8x32xf32>
    %642 = tpu.matmul %640, %641, %cst_201 {dimension_numbers = #tpu.dot_dimension_numbers<[1], [0], [0], [1], [0, 0, 1, 1], [], []>} : vector<8x128xbf16>, vector<128x32xbf16>, vector<8x32xf32> -> vector<8x32xf32>
    %c0_202 = arith.constant 0 : index
    %c0_203 = arith.constant 0 : index
    %643 = vector.load %arg17[%c0_202, %c0_203] : memref<1x32xf32, #tpu.memory_space<vmem>>, vector<1x32xf32>
    %644 = vector.broadcast %643 : vector<1x32xf32> to vector<8x32xf32>
    %645 = arith.addf %642, %644 : vector<8x32xf32>
    %646 = tpu.transpose %645, [1, 0] : vector<8x32xf32> -> vector<32x8xf32>
    %647 = arith.truncf %646 : vector<32x8xf32> to vector<32x8xbf16>
    %c0_204 = arith.constant 0 : index
    %c0_205 = arith.constant 0 : index
    %648 = vector.load %arg24[%c0_204, %c0_205] : memref<2x16xi32, #tpu.memory_space<vmem>>, vector<2x16xi32>
    %649 = tpu.iota {dimensions = array<i32: 0>} : vector<8x16xi32>
    %650 = vector.extract_strided_slice %648 {offsets = [0, 0], sizes = [1, 16], strides = [1, 1]} : vector<2x16xi32> to vector<1x16xi32>
    %651 = vector.broadcast %650 : vector<1x16xi32> to vector<8x16xi32>
    %652 = arith.cmpi eq, %649, %651 : vector<8x16xi32>
    %cst_206 = arith.constant 1.000000e+00 : f32
    %cst_207 = arith.constant 0.000000e+00 : f32
    %653 = vector.broadcast %cst_206 : f32 to vector<8x16xf32>
    %654 = vector.broadcast %cst_207 : f32 to vector<8x16xf32>
    %655 = arith.select %652, %653, %654 : vector<8x16xi1>, vector<8x16xf32>
    %656 = arith.truncf %655 : vector<8x16xf32> to vector<8x16xbf16>
    %657 = vector.extract_strided_slice %648 {offsets = [1, 0], sizes = [1, 16], strides = [1, 1]} : vector<2x16xi32> to vector<1x16xi32>
    %658 = vector.broadcast %657 : vector<1x16xi32> to vector<8x16xi32>
    %659 = arith.cmpi eq, %649, %658 : vector<8x16xi32>
    %cst_208 = arith.constant 1.000000e+00 : f32
    %cst_209 = arith.constant 0.000000e+00 : f32
    %660 = vector.broadcast %cst_208 : f32 to vector<8x16xf32>
    %661 = vector.broadcast %cst_209 : f32 to vector<8x16xf32>
    %662 = arith.select %659, %660, %661 : vector<8x16xi1>, vector<8x16xf32>
    %663 = arith.truncf %662 : vector<8x16xf32> to vector<8x16xbf16>
    %cst_210 = arith.constant dense<0.000000e+00> : vector<32x16xf32>
    %664 = tpu.matmul %647, %656, %cst_210 {dimension_numbers = #tpu.dot_dimension_numbers<[1], [0], [0], [1], [0, 0, 1, 1], [], []>} : vector<32x8xbf16>, vector<8x16xbf16>, vector<32x16xf32> -> vector<32x16xf32>
    %cst_211 = arith.constant dense<0.000000e+00> : vector<32x16xf32>
    %665 = tpu.matmul %647, %663, %cst_211 {dimension_numbers = #tpu.dot_dimension_numbers<[1], [0], [0], [1], [0, 0, 1, 1], [], []>} : vector<32x8xbf16>, vector<8x16xbf16>, vector<32x16xf32> -> vector<32x16xf32>
    %666 = arith.mulf %664, %665 : vector<32x16xf32>
    %667 = arith.truncf %666 : vector<32x16xf32> to vector<32x16xbf16>
    %c0_212 = arith.constant 0 : index
    %c0_213 = arith.constant 0 : index
    %668 = vector.load %arg18[%c0_212, %c0_213] : memref<32x32xbf16, #tpu.memory_space<vmem>>, vector<32x32xbf16>
    %cst_214 = arith.constant dense<0.000000e+00> : vector<32x16xf32>
    %669 = tpu.matmul %668, %667, %cst_214 {dimension_numbers = #tpu.dot_dimension_numbers<[1], [0], [0], [1], [0, 0, 1, 1], [], []>} : vector<32x32xbf16>, vector<32x16xbf16>, vector<32x16xf32> -> vector<32x16xf32>
    %c0_215 = arith.constant 0 : index
    %c0_216 = arith.constant 0 : index
    %670 = vector.load %arg19[%c0_215, %c0_216] : memref<32x1xf32, #tpu.memory_space<vmem>>, vector<32x1xf32>
    %671 = vector.broadcast %670 : vector<32x1xf32> to vector<32x16xf32>
    %672 = arith.addf %669, %671 : vector<32x16xf32>
    %cst_217 = arith.constant 0.000000e+00 : f32
    %673 = vector.broadcast %cst_217 : f32 to vector<32x16xf32>
    %674 = arith.maximumf %672, %673 : vector<32x16xf32>
    %c0_218 = arith.constant 0 : index
    %c0_219 = arith.constant 0 : index
    %675 = vector.load %arg20[%c0_218, %c0_219] : memref<32x32xbf16, #tpu.memory_space<vmem>>, vector<32x32xbf16>
    %676 = arith.truncf %674 : vector<32x16xf32> to vector<32x16xbf16>
    %cst_220 = arith.constant dense<0.000000e+00> : vector<32x16xf32>
    %677 = tpu.matmul %675, %676, %cst_220 {dimension_numbers = #tpu.dot_dimension_numbers<[1], [0], [0], [1], [0, 0, 1, 1], [], []>} : vector<32x32xbf16>, vector<32x16xbf16>, vector<32x16xf32> -> vector<32x16xf32>
    %c0_221 = arith.constant 0 : index
    %c0_222 = arith.constant 0 : index
    %678 = vector.load %arg21[%c0_221, %c0_222] : memref<32x1xf32, #tpu.memory_space<vmem>>, vector<32x1xf32>
    %679 = vector.broadcast %678 : vector<32x1xf32> to vector<32x16xf32>
    %680 = arith.addf %677, %679 : vector<32x16xf32>
    %cst_223 = arith.constant 0.000000e+00 : f32
    %681 = vector.broadcast %cst_223 : f32 to vector<32x16xf32>
    %682 = arith.maximumf %680, %681 : vector<32x16xf32>
    %c0_224 = arith.constant 0 : index
    %c0_225 = arith.constant 0 : index
    %683 = vector.load %arg22[%c0_224, %c0_225] : memref<32x1xf32, #tpu.memory_space<vmem>>, vector<32x1xf32>
    %684 = vector.broadcast %683 : vector<32x1xf32> to vector<32x16xf32>
    %685 = arith.mulf %682, %684 : vector<32x16xf32>
    %cst_226 = arith.constant dense<0.000000e+00> : vector<16xf32>
    %686 = vector.multi_reduction <add>, %685, %cst_226 [0] : vector<32x16xf32> to vector<16xf32>
    %687 = vector.shape_cast %686 : vector<16xf32> to vector<1x16xf32>
    %c0_227 = arith.constant 0 : index
    %c0_228 = arith.constant 0 : index
    %688 = vector.load %arg23[%c0_227, %c0_228] : memref<1x1xf32, #tpu.memory_space<vmem>>, vector<1x1xf32>
    %689 = vector.broadcast %688 : vector<1x1xf32> to vector<1x16xf32>
    %690 = arith.addf %687, %689 : vector<1x16xf32>
    %c0_229 = arith.constant 0 : index
    %c0_230 = arith.constant 0 : index
    %691 = vector.load %arg25[%c0_229, %c0_230] : memref<1x16xf32, #tpu.memory_space<vmem>>, vector<1x16xf32>
    tpu.vector_store %arg25[%c0_229, %c0_230], %690 {strides = array<i32>} : memref<1x16xf32, #tpu.memory_space<vmem>>, vector<1x16xf32>,
    return
  }
}

</mosaic_0001>

<bundles_post_ra>
// kernel: tpu_custom_call.1
= control target key start
LH: loop header
LB: loop body
LE: loop exit
PB: predicated region body
PF: predicated region fallthrough
CT: control target
= control target key end

     0   :  { %s4904_s0 = inlined_call_operand.vmem [shape: f32[64,16], index: 0, kind: input, shape index: {}]   ;;  %s4905_s1 = inlined_call_operand.vmem [shape: bf16[16,128], index: 1, kind: input, shape index: {}]   ;;  %s4906_s2 = inlined_call_operand.vmem [shape: f32[32,4], index: 2, kind: input, shape index: {}]   ;;  %s4907_s3 = inlined_call_operand.vmem [shape: f32[4,32], index: 3, kind: input, shape index: {}]   ;;  %s4908_s4 = inlined_call_operand.vmem [shape: f32[1,128], index: 4, kind: input, shape index: {}]   ;;  %s4909_s5 = inlined_call_operand.vmem [shape: s8[32,64], index: 5, kind: input, shape index: {}]   ;;  %s4910_s6 = inlined_call_operand.vmem [shape: bf16[128,128], index: 6, kind: input, shape index: {}]   ;;  %s4911_s7 = inlined_call_operand.vmem [shape: f32[32,4], index: 7, kind: input, shape index: {}]   ;;  %s4912_s8 = inlined_call_operand.vmem [shape: f32[4,32], index: 8, kind: input, shape index: {}]   ;;  %s4913_s9 = inlined_call_operand.vmem [shape: f32[1,128], index: 9, kind: input, shape index: {}]   ;;  %s4914_s10 = inlined_call_operand.vmem [shape: s8[16,32], index: 10, kind: input, shape index: {}]   ;;  %s4915_s11 = inlined_call_operand.vmem [shape: bf16[128,128], index: 11, kind: input, shape index: {}]   ;;  %s4916_s12 = inlined_call_operand.vmem [shape: f32[32,4], index: 12, kind: input, shape index: {}]   ;;  %s4917_s13 = inlined_call_operand.vmem [shape: f32[4,32], index: 13, kind: input, shape index: {}]   ;;  %s4918_s14 = inlined_call_operand.vmem [shape: f32[1,128], index: 14, kind: input, shape index: {}]   ;;  %s4919_s15 = inlined_call_operand.vmem [shape: s8[8,16], index: 15, kind: input, shape index: {}]   ;;  %s4920_s16 = inlined_call_operand.vmem [shape: bf16[128,32], index: 16, kind: input, shape index: {}]   ;;  %s4921_s17 = inlined_call_operand.vmem [shape: f32[1,32], index: 17, kind: input, shape index: {}]   ;;  %s4922_s18 = inlined_call_operand.vmem [shape: bf16[32,32], index: 18, kind: input, shape index: {}]   ;;  %s4923_s19 = inlined_call_operand.vmem [shape: f32[32,1], index: 19, kind: input, shape index: {}]   ;;  %s4924_s20 = inlined_call_operand.vmem [shape: bf16[32,32], index: 20, kind: input, shape index: {}]   ;;  %s4925_s21 = inlined_call_operand.vmem [shape: f32[32,1], index: 21, kind: input, shape index: {}]   ;;  %s4926_s22 = inlined_call_operand.vmem [shape: f32[32,1], index: 22, kind: input, shape index: {}]   ;;  %s4927_s23 = inlined_call_operand.<no memory space> [shape: f32[1,1], index: 23, kind: input, shape index: {}]   ;;  %s4928_s24 = inlined_call_operand.vmem [shape: s32[2,16], index: 24, kind: input, shape index: {}]   ;;  %s4929_s25 = inlined_call_operand.hbm [shape: f32[1,16], index: 25, kind: output, shape index: {}]  }
   0x1   :  { %4934 = sst [smem:[#allocation6_spill]] %s4904_s0  ;;  %v30_v0 = vstv %s4927_s23 }
   0x2   :  { %4935 = sst [smem:[#allocation7_spill]] %s4905_s1  ;;  %31 = vst [vmem:[#allocation2] sm:$0x1] %v30_v0 }
   0x3   :  { %4936 = sst [smem:[#allocation8_spill]] %s4906_s2 }
   0x4   :  { %4937 = sst [smem:[#allocation9_spill]] %s4907_s3 }
   0x5   :  { %4938 = sst [smem:[#allocation10_spill]] %s4908_s4 }
   0x6   :  { %4939 = sst [smem:[#allocation11_spill]] %s4909_s5 }
   0x7   :  { %4940 = sst [smem:[#allocation12_spill]] %s4910_s6 }
   0x8   :  { %4941 = sst [smem:[#allocation13_spill]] %s4911_s7 }
   0x9   :  { %4942 = sst [smem:[#allocation14_spill]] %s4912_s8 }
   0xa   :  { %4943 = sst [smem:[#allocation15_spill]] %s4913_s9 }
   0xb   :  { %s4944_s7 = sld [smem:[#allocation7_spill]]  ;;  %v237_v2 = vlaneseq  ;;  %s4945_s1 = sld [smem:[#allocation6_spill]]  ;;  %vm104_vm0 = vcmask 130048   ;;  %v3597_v10 = vmov 0   ;;  %v3598_v21 = vmov 2  }
   0xc   :  { %3394 = vset.pattern.permute.xlu1 %v3597_v10  ;;  %s4947_s8 = sld [smem:[#allocation9_spill]]  ;;  %3397 = vset.pattern.permute.xlu0 %v3598_v21  ;;  %v3599_v23 = vmov 1   ;;  %s3600_s9 = smov 32   ;;  %v3603_v30 = vmov 3  }
   0xd   :  { %v3763_v11 = vshrl.u32 %v237_v2, 7  ;;  %s3601_s0 = smov 64   ;;  %s3602_s29 = smov 96  }
   0xf   :  { %v3773_v16 = vsub.s32 1, %v3763_v11  ;;  %v3782_v19 = vsub.s32 3, %v3763_v11  ;;  %v3785_v20 = vsub.s32 2, %v3763_v11 }
  0x11   :  { %v3418_v1 = vld [vmem:[%s4944_s7] sm:$0xff]   ;;  %v85_v4 = vld [vmem:[%s4945_s1 + $0x8] sm:$0xff]  ;;  %v86_v5 = vld [vmem:[%s4945_s1 + $0x10] sm:$0xff]  ;;  %s4946_s7 = sld [smem:[#allocation8_spill]] }
  0x12   :  { %v84_v3 = vld [vmem:[%s4945_s1] sm:$0xff]  ;;  %3180 = vmatprep.subr.bf16.mxu0 %v3418_v1  ;;  %v87_v7 = vld [vmem:[%s4945_s1 + $0x18] sm:$0xff]  ;;  %v89_v9 = vld [vmem:[%s4945_s1 + $0x28] sm:$0xff] }
  0x13   :  { %v92_v6 = vpack.c.bf16 %v85_v4, %v84_v3  ;;  %v88_v8 = vld [vmem:[%s4945_s1 + $0x20] sm:$0xff]  ;;  %3181 = vmatpush3.bf16.msra.mxu0 %v3418_v1  ;;  %v93_v12 = vpack.c.bf16 %v87_v7, %v86_v5  ;;  %v90_v17 = vld [vmem:[%s4945_s1 + $0x30] sm:$0xff]  ;;  %v91_v18 = vld [vmem:[%s4945_s1 + $0x38] sm:$0xff] }
  0x14   :  { %v94_v13 = vpack.c.bf16 %v89_v9, %v88_v8  ;;  %v235_v15 = vld [vmem:[%s4947_s8] sm:$0xf]  ;;  %v95_v26 = vpack.c.bf16 %v91_v18, %v90_v17 }
  0x15   :  { %3182 = vmatprep.mubr.msk.bf16.mxu0 %vm104_vm0, %v92_v6  ;;  %v443_v22 = vrot.slane %v235_v15, %v3773_v16  ;;  %v658_v24 = vrot.slane %v235_v15, %v3785_v20  ;;  %v873_v25 = vrot.slane %v235_v15, %v3782_v19 }
  0x16   :  { %3183 = vmatmul.mubr.msk.bf16.vlgmr.msra.gmra.mrb[0].mxu0 %vm104_vm0, %v93_v12 }
  0x17   :  { %v231_v14 = vld [vmem:[%s4946_s7] sm:$0xff]  ;;  %3186 = vmatprep.mubr.msk.bf16.mxu0 %vm104_vm0, %v94_v13  ;;  %445 = vrot.lane.b32.xlu0 %v443_v22, %s3600_s9  ;;  %v3798_v27 = vld [vmem:[%s4946_s7 + $0x8] sm:$0xff]  ;;  %v3806_v28 = vld [vmem:[%s4946_s7 + $0x10] sm:$0xff] }
  0x18   :  { %262 = vperm.xlu1 %3394, %v231_v14   ;;  %v3813_v29 = vld [vmem:[%s4946_s7 + $0x18] sm:$0xff] }
  0x1b   :  { %660 = vrot.lane.b32.xlu0 %v658_v24, %s3601_s0 }
  0x1c   :  { %3395 = vset.pattern.permute.xlu1 %v3599_v23 }
  0x1d   :  { %481 = vperm.xlu1 %3395, %v231_v14  }
  0x1e   :  { %3187 = vmatmul.mubr.msk.bf16.gmra.mrb[4].mxu0 %vm104_vm0, %v95_v26 }
  0x1f   :  { %700 = vperm.xlu0 %3397, %v3798_v27  }
  0x21   :  { %875 = vrot.lane.b32.xlu1 %v873_v25, %s3602_s29 }
  0x23   :  { %3400 = vset.pattern.permute.xlu0 %v3603_v30 }
  0x24   :  { %919 = vperm.xlu0 %3400, %v3806_v28  }
  0x25   :  { %485 = vperm.xlu1 %3395, %v3798_v27  }
  0x29   :  { %489 = vperm.xlu1 %3395, %v3806_v28  }
  0x2a   :  { %32 = vsyncpa [#allocation4], 0  ;;  %v3825_v31 = vsub.s32 0, %v3763_v11  ;;  %vm247_vm1 = vcmask 261120   ;;  %vm284_vm2 = vcmask 523264   ;;  %s4948_s8 = sld [smem:[#allocation11_spill]] }
  0x2b   :  { %s4949_s28 = sld [smem:[#allocation14_spill]]  ;;  %s4950_s5 = sld [smem:[#allocation13_spill]] }
  0x2c   :  { %v242_v34 = vrot.slane %v235_v15, %v3825_v31  ;;  %s4951_s7 = sld [smem:[#allocation12_spill]]  ;;  %s4956_s2 = sld [smem:[#allocation10_spill]] }
  0x2d   :  { %493 = vperm.xlu1 %3395, %v3813_v29  }
  0x31   :  { %3396 = vset.pattern.permute.xlu1 %v3598_v21 }
  0x32   :  { %696 = vperm.xlu1 %3396, %v231_v14  }
  0x36   :  { %3398 = vset.pattern.permute.xlu1 %v3603_v30 }
  0x37   :  { %911 = vperm.xlu1 %3398, %v231_v14  }
  0x3b   :  { %915 = vperm.xlu1 %3398, %v3798_v27  }
  0x3f   :  { %3399 = vset.pattern.permute.xlu1 %v3598_v21 }
  0x40   :  { %704 = vperm.xlu1 %3399, %v3806_v28  }
  0x89   :  { %v3827_v32 = vpop.permute.xlu0 %445 }
  0x8d   :  { %v661_v36 = vpop.permute.xlu0 %660 }
  0x97   :  { %v3829_v33 = vpop.permute.xlu1 %262 }
  0x9c   :  { %v3839_v40 = vpop.permute.xlu1 %481 }
  0x9e   :  { %v3923_v22 = vpop.permute.xlu0 %700 }
  0xa0   :  { %v876_v48 = vpop.permute.xlu1 %875 }
  0xa3   :  { %v3925_v25 = vpop.permute.xlu0 %919 }
  0xa4   :  { %v3903_v6 = vpop.permute.xlu1 %485 }
  0xa8   :  { %v3906_v8 = vpop.permute.xlu1 %489 }
  0xac   :  { %v3908_v9 = vpop.permute.xlu1 %493 }
  0xb1   :  { %v3910_v12 = vpop.permute.xlu1 %696 }
  0xb6   :  { %v3912_v13 = vpop.permute.xlu1 %911 }
  0xba   :  { %v3915_v14 = vpop.permute.xlu1 %915 }
  0xbf   :  { %v3920_v15 = vpop.permute.xlu1 %704 }
  0xe9   :  { %v3832_v35 = vpop.f32.mrb[0].mxu0 }
  0xea   :  { %v3834_v37 = vpop.f32.mrb[1].mxu0  ;;  %v450_v38 = vmul.f32 %v3832_v35, %v3827_v32  ;;  %v245_v39 = vmul.f32 %v3832_v35, %v242_v34  ;;  %v665_v46 = vmul.f32 %v3832_v35, %v661_v36  ;;  %v880_v51 = vmul.f32 %v3832_v35, %v876_v48 }
  0xeb   :  { %v3841_v41 = vpop.f32.mrb[2].mxu0  ;;  %v448_v56 = vmul.f32 %v3827_v32, %v3834_v37  ;;  %v663_v57 = vmul.f32 %v661_v36, %v3834_v37  ;;  %v878_v58 = vmul.f32 %v876_v48, %v3834_v37  ;;  %v243_v0 = vmul.f32 %v242_v34, %v3834_v37 }
  0xec   :  { %v3845_v42 = vpack.c.bf16 %v3841_v41, %v3832_v35  ;;  %460 = vrot.lane.b32.xlu1 %v450_v38, %s3602_s29  ;;  %v154_v43 = vpop.f32.mrb[3].mxu0  ;;  %v254_v44 = vsel %vm247_vm1, %v245_v39, 0.0  ;;  %v246_v47 = vmul.f32 %v3841_v41, %v242_v34  ;;  %v451_v59 = vmul.f32 %v3841_v41, %v3827_v32 }
  0xed   :  { %v3850_v45 = vpack.c.bf16 %v154_v43, %v3834_v37  ;;  %255 = vadd.xlane.f32.xlu0 %v254_v44  ;;  %v666_v60 = vmul.f32 %v3841_v41, %v661_v36  ;;  %v881_v61 = vmul.f32 %v3841_v41, %v876_v48  ;;  %v244_v62 = vmul.f32 %v242_v34, %v154_v43 }
  0xee   :  { %v248_v1 = vsel %vm247_vm1, %v243_v0, 0.0  ;;  %v449_v3 = vmul.f32 %v3827_v32, %v154_v43  ;;  %v664_v4 = vmul.f32 %v661_v36, %v154_v43  ;;  %v879_v5 = vmul.f32 %v876_v48, %v154_v43 }
  0xef   :  { %3190 = vmatprep.subr.bf16.mxu1 %v3850_v45  ;;  %3202 = vmatprep.subr.bf16.mxu0 %v3850_v45  ;;  %v251_v63 = vsel %vm247_vm1, %v244_v62, 0.0  ;;  %v257_v7 = vsel %vm247_vm1, %v246_v47, 0.0 }
  0xf0   :  { %675 = vrot.lane.b32.xlu1 %v665_v46, %s3601_s0  ;;  %3191 = vmatpush3.bf16.msra.mxu1 %v3850_v45 }
  0xf1   :  { %3203 = vmatpush3.bf16.msra.mxu0 %v3850_v45  ;;  %v3188_v49 = vpop.f32.mrb[4].mxu0  ;;  %3192 = vmatprep.subr.bf16.mxu1 %v3845_v42 }
  0xf2   :  { %3204 = vmatprep.subr.bf16.mxu0 %v3845_v42  ;;  %v167_v50 = vpop.f32.mrb[5].mxu0 }
  0xf3   :  { %v3189_v52 = vpop.f32.mrb[6].mxu0 }
  0xf4   :  { %v3862_v53 = vpack.c.bf16 %v3189_v52, %v3188_v49  ;;  %890 = vrot.lane.b32.xlu1 %v880_v51, %s3600_s9  ;;  %v170_v54 = vpop.f32.mrb[7].mxu0  ;;  %3193 = vmatpush3.bf16.msra.mxu1 %v3845_v42 }
  0xf5   :  { %v3866_v55 = vpack.c.bf16 %v170_v54, %v167_v50  ;;  %3205 = vmatpush3.bf16.msra.mxu0 %v3845_v42 }
  0xf7   :  { %3194 = vmatprep.subr.bf16.mxu1 %v3866_v55  ;;  %3206 = vmatprep.subr.bf16.mxu0 %v3866_v55 }
  0xf8   :  { %456 = vrot.lane.b32.xlu1 %v448_v56, %s3602_s29  ;;  %3195 = vmatpush3.bf16.msra.mxu1 %v3866_v55 }
  0xf9   :  { %3207 = vmatpush3.bf16.msra.mxu0 %v3866_v55  ;;  %3196 = vmatprep.subr.bf16.mxu1 %v3862_v53 }
  0xfa   :  { %3208 = vmatprep.subr.bf16.mxu0 %v3862_v53 }
  0xfc   :  { %671 = vrot.lane.b32.xlu1 %v663_v57, %s3601_s0  ;;  %3197 = vmatpush3.bf16.msra.mxu1 %v3862_v53 }
  0xfd   :  { %3209 = vmatpush3.bf16.msra.mxu0 %v3862_v53  ;;  %3214 = vmatprep.subr.bf16.mxu1 %v3850_v45 }
  0xfe   :  { %3226 = vmatprep.subr.bf16.mxu0 %v3850_v45 }
 0x100   :  { %886 = vrot.lane.b32.xlu1 %v878_v58, %s3600_s9 }
 0x103   :  { %462 = vrot.lane.b32.xlu0 %v451_v59, %s3602_s29 }
 0x107   :  { %677 = vrot.lane.b32.xlu0 %v666_v60, %s3601_s0 }
 0x10b   :  { %892 = vrot.lane.b32.xlu0 %v881_v61, %s3600_s9 }
 0x124   :  { %252 = vadd.xlane.f32.xlu1 %v251_v63 }
 0x12a   :  { %249 = vadd.xlane.f32.xlu0 %v248_v1 }
 0x140   :  { %458 = vrot.lane.b32.xlu0 %v449_v3, %s3602_s29 }
 0x144   :  { %673 = vrot.lane.b32.xlu0 %v664_v4, %s3601_s0 }
 0x148   :  { %888 = vrot.lane.b32.xlu0 %v879_v5, %s3600_s9 }
 0x157   :  { %182 = vxpose.xlu1.b32.start [1/8] (short) %v3834_v37, 128 }
 0x15b   :  { %183 = vxpose.xlu1.b32.cont [2/8] (short) %v154_v43, 128 }
 0x15e   :  { %v461_v17 = vpop.permute.xlu1 %460 }
 0x15f   :  { %184 = vxpose.xlu1.b32.cont [3/8] (short) %v3832_v35, 128  ;;  %v474_v39 = vsel %vm247_vm1, %v461_v17, 0.0 }
 0x162   :  { %v676_v18 = vpop.permute.xlu1 %675 }
 0x163   :  { %185 = vxpose.xlu1.b32.cont [4/8] (short) %v3841_v41, 128  ;;  %v689_v46 = vsel %vm247_vm1, %v676_v18, 0.0 }
 0x166   :  { %v891_v24 = vpop.permute.xlu1 %890 }
 0x167   :  { %258 = vadd.xlane.f32.xlu0 %v257_v7  ;;  %186 = vxpose.xlu1.b32.cont [5/8] (short) %v167_v50, 128  ;;  %v904_v51 = vsel %vm247_vm1, %v891_v24, 0.0 }
 0x16a   :  { %v457_v26 = vpop.permute.xlu1 %456 }
 0x16b   :  { %187 = vxpose.xlu1.b32.cont [6/8] (short) %v170_v54, 128  ;;  %v468_v44 = vsel %vm247_vm1, %v457_v26, 0.0 }
 0x16e   :  { %v672_v34 = vpop.permute.xlu1 %671 }
 0x16f   :  { %188 = vxpose.xlu1.b32.cont [7/8] (short) %v3188_v49, 128 }
 0x172   :  { %v887_v48 = vpop.permute.xlu1 %886 }
 0x173   :  { %189 = vxpose.xlu1.b32.end [8/8] (short) %v3189_v52, 128  ;;  %v898_v50 = vsel %vm247_vm1, %v887_v48, 0.0 }
 0x17a   :  { %v3927_v32 = vpop.xlane.xlu0 %255 }
 0x17d   :  { %923 = vperm.xlu0 %3400, %v3813_v29  }
 0x17e   :  { %v463_v35 = vpop.permute.xlu0 %462 }
 0x181   :  { %3401 = vset.pattern.permute.xlu0 %v3597_v10 }
 0x182   :  { %267 = vperm.xlu0 %3401, %v3798_v27   ;;  %v683_v27 = vsel %vm247_vm1, %v672_v34, 0.0  ;;  %v678_v36 = vpop.permute.xlu0 %677 }
 0x183   :  { %v692_v47 = vsel %vm247_vm1, %v678_v36, 0.0 }
 0x186   :  { %272 = vperm.xlu0 %3401, %v3806_v28   ;;  %v477_v28 = vsel %vm247_vm1, %v463_v35, 0.0  ;;  %v893_v37 = vpop.permute.xlu0 %892 }
 0x187   :  { %v907_v56 = vsel %vm247_vm1, %v893_v37, 0.0 }
 0x18a   :  { %277 = vperm.xlu0 %3401, %v3813_v29  }
 0x1a9   :  { %684 = vadd.xlane.f32.xlu0 %v683_v27 }
 0x1ad   :  { %478 = vadd.xlane.f32.xlu0 %v477_v28 }
 0x1b1   :  { %v253_v57 = vpop.xlane.xlu1 %252 }
 0x1b7   :  { %v3931_v38 = vpop.xlane.xlu0 %249 }
 0x1ba   :  { %475 = vadd.xlane.f32.xlu1 %v474_v39 }
 0x1bb   :  { %v459_v41 = vpop.permute.xlu0 %458 }
 0x1bc   :  { %v471_v43 = vsel %vm247_vm1, %v459_v41, 0.0 }
 0x1bd   :  { %472 = vadd.xlane.f32.xlu0 %v471_v43 }
 0x1be   :  { %469 = vadd.xlane.f32.xlu1 %v468_v44 }
 0x1bf   :  { %v674_v49 = vpop.permute.xlu0 %673 }
 0x1c0   :  { %v686_v61 = vsel %vm247_vm1, %v674_v49, 0.0 }
 0x1c1   :  { %690 = vadd.xlane.f32.xlu0 %v689_v46  ;;  %v218_v46 = vld [vmem:[%s4948_s8] sm:$0xff] }
 0x1c2   :  { %v221_v49 = vunpack.c.2.s8 %v218_v46 }
 0x1c3   :  { %v889_v52 = vpop.permute.xlu0 %888 }
 0x1c4   :  { %v901_v54 = vsel %vm247_vm1, %v889_v52, 0.0  ;;  %v219_v52 = vunpack.c.0.s8 %v218_v46 }
 0x1c5   :  { %693 = vadd.xlane.f32.xlu0 %v692_v47 }
 0x1c9   :  { %899 = vadd.xlane.f32.xlu0 %v898_v50 }
 0x1cd   :  { %905 = vadd.xlane.f32.xlu0 %v904_v51 }
 0x1cf   :  { %708 = vperm.xlu1 %3399, %v3813_v29  }
 0x1d1   :  { %902 = vadd.xlane.f32.xlu0 %v901_v54 }
 0x1d3   :  { %3402 = vset.pattern.permute.xlu1 %v3597_v10 }
 0x1d5   :  { %908 = vadd.xlane.f32.xlu0 %v907_v56  ;;  %v3959_v56 = vcvt.s32.f32 %v221_v49 }
 0x1d7   :  { %v198_v58 = vpop.trf.xlu1  ;;  %vm229_vm3 = vcmp.gt.f32.partialorder %v3959_v56, 0.0  ;;  %v4218_v56 = vld [vmem:[%s4949_s28] sm:$0xf] }
 0x1d8   :  { %v280_v5 = vmul.f32 %v3829_v33, %v198_v58  ;;  %v222_v58 = vunpack.c.3.s8 %v218_v46 }
 0x1da   :  { %v285_v26 = vsel %vm284_vm2, %v280_v5, 0.0 }
 0x1db   :  { %v199_v59 = vpop.trf.xlu1 }
 0x1df   :  { %v200_v60 = vpop.trf.xlu1 }
 0x1e3   :  { %v201_v62 = vpop.trf.xlu1 }
 0x1e7   :  { %v202_v0 = vpop.trf.xlu1 }
 0x1eb   :  { %v203_v29 = vpop.trf.xlu1 }
 0x1ef   :  { %v204_v7 = vpop.trf.xlu1 }
 0x1f3   :  { %687 = vadd.xlane.f32.xlu1 %v686_v61  ;;  %v205_v36 = vpop.trf.xlu1 }
 0x1f4   :  { %v259_v63 = vpop.xlane.xlu0 %258 }
 0x1f7   :  { %v3952_v33 = vpop.trf.xlu1 }
 0x1fb   :  { %v3957_v50 = vpop.trf.xlu1 }
 0x1fc   :  { %v3945_v1 = vpop.permute.xlu0 %923 }
 0x201   :  { %v268_v3 = vpop.permute.xlu0 %267 }
 0x202   :  { %v281_v4 = vmul.f32 %v268_v3, %v199_v59  ;;  %v3965_v3 = vpop.trf.xlu1 }
 0x204   :  { %v286_v18 = vsel %vm284_vm2, %v281_v4, 0.0 }
 0x205   :  { %v273_v17 = vpop.permute.xlu0 %272  ;;  %v287_v35 = vadd.f32 %v286_v18, %v285_v26  ;;  %v220_v18 = vunpack.c.1.s8 %v218_v46 }
 0x206   :  { %v282_v24 = vmul.f32 %v273_v17, %v200_v60  ;;  %v3962_v60 = vcvt.s32.f32 %v219_v52  ;;  %v3968_v17 = vcvt.s32.f32 %v222_v58 }
 0x208   :  { %v288_v34 = vsel %vm284_vm2, %v282_v24, 0.0  ;;  %vm227_vm6 = vcmp.gt.f32.partialorder %v3962_v60, 0.0  ;;  %vm230_vm8 = vcmp.gt.f32.partialorder %v3968_v17, 0.0  ;;  %v4226_v17 = vld [vmem:[%s4950_s5] sm:$0xff] }
 0x209   :  { %v278_v27 = vpop.permute.xlu0 %277  ;;  %v289_v37 = vadd.f32 %v288_v34, %v287_v35 }
 0x20a   :  { %v283_v28 = vmul.f32 %v278_v27, %v201_v62  ;;  %v3981_v27 = vcvt.s32.f32 %v220_v18 }
 0x20c   :  { %v290_v39 = vsel %vm284_vm2, %v283_v28, 0.0  ;;  %v497_v28 = vmul.f32 %v3903_v6, %v203_v29  ;;  %v499_v29 = vmul.f32 %v3908_v9, %v205_v36  ;;  %vm228_vm10 = vcmp.gt.f32.partialorder %v3981_v27, 0.0 }
 0x20d   :  { %v291_v41 = vadd.f32 %v290_v39, %v289_v37  ;;  %v3984_v37 = vpop.trf.xlu1 }
 0x20e   :  { %v501_v6 = vsel %vm284_vm2, %v497_v28, 0.0 }
 0x20f   :  { %v292_v43 = vrot.slane %v291_v41, 4 }
 0x211   :  { %v293_v44 = vadd.f32 %v292_v43, %v291_v41  ;;  %v496_v41 = vmul.f32 %v3839_v40, %v202_v0  ;;  %v498_v43 = vmul.f32 %v3906_v8, %v204_v7  ;;  %v210_v8 = vpop.trf.xlu1 }
 0x212   :  { %v926_v18 = vmul.f32 %v3912_v13, %v210_v8 }
 0x213   :  { %v294_v47 = vrot.slane %v293_v44, 2  ;;  %v503_v40 = vsel %vm284_vm2, %v498_v43, 0.0 }
 0x215   :  { %v295_v48 = vadd.f32 %v294_v47, %v293_v44 }
 0x217   :  { %v296_v51 = vrot.slane %v295_v48, 1 }
 0x219   :  { %v297_v54 = vadd.f32 %v296_v51, %v295_v48  ;;  %v500_v48 = vsel %vm284_vm2, %v496_v41, 0.0  ;;  %v505_v51 = vsel %vm284_vm2, %v499_v29, 0.0 }
 0x21a   :  { %v502_v7 = vadd.f32 %v501_v6, %v500_v48 }
 0x21b   :  { %v300_v59 = vadd.f32 %v297_v54, %v3927_v32  ;;  %v298_v61 = vadd.f32 %v297_v54, %v3931_v38  ;;  %v301_v62 = vadd.f32 %v297_v54, %v259_v63  ;;  %v299_v26 = vadd.f32 %v297_v54, %v253_v57  ;;  %v211_v54 = vpop.trf.xlu1 }
 0x21c   :  { %v504_v9 = vadd.f32 %v503_v40, %v502_v7  ;;  %v713_v40 = vmul.f32 %v3920_v15, %v3965_v3 }
 0x21d   :  { %vm304_vm4 = vcmp.gt.f32.partialorder %v300_v59, 0.0  ;;  %v308_v4 = vmul.f32 0.2, %v300_v59  ;;  %vm302_vm5 = vcmp.gt.f32.partialorder %v298_v61, 0.0  ;;  %v306_v5 = vmul.f32 0.2, %v298_v61 }
 0x21e   :  { %v309_v32 = vmul.f32 0.2, %v301_v62  ;;  %vm305_vm7 = vcmp.gt.f32.partialorder %v301_v62, 0.0  ;;  %v307_v39 = vmul.f32 0.2, %v299_v26  ;;  %vm303_vm9 = vcmp.gt.f32.partialorder %v299_v26, 0.0 }
 0x21f   :  { %v312_v24 = vsel %vm304_vm4, %v300_v59, %v308_v4  ;;  %v310_v63 = vsel %vm302_vm5, %v298_v61, %v306_v5  ;;  %v506_v52 = vadd.f32 %v505_v51, %v504_v9  ;;  %v212_v59 = vpop.trf.xlu1  ;;  %v927_v4 = vmul.f32 %v3915_v14, %v211_v54 }
 0x220   :  { %v3973_v38 = vsel %vm229_vm3, %v312_v24, -1e+30  ;;  %v3979_v35 = vsel %vm227_vm6, %v310_v63, -1e+30  ;;  %v313_v57 = vsel %vm305_vm7, %v301_v62, %v309_v32  ;;  %v311_v47 = vsel %vm303_vm9, %v299_v26, %v307_v39 }
 0x221   :  { %v324_v34 = vsel %vm284_vm2, %v3973_v38, -inf  ;;  %v318_v44 = vsel %vm284_vm2, %v3979_v35, -inf  ;;  %v3993_v46 = vsel %vm230_vm8, %v313_v57, -1e+30  ;;  %v4004_v49 = vsel %vm228_vm10, %v311_v47, -1e+30 }
 0x222   :  { %325 = vmax.xlane.f32.xlu0 %v324_v34  ;;  %v327_v0 = vsel %vm284_vm2, %v3993_v46, -inf  ;;  %v321_v36 = vsel %vm284_vm2, %v4004_v49, -inf  ;;  %v507_v58 = vrot.slane %v506_v52, 4  ;;  %v928_v24 = vmul.f32 %v3925_v25, %v212_v59 }
 0x223   :  { %v213_v5 = vpop.trf.xlu1  ;;  %v931_v26 = vsel %vm284_vm2, %v927_v4, 0.0  ;;  %v930_v34 = vsel %vm284_vm2, %v926_v18, 0.0  ;;  %v712_v25 = vmul.f32 %v3923_v22, %v3957_v50 }
 0x224   :  { %v508_v61 = vadd.f32 %v507_v58, %v506_v52  ;;  %v929_v63 = vmul.f32 %v3945_v1, %v213_v5  ;;  %v933_v28 = vsel %vm284_vm2, %v928_v24, 0.0  ;;  %v932_v39 = vadd.f32 %v931_v26, %v930_v34 }
 0x225   :  { %v711_v1 = vmul.f32 %v3910_v12, %v3952_v33  ;;  %v716_v51 = vsel %vm284_vm2, %v712_v25, 0.0  ;;  %v718_v12 = vsel %vm284_vm2, %v713_v40, 0.0 }
 0x226   :  { %319 = vmax.xlane.f32.xlu0 %v318_v44  ;;  %v509_v62 = vrot.slane %v508_v61, 2  ;;  %v935_v43 = vsel %vm284_vm2, %v929_v63, 0.0  ;;  %v934_v14 = vadd.f32 %v933_v28, %v932_v39 }
 0x227   :  { %v715_v52 = vsel %vm284_vm2, %v711_v1, 0.0 }
 0x228   :  { %v510_v32 = vadd.f32 %v509_v62, %v508_v61  ;;  %v936_v44 = vadd.f32 %v935_v43, %v934_v14  ;;  %v717_v3 = vadd.f32 %v716_v51, %v715_v52 }
 0x22a   :  { %328 = vmax.xlane.f32.xlu0 %v327_v0  ;;  %v511_v41 = vrot.slane %v510_v32, 1  ;;  %v937_v48 = vrot.slane %v936_v44, 4  ;;  %v719_v62 = vadd.f32 %v718_v12, %v717_v3 }
 0x22c   :  { %v512_v6 = vadd.f32 %v511_v41, %v510_v32  ;;  %v938_v54 = vadd.f32 %v937_v48, %v936_v44 }
 0x22e   :  { %322 = vmax.xlane.f32.xlu0 %v321_v36  ;;  %v939_v4 = vrot.slane %v938_v54, 2 }
 0x230   :  { %v940_v63 = vadd.f32 %v939_v4, %v938_v54 }
 0x236   :  { %v685_v57 = vpop.xlane.xlu0 %684 }
 0x23a   :  { %v479_v13 = vpop.xlane.xlu0 %478 }
 0x23b   :  { %v516_v44 = vadd.f32 %v512_v6, %v479_v13 }
 0x23d   :  { %v524_v40 = vmul.f32 0.2, %v516_v44  ;;  %vm520_vm13 = vcmp.gt.f32.partialorder %v516_v44, 0.0 }
 0x247   :  { %v476_v29 = vpop.xlane.xlu1 %475 }
 0x248   :  { %v515_v47 = vadd.f32 %v512_v6, %v476_v29 }
 0x24a   :  { %v523_v8 = vmul.f32 0.2, %v515_v47  ;;  %v473_v0 = vpop.xlane.xlu0 %472  ;;  %vm519_vm11 = vcmp.gt.f32.partialorder %v515_v47, 0.0 }
 0x24b   :  { %v470_v7 = vpop.xlane.xlu1 %469 }
 0x24c   :  { %v513_v9 = vadd.f32 %v512_v6, %v470_v7  ;;  %v527_v36 = vsel %vm519_vm11, %v515_v47, %v523_v8  ;;  %v514_v8 = vadd.f32 %v512_v6, %v473_v0 }
 0x24d   :  { %v4027_v22 = vsel %vm229_vm3, %v527_v36, -1e+30 }
 0x24e   :  { %v521_v33 = vmul.f32 0.2, %v513_v9  ;;  %v691_v50 = vpop.xlane.xlu0 %690  ;;  %v539_v15 = vsel %vm284_vm2, %v4027_v22, -inf  ;;  %vm517_vm12 = vcmp.gt.f32.partialorder %v513_v9, 0.0  ;;  %v522_v13 = vmul.f32 0.2, %v514_v8 }
 0x24f   :  { %540 = vmax.xlane.f32.xlu0 %v539_v15  ;;  %v709_v58 = vpop.permute.xlu1 %708  ;;  %vm518_vm7 = vcmp.gt.f32.partialorder %v514_v8, 0.0 }
 0x250   :  { %v714_v59 = vmul.f32 %v709_v58, %v3984_v37  ;;  %v525_v61 = vsel %vm517_vm12, %v513_v9, %v521_v33  ;;  %v941_v37 = vrot.slane %v940_v63, 1  ;;  %v528_v33 = vsel %vm520_vm13, %v516_v44, %v524_v40 }
 0x251   :  { %v4035_v5 = vsel %vm227_vm6, %v525_v61, -1e+30 }
 0x252   :  { %v720_v18 = vsel %vm284_vm2, %v714_v59, 0.0  ;;  %v694_v24 = vpop.xlane.xlu0 %693  ;;  %v533_v32 = vsel %vm284_vm2, %v4035_v5, -inf  ;;  %v942_v25 = vadd.f32 %v941_v37, %v940_v63 }
 0x253   :  { %v721_v26 = vadd.f32 %v720_v18, %v719_v62  ;;  %534 = vmax.xlane.f32.xlu0 %v533_v32  ;;  %v526_v32 = vsel %vm518_vm7, %v514_v8, %v522_v13 }
 0x254   :  { %v4072_v37 = vsel %vm228_vm10, %v526_v32, -1e+30 }
 0x255   :  { %v722_v34 = vrot.slane %v721_v26, 4  ;;  %v536_v44 = vsel %vm284_vm2, %v4072_v37, -inf }
 0x256   :  { %v900_v28 = vpop.xlane.xlu0 %899 }
 0x257   :  { %v723_v39 = vadd.f32 %v722_v34, %v721_v26 }
 0x259   :  { %v724_v41 = vrot.slane %v723_v39, 2 }
 0x25a   :  { %v4040_v43 = vpop.xlane.xlu0 %905 }
 0x25b   :  { %v725_v14 = vadd.f32 %v724_v41, %v723_v39 }
 0x25d   :  { %v726_v29 = vrot.slane %v725_v14, 1 }
 0x25e   :  { %v903_v47 = vpop.xlane.xlu0 %902 }
 0x25f   :  { %v727_v1 = vadd.f32 %v726_v29, %v725_v14  ;;  %v944_v48 = vadd.f32 %v942_v25, %v903_v47 }
 0x261   :  { %v731_v7 = vadd.f32 %v727_v1, %v694_v24  ;;  %v952_v51 = vmul.f32 0.2, %v944_v48  ;;  %v728_v9 = vadd.f32 %v727_v1, %v685_v57  ;;  %vm948_vm14 = vcmp.gt.f32.partialorder %v944_v48, 0.0 }
 0x262   :  { %v909_v36 = vpop.xlane.xlu0 %908  ;;  %v730_v0 = vadd.f32 %v727_v1, %v691_v50  ;;  %v4060_v50 = vsel %vm230_vm8, %v528_v33, -1e+30  ;;  %v943_v24 = vadd.f32 %v942_v25, %v900_v28 }
 0x263   :  { %v739_v52 = vmul.f32 0.2, %v731_v7  ;;  %v946_v54 = vadd.f32 %v942_v25, %v909_v36  ;;  %vm735_vm15 = vcmp.gt.f32.partialorder %v731_v7, 0.0  ;;  %vm732_vm4 = vcmp.gt.f32.partialorder %v728_v9, 0.0 }
 0x264   :  { %v736_v12 = vmul.f32 0.2, %v728_v9  ;;  %v956_v58 = vsel %vm948_vm14, %v944_v48, %v952_v51  ;;  %v738_v26 = vmul.f32 0.2, %v730_v0  ;;  %vm734_vm9 = vcmp.gt.f32.partialorder %v730_v0, 0.0 }
 0x265   :  { %v954_v15 = vmul.f32 0.2, %v946_v54  ;;  %v743_v3 = vsel %vm735_vm15, %v731_v7, %v739_v52  ;;  %vm950_vm5 = vcmp.gt.f32.partialorder %v946_v54, 0.0  ;;  %v4056_v4 = vsel %vm228_vm10, %v956_v58, -1e+30 }
 0x266   :  { %v4044_v59 = vsel %vm230_vm8, %v743_v3, -1e+30  ;;  %v740_v6 = vsel %vm732_vm4, %v728_v9, %v736_v12  ;;  %v966_v63 = vsel %vm284_vm2, %v4056_v4, -inf  ;;  %v542_v34 = vsel %vm284_vm2, %v4060_v50, -inf }
 0x267   :  { %v757_v57 = vsel %vm284_vm2, %v4044_v59, -inf  ;;  %v4050_v61 = vsel %vm227_vm6, %v740_v6, -1e+30  ;;  %v958_v18 = vsel %vm950_vm5, %v946_v54, %v954_v15  ;;  %v951_v28 = vmul.f32 0.2, %v943_v24 }
 0x268   :  { %758 = vmax.xlane.f32.xlu1 %v757_v57  ;;  %v748_v62 = vsel %vm284_vm2, %v4050_v61, -inf  ;;  %v4068_v39 = vsel %vm230_vm8, %v958_v18, -1e+30  ;;  %v742_v41 = vsel %vm734_vm9, %v730_v0, %v738_v26  ;;  %vm947_vm11 = vcmp.gt.f32.partialorder %v943_v24, 0.0 }
 0x269   :  { %749 = vmax.xlane.f32.xlu0 %v748_v62  ;;  %v972_v14 = vsel %vm284_vm2, %v4068_v39, -inf  ;;  %v4080_v29 = vsel %vm229_vm3, %v742_v41, -1e+30  ;;  %v955_v47 = vsel %vm947_vm11, %v943_v24, %v951_v28  ;;  %v945_v7 = vadd.f32 %v942_v25, %v4040_v43 }
 0x26a   :  { %v754_v48 = vsel %vm284_vm2, %v4080_v29, -inf  ;;  %v4086_v40 = vsel %vm227_vm6, %v955_v47, -1e+30 }
 0x26b   :  { %v963_v8 = vsel %vm284_vm2, %v4086_v40, -inf  ;;  %v953_v9 = vmul.f32 0.2, %v945_v7  ;;  %vm949_vm12 = vcmp.gt.f32.partialorder %v945_v7, 0.0 }
 0x26c   :  { %967 = vmax.xlane.f32.xlu1 %v966_v63 }
 0x26d   :  { %543 = vmax.xlane.f32.xlu0 %v542_v34  ;;  %v957_v12 = vsel %vm949_vm12, %v945_v7, %v953_v9 }
 0x26e   :  { %v4099_v15 = vsel %vm229_vm3, %v957_v12, -1e+30 }
 0x26f   :  { %v969_v43 = vsel %vm284_vm2, %v4099_v15, -inf }
 0x270   :  { %973 = vmax.xlane.f32.xlu1 %v972_v14 }
 0x271   :  { %537 = vmax.xlane.f32.xlu0 %v536_v44 }
 0x275   :  { %755 = vmax.xlane.f32.xlu0 %v754_v48 }
 0x279   :  { %964 = vmax.xlane.f32.xlu0 %v963_v8 }
 0x280   :  { %v688_v51 = vpop.xlane.xlu1 %687 }
 0x281   :  { %v729_v36 = vadd.f32 %v727_v1, %v688_v51 }
 0x283   :  { %v737_v52 = vmul.f32 0.2, %v729_v36  ;;  %vm733_vm13 = vcmp.gt.f32.partialorder %v729_v36, 0.0 }
 0x285   :  { %v741_v54 = vsel %vm733_vm13, %v729_v36, %v737_v52 }
 0x286   :  { %v4093_v33 = vsel %vm228_vm10, %v741_v54, -1e+30 }
 0x287   :  { %v751_v13 = vsel %vm284_vm2, %v4093_v33, -inf }
 0x288   :  { %752 = vmax.xlane.f32.xlu0 %v751_v13 }
 0x28c   :  { %970 = vmax.xlane.f32.xlu0 %v969_v43 }
 0x2af   :  { %v326_v25 = vpop.xlane.xlu0 %325 }
 0x2b0   :  { %v332_v1 = vsub.f32 %v3973_v38, %v326_v25 }
 0x2b2   :  { %v338_v3 = vmul.f32 1.442695, %v332_v1 }
 0x2b3   :  { %v320_v58 = vpop.xlane.xlu0 %319 }
 0x2b4   :  { %3447 = vpow2.f32 %v338_v3  ;;  %v330_v6 = vsub.f32 %v3979_v35, %v320_v58 }
 0x2b6   :  { %v334_v0 = vmul.f32 1.442695, %v330_v6 }
 0x2b7   :  { %v329_v57 = vpop.xlane.xlu0 %328 }
 0x2b8   :  { %3449 = vpow2.f32 %v334_v0  ;;  %v333_v62 = vsub.f32 %v3993_v46, %v329_v57 }
 0x2ba   :  { %v340_v18 = vmul.f32 1.442695, %v333_v62 }
 0x2bb   :  { %v323_v24 = vpop.xlane.xlu0 %322 }
 0x2bc   :  { %3451 = vpow2.f32 %v340_v18  ;;  %v331_v32 = vsub.f32 %v4004_v49, %v323_v24 }
 0x2be   :  { %v3448_v26 = vpop.eup %3447  ;;  %v336_v63 = vmul.f32 1.442695, %v331_v32 }
 0x2bf   :  { %v4109_v38 = vsel %vm229_vm3, %v3448_v26, 0.0 }
 0x2c0   :  { %3453 = vpow2.f32 %v336_v63  ;;  %v352_v35 = vsel %vm284_vm2, %v4109_v38, 0.0 }
 0x2c1   :  { %353 = vadd.xlane.f32.xlu0 %v352_v35 }
 0x2c2   :  { %v3450_v34 = vpop.eup %3449 }
 0x2c3   :  { %v4115_v46 = vsel %vm227_vm6, %v3450_v34, 0.0 }
 0x2c4   :  { %v346_v28 = vsel %vm284_vm2, %v4115_v46, 0.0 }
 0x2c5   :  { %347 = vadd.xlane.f32.xlu0 %v346_v28 }
 0x2c6   :  { %v3452_v49 = vpop.eup %3451 }
 0x2c7   :  { %v4121_v41 = vsel %vm230_vm8, %v3452_v49, 0.0 }
 0x2c8   :  { %v355_v14 = vsel %vm284_vm2, %v4121_v41, 0.0 }
 0x2c9   :  { %356 = vadd.xlane.f32.xlu1 %v355_v14 }
 0x2ca   :  { %v3454_v44 = vpop.eup %3453 }
 0x2cb   :  { %v4127_v47 = vsel %vm228_vm10, %v3454_v44, 0.0 }
 0x2cc   :  { %v349_v48 = vsel %vm284_vm2, %v4127_v47, 0.0 }
 0x2cd   :  { %350 = vadd.xlane.f32.xlu1 %v349_v48 }
 0x2dc   :  { %v541_v8 = vpop.xlane.xlu0 %540 }
 0x2dd   :  { %v547_v7 = vsub.f32 %v4027_v22, %v541_v8 }
 0x2df   :  { %v553_v51 = vmul.f32 1.442695, %v547_v7 }
 0x2e0   :  { %v535_v9 = vpop.xlane.xlu0 %534 }
 0x2e1   :  { %3455 = vpow2.f32 %v553_v51  ;;  %v545_v36 = vsub.f32 %v4035_v5, %v535_v9 }
 0x2e3   :  { %v549_v52 = vmul.f32 1.442695, %v545_v36 }
 0x2e5   :  { %3457 = vpow2.f32 %v549_v52 }
 0x2eb   :  { %v3456_v54 = vpop.eup %3455 }
 0x2ec   :  { %v4135_v12 = vsel %vm229_vm3, %v3456_v54, 0.0 }
 0x2ed   :  { %v567_v13 = vsel %vm284_vm2, %v4135_v12, 0.0 }
 0x2ee   :  { %568 = vadd.xlane.f32.xlu0 %v567_v13 }
 0x2ef   :  { %v3458_v43 = vpop.eup %3457 }
 0x2f0   :  { %v4141_v22 = vsel %vm227_vm6, %v3458_v43, 0.0 }
 0x2f1   :  { %v561_v25 = vsel %vm284_vm2, %v4141_v22, 0.0 }
 0x2f2   :  { %562 = vadd.xlane.f32.xlu0 %v561_v25 }
 0x2f5   :  { %v759_v1 = vpop.xlane.xlu1 %758 }
 0x2f6   :  { %v750_v5 = vpop.xlane.xlu0 %749  ;;  %v763_v3 = vsub.f32 %v4044_v59, %v759_v1 }
 0x2f7   :  { %v760_v57 = vsub.f32 %v4050_v61, %v750_v5 }
 0x2f8   :  { %v770_v62 = vmul.f32 1.442695, %v763_v3 }
 0x2f9   :  { %v764_v26 = vmul.f32 1.442695, %v760_v57  ;;  %v968_v44 = vpop.xlane.xlu1 %967 }
 0x2fa   :  { %v544_v58 = vpop.xlane.xlu0 %543  ;;  %v976_v9 = vsub.f32 %v4056_v4, %v968_v44 }
 0x2fb   :  { %v548_v6 = vsub.f32 %v4060_v50, %v544_v58 }
 0x2fc   :  { %v981_v5 = vmul.f32 1.442695, %v976_v9 }
 0x2fd   :  { %v555_v0 = vmul.f32 1.442695, %v548_v6  ;;  %v974_v36 = vpop.xlane.xlu1 %973 }
 0x2fe   :  { %v538_v18 = vpop.xlane.xlu0 %537  ;;  %v978_v4 = vsub.f32 %v4068_v39, %v974_v36 }
 0x2ff   :  { %3459 = vpow2.f32 %v555_v0  ;;  %v546_v24 = vsub.f32 %v4072_v37, %v538_v18 }
 0x300   :  { %3461 = vpow2.f32 %v770_v62  ;;  %v985_v57 = vmul.f32 1.442695, %v978_v4 }
 0x301   :  { %v551_v32 = vmul.f32 1.442695, %v546_v24 }
 0x302   :  { %v756_v63 = vpop.xlane.xlu0 %755 }
 0x303   :  { %3463 = vpow2.f32 %v551_v32  ;;  %v762_v35 = vsub.f32 %v4080_v29, %v756_v63 }
 0x304   :  { %3465 = vpow2.f32 %v764_v26 }
 0x305   :  { %v768_v34 = vmul.f32 1.442695, %v762_v35 }
 0x306   :  { %v965_v59 = vpop.xlane.xlu0 %964 }
 0x307   :  { %3467 = vpow2.f32 %v768_v34  ;;  %v975_v50 = vsub.f32 %v4086_v40, %v965_v59 }
 0x309   :  { %v3460_v28 = vpop.eup %3459  ;;  %v979_v61 = vmul.f32 1.442695, %v975_v50 }
 0x30a   :  { %v4153_v49 = vsel %vm230_vm8, %v3460_v28, 0.0  ;;  %v3462_v14 = vpop.eup %3461 }
 0x30b   :  { %3469 = vpow2.f32 %v979_v61  ;;  %v570_v37 = vsel %vm284_vm2, %v4153_v49, 0.0  ;;  %v4165_v7 = vsel %vm230_vm8, %v3462_v14, 0.0  ;;  %v1419_v61 = vrot.slane %v4218_v56, %v3773_v16 }
 0x30c   :  { %571 = vadd.xlane.f32.xlu1 %v570_v37  ;;  %v785_v13 = vsel %vm284_vm2, %v4165_v7, 0.0  ;;  %3471 = vpow2.f32 %v981_v5  ;;  %v4232_v37 = vld [vmem:[%s4950_s5 + $0x18] sm:$0xff] }
 0x30d   :  { %v3464_v29 = vpop.eup %3463 }
 0x30e   :  { %v4159_v48 = vsel %vm228_vm10, %v3464_v29, 0.0  ;;  %v3466_v8 = vpop.eup %3465 }
 0x30f   :  { %v564_v40 = vsel %vm284_vm2, %v4159_v48, 0.0  ;;  %v4178_v43 = vsel %vm227_vm6, %v3466_v8, 0.0 }
 0x310   :  { %565 = vadd.xlane.f32.xlu1 %v564_v40  ;;  %v776_v58 = vsel %vm284_vm2, %v4178_v43, 0.0 }
 0x311   :  { %v3468_v51 = vpop.eup %3467 }
 0x312   :  { %v4170_v52 = vsel %vm229_vm3, %v3468_v51, 0.0 }
 0x313   :  { %v782_v54 = vsel %vm284_vm2, %v4170_v52, 0.0 }
 0x314   :  { %783 = vadd.xlane.f32.xlu0 %v782_v54  ;;  %786 = vadd.xlane.f32.xlu1 %v785_v13 }
 0x315   :  { %v3470_v25 = vpop.eup %3469  ;;  %v753_v1 = vpop.xlane.xlu0 %752 }
 0x316   :  { %v761_v3 = vsub.f32 %v4093_v33, %v753_v1  ;;  %v4186_v0 = vsel %vm227_vm6, %v3470_v25, 0.0  ;;  %v3472_v33 = vpop.eup %3471 }
 0x317   :  { %v991_v39 = vsel %vm284_vm2, %v4186_v0, 0.0 }
 0x318   :  { %v766_v6 = vmul.f32 1.442695, %v761_v3  ;;  %777 = vadd.xlane.f32.xlu0 %v776_v58 }
 0x319   :  { %v971_v62 = vpop.xlane.xlu0 %970 }
 0x31a   :  { %3473 = vpow2.f32 %v766_v6  ;;  %v977_v18 = vsub.f32 %v4099_v15, %v971_v62  ;;  %v4199_v15 = vsel %vm228_vm10, %v3472_v33, 0.0 }
 0x31b   :  { %3475 = vpow2.f32 %v985_v57  ;;  %v994_v50 = vsel %vm284_vm2, %v4199_v15, 0.0 }
 0x31c   :  { %v983_v24 = vmul.f32 1.442695, %v977_v18  ;;  %992 = vadd.xlane.f32.xlu0 %v991_v39 }
 0x31e   :  { %3477 = vpow2.f32 %v983_v24 }
 0x324   :  { %v3474_v32 = vpop.eup %3473 }
 0x325   :  { %v4193_v60 = vsel %vm228_vm10, %v3474_v32, 0.0  ;;  %v3476_v63 = vpop.eup %3475 }
 0x326   :  { %v779_v26 = vsel %vm284_vm2, %v4193_v60, 0.0  ;;  %v4211_v28 = vsel %vm230_vm8, %v3476_v63, 0.0 }
 0x327   :  { %780 = vadd.xlane.f32.xlu1 %v779_v26  ;;  %v1000_v27 = vsel %vm284_vm2, %v4211_v28, 0.0 }
 0x328   :  { %v3478_v35 = vpop.eup %3477 }
 0x329   :  { %v4203_v34 = vsel %vm229_vm3, %v3478_v35, 0.0 }
 0x32a   :  { %v997_v59 = vsel %vm284_vm2, %v4203_v34, 0.0 }
 0x32b   :  { %998 = vadd.xlane.f32.xlu0 %v997_v59  ;;  %995 = vadd.xlane.f32.xlu1 %v994_v50 }
 0x32f   :  { %1001 = vadd.xlane.f32.xlu1 %v1000_v27 }
 0x341   :  { %1421 = vrot.lane.b32.xlu0 %v1419_v61, %s3600_s9 }
 0x345   :  { %1296 = vperm.xlu0 %3401, %v4226_v17  }
 0x349   :  { %1311 = vperm.xlu0 %3401, %v4232_v37  }
 0x34d   :  { %3404 = vset.pattern.permute.xlu0 %v3599_v23 }
 0x34e   :  { %v354_v14 = vpop.xlane.xlu0 %353 }
 0x34f   :  { %vm360_vm6 = vcmp.gt.f32.partialorder %v354_v14, 0.0 }
 0x350   :  { %v364_v51 = vsel %vm360_vm6, %v354_v14, 1.0 }
 0x352   :  { %v348_v44 = vpop.xlane.xlu0 %347 }
 0x353   :  { %vm358_vm3 = vcmp.gt.f32.partialorder %v348_v44, 0.0 }
 0x354   :  { %v362_v40 = vsel %vm358_vm3, %v348_v44, 1.0 }
 0x356   :  { %v357_v29 = vpop.xlane.xlu1 %356 }
 0x357   :  { %vm361_vm8 = vcmp.gt.f32.partialorder %v357_v29, 0.0 }
 0x358   :  { %v365_v8 = vsel %vm361_vm8, %v357_v29, 1.0 }
 0x359   :  { %3479 = vrcp.f32 %v365_v8 }
 0x35a   :  { %v351_v9 = vpop.xlane.xlu1 %350  ;;  %3481 = vrcp.f32 %v362_v40 }
 0x35b   :  { %vm359_vm10 = vcmp.gt.f32.partialorder %v351_v9, 0.0  ;;  %3483 = vrcp.f32 %v364_v51 }
 0x35c   :  { %v363_v36 = vsel %vm359_vm10, %v351_v9, 1.0 }
 0x35d   :  { %3485 = vrcp.f32 %v363_v36 }
 0x363   :  { %v3480_v54 = vpop.eup %3479 }
 0x364   :  { %v3482_v13 = vpop.eup %3481  ;;  %v373_v4 = vmul.f32 %v3480_v54, %v4121_v41 }
 0x365   :  { %v3484_v25 = vpop.eup %3483  ;;  %v367_v1 = vmul.f32 %v3482_v13, %v4115_v46 }
 0x366   :  { %v371_v58 = vmul.f32 %v3484_v25, %v4109_v38 }
 0x367   :  { %v3486_v5 = vpop.eup %3485 }
 0x368   :  { %v369_v3 = vmul.f32 %v3486_v5, %v4127_v47  ;;  %v375_v57 = vpack.c.bf16 %v373_v4, %v371_v58 }
 0x36a   :  { %v374_v6 = vpack.c.bf16 %v369_v3, %v367_v1 }
 0x36c   :  { %3198 = vmatprep.mubr.msk.bf16.mxu1 %vm284_vm2, %v374_v6 }
 0x36d   :  { %3199 = vmatmul.mubr.msk.bf16.vlgmr.msra.gmra.mrb[0].mxu1 %vm284_vm2, %v375_v57 }
 0x36e   :  { %3215 = vmatpush3.bf16.msra.mxu1 %v3850_v45 }
 0x36f   :  { %3216 = vmatprep.subr.bf16.mxu1 %v3845_v42 }
 0x372   :  { %3217 = vmatpush3.bf16.msra.mxu1 %v3845_v42 }
 0x373   :  { %3218 = vmatprep.subr.bf16.mxu1 %v3866_v55 }
 0x376   :  { %3219 = vmatpush3.bf16.msra.mxu1 %v3866_v55 }
 0x377   :  { %3220 = vmatprep.subr.bf16.mxu1 %v3862_v53 }
 0x37a   :  { %3221 = vmatpush3.bf16.msra.mxu1 %v3862_v53 }
 0x37b   :  { %v569_v38 = vpop.xlane.xlu0 %568 }
 0x37c   :  { %vm575_vm15 = vcmp.gt.f32.partialorder %v569_v38, 0.0 }
 0x37d   :  { %v579_v18 = vsel %vm575_vm15, %v569_v38, 1.0 }
 0x37f   :  { %v563_v46 = vpop.xlane.xlu0 %562 }
 0x380   :  { %vm573_vm14 = vcmp.gt.f32.partialorder %v563_v46, 0.0 }
 0x381   :  { %v577_v47 = vsel %vm573_vm14, %v563_v46, 1.0 }
 0x399   :  { %v572_v41 = vpop.xlane.xlu1 %571 }
 0x39a   :  { %vm576_vm4 = vcmp.gt.f32.partialorder %v572_v41, 0.0 }
 0x39b   :  { %v580_v62 = vsel %vm576_vm4, %v572_v41, 1.0 }
 0x39c   :  { %3487 = vrcp.f32 %v580_v62 }
 0x39d   :  { %v566_v39 = vpop.xlane.xlu1 %565  ;;  %3489 = vrcp.f32 %v577_v47 }
 0x39e   :  { %vm574_vm5 = vcmp.gt.f32.partialorder %v566_v39, 0.0  ;;  %3491 = vrcp.f32 %v579_v18 }
 0x39f   :  { %v578_v24 = vsel %vm574_vm5, %v566_v39, 1.0 }
 0x3a0   :  { %3493 = vrcp.f32 %v578_v24  ;;  %v3419_v24 = vld [vmem:[%s4951_s7] sm:$0xff]  }
 0x3a1   :  { %v784_v33 = vpop.xlane.xlu0 %783  ;;  %v787_v50 = vpop.xlane.xlu1 %786  ;;  %3238 = vmatprep.subr.bf16.mxu1 %v3419_v24 }
 0x3a2   :  { %vm790_vm7 = vcmp.gt.f32.partialorder %v784_v33, 0.0  ;;  %vm791_vm9 = vcmp.gt.f32.partialorder %v787_v50, 0.0 }
 0x3a3   :  { %v794_v8 = vsel %vm790_vm7, %v784_v33, 1.0  ;;  %v795_v51 = vsel %vm791_vm9, %v787_v50, 1.0  ;;  %v3424_v33 = vld [vmem:[%s4951_s7 + $0x28] sm:$0xff]  }
 0x3a4   :  { %3495 = vrcp.f32 %v794_v8 }
 0x3a5   :  { %v778_v27 = vpop.xlane.xlu0 %777  ;;  %3497 = vrcp.f32 %v795_v51 }
 0x3a6   :  { %v3488_v32 = vpop.eup %3487  ;;  %vm788_vm11 = vcmp.gt.f32.partialorder %v778_v27, 0.0 }
 0x3a7   :  { %v3490_v26 = vpop.eup %3489  ;;  %v588_v59 = vmul.f32 %v3488_v32, %v4153_v49  ;;  %v792_v9 = vsel %vm788_vm11, %v778_v27, 1.0  ;;  %v3425_v32 = vld [vmem:[%s4951_s7 + $0x30] sm:$0xff]  }
 0x3a8   :  { %v3492_v63 = vpop.eup %3491  ;;  %v582_v61 = vmul.f32 %v3490_v26, %v4141_v22  ;;  %3499 = vrcp.f32 %v792_v9  ;;  %v3426_v26 = vld [vmem:[%s4951_s7 + $0x38] sm:$0xff]  }
 0x3a9   :  { %v586_v44 = vmul.f32 %v3492_v63, %v4135_v12  ;;  %v993_v49 = vpop.xlane.xlu0 %992  ;;  %v1561_v63 = vrot.slane %v4218_v56, %v3785_v20 }
 0x3aa   :  { %v3494_v35 = vpop.eup %3493  ;;  %vm1003_vm12 = vcmp.gt.f32.partialorder %v993_v49, 0.0 }
 0x3ab   :  { %v584_v14 = vmul.f32 %v3494_v35, %v4159_v48  ;;  %v590_v40 = vpack.c.bf16 %v588_v59, %v586_v44  ;;  %v1007_v48 = vsel %vm1003_vm12, %v993_v49, 1.0  ;;  %v1277_v35 = vld [vmem:[%s4950_s5 + $0x8] sm:$0xff]  ;;  %1563 = vrot.lane.b32.xlu1 %v1561_v63, %s3601_s0  ;;  %v1703_v59 = vrot.slane %v4218_v56, %v3782_v19  ;;  %v4313_v44 = vld [vmem:[%s4950_s5 + $0x10] sm:$0xff] }
 0x3ac   :  { %1445 = vperm.xlu0 %3404, %v1277_v35  }
 0x3ad   :  { %v589_v29 = vpack.c.bf16 %v584_v14, %v582_v61 }
 0x3af   :  { %3210 = vmatprep.mubr.msk.bf16.mxu0 %vm284_vm2, %v589_v29  ;;  %1705 = vrot.lane.b32.xlu1 %v1703_v59, %s3602_s29  ;;  %v4326_v29 = vand.u32 127, %v237_v2 }
 0x3b0   :  { %3211 = vmatmul.mubr.msk.bf16.vlgmr.msra.gmra.mrb[8].mxu0 %vm284_vm2, %v590_v40  ;;  %3405 = vset.pattern.permute.xlu0 %v3598_v21 }
 0x3b1   :  { %3227 = vmatpush3.bf16.msra.mxu0 %v3850_v45  ;;  %1583 = vperm.xlu0 %3405, %v4226_v17   ;;  %vm647_vm10 = vcmp.lt.s32.totalorder %v4326_v29, 64  ;;  %vm432_vm14 = vcmp.lt.s32.totalorder %v4326_v29, 32  ;;  %vm861_vm4 = vcmp.ge.s32.totalorder %v4326_v29, 64  ;;  %vm862_vm5 = vcmp.lt.s32.totalorder %v4326_v29, 96 }
 0x3b2   :  { %3228 = vmatprep.subr.bf16.mxu0 %v3845_v42  ;;  %vm4353_vm7 = vmand %vm861_vm4, %vm862_vm5  ;;  %vm1076_vm9 = vcmp.ge.s32.totalorder %v4326_v29, 96 }
 0x3b3   :  { %1301 = vperm.xlu1 %3402, %v1277_v35  }
 0x3b4   :  { %v781_v12 = vpop.xlane.xlu1 %780 }
 0x3b5   :  { %3229 = vmatpush3.bf16.msra.mxu0 %v3845_v42  ;;  %vm789_vm13 = vcmp.gt.f32.partialorder %v781_v12, 0.0  ;;  %v3496_v42 = vpop.eup %3495  ;;  %3408 = vset.pattern.permute.xlu0 %v3603_v30 }
 0x3b6   :  { %v793_v22 = vsel %vm789_vm13, %v781_v12, 1.0  ;;  %3230 = vmatprep.subr.bf16.mxu0 %v3866_v55  ;;  %v3498_v5 = vpop.eup %3497  ;;  %v801_v58 = vmul.f32 %v3496_v42, %v4170_v52  ;;  %1729 = vperm.xlu0 %3408, %v1277_v35  }
 0x3b7   :  { %3501 = vrcp.f32 %v793_v22  ;;  %v3500_v1 = vpop.eup %3499  ;;  %1306 = vperm.xlu1 %3402, %v4313_v44  }
 0x3b8   :  { %v999_v36 = vpop.xlane.xlu0 %998  ;;  %v996_v54 = vpop.xlane.xlu1 %995  ;;  %3503 = vrcp.f32 %v1007_v48  ;;  %v797_v6 = vmul.f32 %v3500_v1, %v4178_v43 }
 0x3b9   :  { %3231 = vmatpush3.bf16.msra.mxu0 %v3866_v55  ;;  %vm1005_vm3 = vcmp.gt.f32.partialorder %v999_v36, 0.0  ;;  %vm1004_vm6 = vcmp.gt.f32.partialorder %v996_v54, 0.0  ;;  %v803_v55 = vmul.f32 %v3498_v5, %v4165_v7 }
 0x3ba   :  { %v1009_v45 = vsel %vm1005_vm3, %v999_v36, 1.0  ;;  %v1008_v13 = vsel %vm1004_vm6, %v996_v54, 1.0  ;;  %3232 = vmatprep.subr.bf16.mxu0 %v3862_v53 }
 0x3bb   :  { %3505 = vrcp.f32 %v1008_v13  ;;  %v805_v41 = vpack.c.bf16 %v803_v55, %v801_v58  ;;  %3403 = vset.pattern.permute.xlu1 %v3599_v23 }
 0x3bc   :  { %v1002_v25 = vpop.xlane.xlu1 %1001  ;;  %3507 = vrcp.f32 %v1009_v45  ;;  %1441 = vperm.xlu1 %3403, %v4226_v17  }
 0x3bd   :  { %3233 = vmatpush3.bf16.msra.mxu0 %v3862_v53  ;;  %vm1006_vm8 = vcmp.gt.f32.partialorder %v1002_v25, 0.0 }
 0x3be   :  { %v1010_v4 = vsel %vm1006_vm8, %v1002_v25, 1.0 }
 0x3bf   :  { %3509 = vrcp.f32 %v1010_v4 }
 0x3c0   :  { %1449 = vperm.xlu1 %3403, %v4313_v44  }
 0x3c1   :  { %v3502_v3 = vpop.eup %3501 }
 0x3c2   :  { %v799_v57 = vmul.f32 %v3502_v3, %v4193_v60  ;;  %v3504_v38 = vpop.eup %3503 }
 0x3c3   :  { %v1012_v62 = vmul.f32 %v3504_v38, %v4186_v0  ;;  %v3420_v0 = vld [vmem:[%s4951_s7 + $0x8] sm:$0xff]  }
 0x3c4   :  { %v804_v46 = vpack.c.bf16 %v799_v57, %v797_v6  ;;  %1453 = vperm.xlu1 %3403, %v4232_v37   ;;  %v3030_v6 = vld [vmem:[%s4956_s2] ss:$0 sm:$0xff]  ;;  %s4957_s2 = sld [smem:[#allocation15_spill]] }
 0x3c5   :  { %v3506_v47 = vpop.eup %3505 }
 0x3c6   :  { %3222 = vmatprep.mubr.msk.bf16.mxu1 %vm284_vm2, %v804_v46  ;;  %v3508_v53 = vpop.eup %3507  ;;  %v1014_v18 = vmul.f32 %v3506_v47, %v4199_v15  ;;  %v3421_v15 = vld [vmem:[%s4951_s7 + $0x10] sm:$0xff]  }
 0x3c7   :  { %3223 = vmatmul.mubr.msk.bf16.vlgmr.msra.gmra.mrb[4].mxu1 %vm284_vm2, %v805_v41  ;;  %v1016_v43 = vmul.f32 %v3508_v53, %v4203_v34  ;;  %v3422_v34 = vld [vmem:[%s4951_s7 + $0x18] sm:$0xff]  }
 0x3c8   :  { %v1019_v39 = vpack.c.bf16 %v1014_v18, %v1012_v62  ;;  %3239 = vmatpush3.bf16.msra.mxu1 %v3419_v24  ;;  %3406 = vset.pattern.permute.xlu1 %v3598_v21 }
 0x3c9   :  { %v3510_v7 = vpop.eup %3509  ;;  %3240 = vmatprep.subr.bf16.mxu1 %v3420_v0  ;;  %1587 = vperm.xlu1 %3406, %v1277_v35  }
 0x3ca   :  { %v1018_v52 = vmul.f32 %v3510_v7, %v4211_v28  ;;  %3234 = vmatprep.mubr.msk.bf16.mxu0 %vm284_vm2, %v1019_v39  ;;  %v3423_v28 = vld [vmem:[%s4951_s7 + $0x20] sm:$0xff]  }
 0x3cc   :  { %v1020_v60 = vpack.c.bf16 %v1018_v52, %v1016_v43  ;;  %3241 = vmatpush3.bf16.msra.mxu1 %v3420_v0 }
 0x3cd   :  { %3242 = vmatprep.subr.bf16.mxu1 %v3421_v15  ;;  %1591 = vperm.xlu1 %3406, %v4313_v44  }
 0x3ce   :  { %3235 = vmatmul.mubr.msk.bf16.vlgmr.msra.gmra.mrb[12].mxu0 %vm284_vm2, %v1020_v60  ;;  %vm646_vm2 = vcmp.ge.s32.totalorder %v4326_v29, 32 }
 0x3cf   :  { %vm4331_vm15 = vmand %vm646_vm2, %vm647_vm10 }
 0x3d0   :  { %3243 = vmatpush3.bf16.msra.mxu1 %v3421_v15 }
 0x3d1   :  { %3244 = vmatprep.subr.bf16.mxu1 %v3422_v34  ;;  %1595 = vperm.xlu1 %3406, %v4232_v37  }
 0x3d4   :  { %3245 = vmatpush3.bf16.msra.mxu1 %v3422_v34 }
 0x3d5   :  { %3246 = vmatprep.subr.bf16.mxu1 %v3423_v28  ;;  %3407 = vset.pattern.permute.xlu1 %v3603_v30 }
 0x3d6   :  { %1725 = vperm.xlu1 %3407, %v4226_v17  }
 0x3d8   :  { %3247 = vmatpush3.bf16.msra.mxu1 %v3423_v28 }
 0x3d9   :  { %3248 = vmatprep.subr.bf16.mxu1 %v3424_v33 }
 0x3dc   :  { %3249 = vmatpush3.bf16.msra.mxu1 %v3424_v33 }
 0x3dd   :  { %3250 = vmatprep.subr.bf16.mxu1 %v3425_v32 }
 0x3e0   :  { %3251 = vmatpush3.bf16.msra.mxu1 %v3425_v32 }
 0x3e1   :  { %3252 = vmatprep.subr.bf16.mxu1 %v3426_v26 }
 0x3e4   :  { %3253 = vmatpush3.bf16.msra.mxu1 %v3426_v26 }
 0x440   :  { %v3200_v50 = vpop.f32.mrb[0].mxu1 }
 0x441   :  { %v416_v27 = vpop.f32.mrb[1].mxu1  ;;  %v438_v8 = vsel %vm432_vm14, %v3200_v50, 0.0 }
 0x442   :  { %v3201_v61 = vpop.f32.mrb[2].mxu1  ;;  %v436_v17 = vsel %vm432_vm14, %v416_v27, 0.0 }
 0x443   :  { %v419_v14 = vpop.f32.mrb[3].mxu1  ;;  %v439_v9 = vsel %vm432_vm14, %v3201_v61, 0.0 }
 0x444   :  { %v437_v48 = vsel %vm432_vm14, %v419_v14, 0.0 }
 0x483   :  { %v3212_v51 = vpop.f32.mrb[8].mxu0 }
 0x484   :  { %v653_v2 = vsel %vm4331_vm15, %v3212_v51, %v438_v8  ;;  %v631_v49 = vpop.f32.mrb[9].mxu0 }
 0x485   :  { %v651_v12 = vsel %vm4331_vm15, %v631_v49, %v436_v17  ;;  %v3213_v22 = vpop.f32.mrb[10].mxu0 }
 0x486   :  { %v654_v36 = vsel %vm4331_vm15, %v3213_v22, %v439_v9  ;;  %v634_v54 = vpop.f32.mrb[11].mxu0  ;;  %v1422_v22 = vpop.permute.xlu0 %1421 }
 0x487   :  { %v652_v45 = vsel %vm4331_vm15, %v634_v54, %v437_v48 }
 0x49a   :  { %v3224_v25 = vpop.f32.mrb[4].mxu1 }
 0x49b   :  { %v868_v42 = vsel %vm4353_vm7, %v3224_v25, %v653_v2  ;;  %v846_v5 = vpop.f32.mrb[5].mxu1 }
 0x49c   :  { %v866_v4 = vsel %vm4353_vm7, %v846_v5, %v651_v12  ;;  %v3225_v1 = vpop.f32.mrb[6].mxu1  ;;  %v3604_v12 = vmov 0.0  }
 0x49d   :  { %v869_v3 = vsel %vm4353_vm7, %v3225_v1, %v654_v36  ;;  %v849_v55 = vpop.f32.mrb[7].mxu1  ;;  %3258 = vmatprep.subr.bf16.mxu0 %v3604_v12  ;;  %3290 = vmatprep.subr.bf16.mxu1 %v3604_v12  ;;  %v1564_v36 = vpop.permute.xlu1 %1563 }
 0x49e   :  { %v867_v58 = vsel %vm4353_vm7, %v849_v55, %v652_v45 }
 0x4a1   :  { %v3236_v57 = vpop.f32.mrb[12].mxu0  ;;  %v1706_v55 = vpop.permute.xlu1 %1705 }
 0x4a2   :  { %v1083_v38 = vsel %vm1076_vm9, %v3236_v57, %v868_v42  ;;  %v1061_v46 = vpop.f32.mrb[13].mxu0 }
 0x4a3   :  { %v1093_v41 = vadd.f32 %v3030_v6, %v1083_v38  ;;  %v1081_v47 = vsel %vm1076_vm9, %v1061_v46, %v866_v4  ;;  %v3237_v53 = vpop.f32.mrb[14].mxu0  ;;  %v1285_v38 = vrot.slane %v4218_v56, %v3825_v31 }
 0x4a4   :  { %v1091_v62 = vadd.f32 %v3030_v6, %v1081_v47  ;;  %v1084_v18 = vsel %vm1076_vm9, %v3237_v53, %v869_v3  ;;  %v1064_v7 = vpop.f32.mrb[15].mxu0 }
 0x4a5   :  { %v1101_v39 = vmin.f32 %v1093_v41, 0.0  ;;  %v1094_v52 = vadd.f32 %v3030_v6, %v1084_v18  ;;  %v1082_v43 = vsel %vm1076_vm9, %v1064_v7, %v867_v58  ;;  %vm1097_vm11 = vcmp.gt.f32.partialorder %v1093_v41, 0.0 }
 0x4a6   :  { %v1099_v60 = vmin.f32 %v1091_v62, 0.0  ;;  %v1092_v24 = vadd.f32 %v3030_v6, %v1082_v43  ;;  %vm1095_vm13 = vcmp.gt.f32.partialorder %v1091_v62, 0.0 }
 0x4a7   :  { %v1107_v0 = vmul.f32 1.442695, %v1101_v39  ;;  %v1102_v15 = vmin.f32 %v1094_v52, 0.0  ;;  %vm1098_vm12 = vcmp.gt.f32.partialorder %v1094_v52, 0.0 }
 0x4a8   :  { %v1103_v34 = vmul.f32 1.442695, %v1099_v60  ;;  %v1100_v28 = vmin.f32 %v1092_v24, 0.0  ;;  %vm1096_vm3 = vcmp.gt.f32.partialorder %v1092_v24, 0.0 }
 0x4a9   :  { %3511 = vpow2.f32 %v1107_v0  ;;  %v1109_v33 = vmul.f32 1.442695, %v1102_v15 }
 0x4aa   :  { %3513 = vpow2.f32 %v1103_v34  ;;  %v1105_v32 = vmul.f32 1.442695, %v1100_v28  ;;  %v1297_v34 = vpop.permute.xlu0 %1296 }
 0x4ab   :  { %3515 = vpow2.f32 %v1109_v33 }
 0x4ac   :  { %3517 = vpow2.f32 %v1105_v32 }
 0x4ae   :  { %v1312_v28 = vpop.permute.xlu0 %1311 }
 0x4b2   :  { %v4413_v33 = vpop.permute.xlu0 %1445 }
 0x4b3   :  { %v3512_v26 = vpop.eup %3511 }
 0x4b4   :  { %v3514_v63 = vpop.eup %3513  ;;  %v3033_v35 = vadd.f32 -1.0, %v3512_v26 }
 0x4b5   :  { %v3516_v59 = vpop.eup %3515  ;;  %v3031_v50 = vadd.f32 -1.0, %v3514_v63 }
 0x4b6   :  { %v3518_v27 = vpop.eup %3517  ;;  %v3034_v61 = vadd.f32 -1.0, %v3516_v59  ;;  %v1117_v8 = vsel %vm1097_vm11, %v1093_v41, %v3033_v35  ;;  %v4416_v32 = vpop.permute.xlu0 %1583 }
 0x4b7   :  { %v3032_v14 = vadd.f32 -1.0, %v3518_v27  ;;  %v1115_v17 = vsel %vm1095_vm13, %v1091_v62, %v3031_v50  ;;  %v1302_v62 = vpop.permute.xlu1 %1301 }
 0x4b8   :  { %v1118_v51 = vsel %vm1098_vm12, %v1094_v52, %v3034_v61 }
 0x4b9   :  { %v1116_v2 = vsel %vm1096_vm3, %v1092_v24, %v3032_v14  ;;  %v1120_v49 = vpack.c.bf16 %v1118_v51, %v1117_v8 }
 0x4ba   :  { %v1119_v9 = vpack.c.bf16 %v1116_v2, %v1115_v17  ;;  %v4418_v26 = vpop.permute.xlu0 %1729 }
 0x4bb   :  { %v1307_v18 = vpop.permute.xlu1 %1306 }
 0x4bc   :  { %3254 = vmatprep.mubr.bf16.mxu1 %v1119_v9 }
 0x4bd   :  { %3255 = vmatmul.mubr.bf16.vlgmr.msra.gmra.mrb[8].mxu1 %v1120_v49 }
 0x4bf   :  { %v4397_v7 = vpop.permute.xlu1 %1441 }
 0x4c3   :  { %v4399_v39 = vpop.permute.xlu1 %1449 }
 0x4c7   :  { %v4401_v52 = vpop.permute.xlu1 %1453 }
 0x4cb   :  { %v4403_v43 = vpop.permute.xlu1 %1587 }
 0x4cf   :  { %v4405_v56 = vpop.permute.xlu1 %1591 }
 0x4d3   :  { %v4407_v60 = vpop.permute.xlu1 %1595 }
 0x4d7   :  { %v4409_v24 = vpop.permute.xlu1 %1725 }
 0x590   :  { %v3256_v48 = vpop.f32.mrb[8].mxu1 }
 0x591   :  { %v1219_v54 = vpop.f32.mrb[9].mxu1 }
 0x592   :  { %v3257_v45 = vpop.f32.mrb[10].mxu1  ;;  %v1424_v25 = vmul.f32 %v1422_v22, %v1219_v54  ;;  %v1566_v3 = vmul.f32 %v1564_v36, %v1219_v54  ;;  %v1708_v6 = vmul.f32 %v1706_v55, %v1219_v54  ;;  %v1286_v46 = vmul.f32 %v1285_v38, %v1219_v54 }
 0x593   :  { %v4379_v42 = vpack.c.bf16 %v3257_v45, %v3256_v48  ;;  %v1222_v5 = vpop.f32.mrb[11].mxu1 }
 0x594   :  { %1428 = vrot.lane.b32.xlu0 %v1424_v25, %s3602_s29  ;;  %v1425_v4 = vmul.f32 %v1422_v22, %v1222_v5  ;;  %v4382_v1 = vpack.c.bf16 %v1222_v5, %v1219_v54  ;;  %v1567_v58 = vmul.f32 %v1564_v36, %v1222_v5  ;;  %v1709_v57 = vmul.f32 %v1706_v55, %v1222_v5 }
 0x595   :  { %v1288_v41 = vsel %vm247_vm1, %v1286_v46, 0.0  ;;  %v1287_v47 = vmul.f32 %v1285_v38, %v1222_v5 }
 0x596   :  { %1430 = vrot.lane.b32.xlu1 %v1425_v4, %s3602_s29  ;;  %3259 = vmatpush3.bf16.msra.mxu0 %v4382_v1 }
 0x597   :  { %3260 = vmatprep.subr.bf16.mxu0 %v3604_v12  ;;  %v1291_v53 = vsel %vm247_vm1, %v1287_v47, 0.0 }
 0x598   :  { %1570 = vrot.lane.b32.xlu0 %v1566_v3, %s3601_s0 }
 0x59a   :  { %1572 = vrot.lane.b32.xlu1 %v1567_v58, %s3601_s0  ;;  %3261 = vmatpush3.bf16.msra.mxu0 %v4379_v42 }
 0x59b   :  { %3266 = vmatprep.subr.bf16.mxu0 %v3604_v12 }
 0x59c   :  { %1712 = vrot.lane.b32.xlu0 %v1708_v6, %s3600_s9 }
 0x59e   :  { %1714 = vrot.lane.b32.xlu1 %v1709_v57, %s3600_s9  ;;  %v3086_v57 = vld [vmem:[%s4914_s10] sm:$0xf]  }
 0x59f   :  { %v3087_v47 = vunpack.c.0.s8 %v3086_v57 }
 0x5bb   :  { %1289 = vadd.xlane.f32.xlu0 %v1288_v41 }
 0x5c2   :  { %1292 = vadd.xlane.f32.xlu1 %v1291_v53 }
 0x5f5   :  { %1234 = vxpose.xlu1.b32.start [1/4] (short) %v1219_v54, 128 }
 0x5f9   :  { %1235 = vxpose.xlu1.b32.cont [2/4] (short) %v1222_v5, 128 }
 0x5fd   :  { %1236 = vxpose.xlu1.b32.cont [3/4] (short) %v3256_v48, 128 }
 0x601   :  { %1237 = vxpose.xlu1.b32.end [4/4] (short) %v3257_v45, 128 }
 0x606   :  { %v1429_v63 = vpop.permute.xlu0 %1428 }
 0x607   :  { %v1434_v8 = vsel %vm247_vm1, %v1429_v63, 0.0 }
 0x608   :  { %v1431_v0 = vpop.permute.xlu1 %1430 }
 0x609   :  { %v1437_v15 = vsel %vm247_vm1, %v1431_v0, 0.0 }
 0x60a   :  { %1438 = vadd.xlane.f32.xlu0 %v1437_v15  ;;  %v1571_v35 = vpop.permute.xlu0 %1570 }
 0x60b   :  { %v1576_v50 = vsel %vm247_vm1, %v1571_v35, 0.0 }
 0x60c   :  { %v1573_v59 = vpop.permute.xlu1 %1572 }
 0x60d   :  { %v1579_v46 = vsel %vm247_vm1, %v1573_v59, 0.0 }
 0x60e   :  { %v1713_v27 = vpop.permute.xlu0 %1712 }
 0x60f   :  { %v1718_v61 = vsel %vm247_vm1, %v1713_v27, 0.0 }
 0x610   :  { %v1715_v14 = vpop.permute.xlu1 %1714 }
 0x620   :  { %1737 = vperm.xlu0 %3408, %v4232_v37   ;;  %v1721_v37 = vsel %vm247_vm1, %v1715_v14, 0.0 }
 0x624   :  { %3410 = vset.pattern.permute.xlu0 %v3597_v10 }
 0x63f   :  { %1577 = vadd.xlane.f32.xlu0 %v1576_v50 }
 0x643   :  { %1719 = vadd.xlane.f32.xlu0 %v1718_v61 }
 0x647   :  { %1722 = vadd.xlane.f32.xlu0 %v1721_v37 }
 0x648   :  { %v1290_v15 = vpop.xlane.xlu0 %1289 }
 0x64f   :  { %v1293_v51 = vpop.xlane.xlu1 %1292 }
 0x658   :  { %1435 = vadd.xlane.f32.xlu1 %v1434_v8 }
 0x669   :  { %1733 = vperm.xlu1 %3407, %v4313_v44  }
 0x66d   :  { %3409 = vset.pattern.permute.xlu1 %v3597_v10 }
 0x675   :  { %v1250_v17 = vpop.trf.xlu1 }
 0x676   :  { %v1314_v9 = vmul.f32 %v1297_v34, %v1250_v17 }
 0x678   :  { %v1318_v54 = vsel %vm247_vm1, %v1314_v9, 0.0 }
 0x679   :  { %v1251_v2 = vpop.trf.xlu1 }
 0x67a   :  { %v1315_v49 = vmul.f32 %v1302_v62, %v1251_v2  ;;  %v3088_v62 = vunpack.c.1.s8 %v3086_v57 }
 0x67c   :  { %v1319_v48 = vsel %vm247_vm1, %v1315_v49, 0.0 }
 0x67d   :  { %v1252_v22 = vpop.trf.xlu1  ;;  %v1320_v25 = vadd.f32 %v1319_v48, %v1318_v54 }
 0x67e   :  { %v1316_v36 = vmul.f32 %v1307_v18, %v1252_v22  ;;  %v4434_v18 = vcvt.s32.f32 %v3087_v47 }
 0x680   :  { %v1321_v45 = vsel %vm247_vm1, %v1316_v36, 0.0  ;;  %vm1274_vm6 = vcmp.gt.f32.partialorder %v4434_v18, 0.0 }
 0x681   :  { %v1253_v5 = vpop.trf.xlu1  ;;  %v1322_v3 = vadd.f32 %v1321_v45, %v1320_v25 }
 0x682   :  { %v1317_v4 = vmul.f32 %v1312_v28, %v1253_v5  ;;  %v4436_v28 = vcvt.s32.f32 %v3088_v62 }
 0x684   :  { %v1323_v44 = vsel %vm247_vm1, %v1317_v4, 0.0  ;;  %vm1275_vm10 = vcmp.gt.f32.partialorder %v4436_v28, 0.0 }
 0x685   :  { %v1324_v55 = vadd.f32 %v1323_v44, %v1322_v3  ;;  %v1254_v27 = vpop.trf.xlu1 }
 0x686   :  { %v1456_v54 = vmul.f32 %v4397_v7, %v1254_v27 }
 0x687   :  { %v1325_v58 = vrot.slane %v1324_v55, 4 }
 0x688   :  { %v1460_v4 = vsel %vm247_vm1, %v1456_v54, 0.0 }
 0x689   :  { %v1326_v6 = vadd.f32 %v1325_v58, %v1324_v55  ;;  %v1255_v17 = vpop.trf.xlu1 }
 0x68a   :  { %v1457_v48 = vmul.f32 %v4413_v33, %v1255_v17 }
 0x68b   :  { %v1327_v38 = vrot.slane %v1326_v6, 2 }
 0x68c   :  { %v1461_v25 = vsel %vm247_vm1, %v1457_v48, 0.0 }
 0x68d   :  { %v1328_v41 = vadd.f32 %v1327_v38, %v1326_v6  ;;  %1580 = vadd.xlane.f32.xlu1 %v1579_v46  ;;  %v1256_v2 = vpop.trf.xlu1  ;;  %v1462_v55 = vadd.f32 %v1461_v25, %v1460_v4 }
 0x68e   :  { %v1458_v45 = vmul.f32 %v4399_v39, %v1256_v2 }
 0x68f   :  { %v1329_v53 = vrot.slane %v1328_v41, 1 }
 0x690   :  { %v1463_v3 = vsel %vm247_vm1, %v1458_v45, 0.0 }
 0x691   :  { %v1330_v0 = vadd.f32 %v1329_v53, %v1328_v41  ;;  %v1257_v49 = vpop.trf.xlu1  ;;  %v1464_v57 = vadd.f32 %v1463_v3, %v1462_v55 }
 0x692   :  { %v1459_v5 = vmul.f32 %v4401_v52, %v1257_v49 }
 0x693   :  { %v1331_v34 = vadd.f32 %v1330_v0, %v1290_v15  ;;  %v1332_v63 = vadd.f32 %v1330_v0, %v1293_v51 }
 0x694   :  { %v1465_v6 = vsel %vm247_vm1, %v1459_v5, 0.0 }
 0x695   :  { %vm1333_vm8 = vcmp.gt.f32.partialorder %v1331_v34, 0.0  ;;  %v1335_v35 = vmul.f32 0.2, %v1331_v34  ;;  %vm1334_vm2 = vcmp.gt.f32.partialorder %v1332_v63, 0.0  ;;  %v1336_v50 = vmul.f32 0.2, %v1332_v63  ;;  %v1258_v9 = vpop.trf.xlu1 }
 0x696   :  { %v1598_v33 = vmul.f32 %v4416_v32, %v1258_v9  ;;  %v1466_v52 = vadd.f32 %v1465_v6, %v1464_v57 }
 0x697   :  { %v1337_v59 = vsel %vm1333_vm8, %v1331_v34, %v1335_v35  ;;  %v1338_v14 = vsel %vm1334_vm2, %v1332_v63, %v1336_v50  ;;  %v1439_v27 = vpop.xlane.xlu0 %1438  ;;  %vm3605_vm8 = vmmov 0  }
 0x698   :  { %v4442_v61 = vsel %vm1274_vm6, %v1337_v59, -1e+30  ;;  %v4448_v8 = vsel %vm1275_vm10, %v1338_v14, -1e+30  ;;  %v1602_v46 = vsel %vm247_vm1, %v1598_v33, 0.0  ;;  %v1467_v53 = vrot.slane %v1466_v52, 4  ;;  %3262 = vmatprep.mubr.msk.bf16.mxu0 %vm3605_vm8, %v3604_v12  ;;  %3306 = vmatprep.mubr.msk.bf16.mxu1 %vm3605_vm8, %v3604_v12 }
 0x699   :  { %v1341_v37 = vsel %vm247_vm1, %v4442_v61, -inf  ;;  %v1344_v51 = vsel %vm247_vm1, %v4448_v8, -inf  ;;  %v1259_v22 = vpop.trf.xlu1 }
 0x69a   :  { %1342 = vmax.xlane.f32.xlu0 %v1341_v37  ;;  %v1599_v44 = vmul.f32 %v4403_v43, %v1259_v22  ;;  %v1468_v15 = vadd.f32 %v1467_v53, %v1466_v52 }
 0x69c   :  { %v1603_v39 = vsel %vm247_vm1, %v1599_v44, 0.0 }
 0x69d   :  { %v1260_v36 = vpop.trf.xlu1  ;;  %v1604_v47 = vadd.f32 %v1603_v39, %v1602_v46 }
 0x69e   :  { %1345 = vmax.xlane.f32.xlu0 %v1344_v51  ;;  %v1600_v7 = vmul.f32 %v4405_v56, %v1260_v36  ;;  %v1469_v56 = vrot.slane %v1468_v15, 2 }
 0x69f   :  { %v1738_v17 = vpop.permute.xlu0 %1737 }
 0x6a0   :  { %v1605_v41 = vsel %vm247_vm1, %v1600_v7, 0.0  ;;  %v1470_v50 = vadd.f32 %v1469_v56, %v1468_v15 }
 0x6a1   :  { %v1261_v58 = vpop.trf.xlu1  ;;  %v1606_v62 = vadd.f32 %v1605_v41, %v1604_v47 }
 0x6a2   :  { %v1601_v38 = vmul.f32 %v4407_v60, %v1261_v58  ;;  %v1471_v60 = vrot.slane %v1470_v50, 1 }
 0x6a4   :  { %v1607_v43 = vsel %vm247_vm1, %v1601_v38, 0.0  ;;  %v1472_v51 = vadd.f32 %v1471_v60, %v1470_v50 }
 0x6a5   :  { %v1608_v0 = vadd.f32 %v1607_v43, %v1606_v62  ;;  %v1262_v32 = vpop.trf.xlu1 }
 0x6a6   :  { %v1474_v9 = vadd.f32 %v1472_v51, %v1439_v27  ;;  %v1740_v39 = vmul.f32 %v4409_v24, %v1262_v32 }
 0x6a7   :  { %v1609_v34 = vrot.slane %v1608_v0, 4 }
 0x6a8   :  { %v1478_v54 = vmul.f32 0.2, %v1474_v9  ;;  %vm1476_vm4 = vcmp.gt.f32.partialorder %v1474_v9, 0.0  ;;  %v1744_v47 = vsel %vm247_vm1, %v1740_v39, 0.0 }
 0x6a9   :  { %v1610_v63 = vadd.f32 %v1609_v34, %v1608_v0  ;;  %v1263_v35 = vpop.trf.xlu1 }
 0x6aa   :  { %v1480_v44 = vsel %vm1476_vm4, %v1474_v9, %v1478_v54  ;;  %v1741_v7 = vmul.f32 %v4418_v26, %v1263_v35 }
 0x6ab   :  { %v1611_v59 = vrot.slane %v1610_v63, 2  ;;  %v4476_v33 = vsel %vm1275_vm10, %v1480_v44, -1e+30 }
 0x6ac   :  { %v1486_v52 = vsel %vm247_vm1, %v4476_v33, -inf  ;;  %v1745_v41 = vsel %vm247_vm1, %v1741_v7, 0.0 }
 0x6ad   :  { %v1264_v14 = vpop.trf.xlu1  ;;  %v1612_v37 = vadd.f32 %v1611_v59, %v1610_v63  ;;  %v1746_v53 = vadd.f32 %v1745_v41, %v1744_v47 }
 0x6af   :  { %v1613_v2 = vrot.slane %v1612_v37, 1 }
 0x6b1   :  { %v1265_v49 = vpop.trf.xlu1  ;;  %v1614_v48 = vadd.f32 %v1613_v2, %v1612_v37 }
 0x6b2   :  { %v1743_v24 = vmul.f32 %v1738_v17, %v1265_v49 }
 0x6b4   :  { %v1749_v0 = vsel %vm247_vm1, %v1743_v24, 0.0 }
 0x6cc   :  { %v1578_v22 = vpop.xlane.xlu0 %1577 }
 0x6cd   :  { %v1615_v45 = vadd.f32 %v1614_v48, %v1578_v22 }
 0x6cf   :  { %v1619_v4 = vmul.f32 0.2, %v1615_v45  ;;  %vm1617_vm11 = vcmp.gt.f32.partialorder %v1615_v45, 0.0 }
 0x6d0   :  { %v1720_v59 = vpop.xlane.xlu0 %1719 }
 0x6d1   :  { %v1621_v57 = vsel %vm1617_vm11, %v1615_v45, %v1619_v4 }
 0x6d2   :  { %v4484_v46 = vsel %vm1274_vm6, %v1621_v57, -1e+30 }
 0x6d3   :  { %v1625_v26 = vsel %vm247_vm1, %v4484_v46, -inf }
 0x6d4   :  { %v1723_v27 = vpop.xlane.xlu0 %1722 }
 0x6e5   :  { %v1436_v36 = vpop.xlane.xlu1 %1435 }
 0x6e6   :  { %v1473_v25 = vadd.f32 %v1472_v51, %v1436_v36 }
 0x6e8   :  { %vm1475_vm5 = vcmp.gt.f32.partialorder %v1473_v25, 0.0  ;;  %v1477_v5 = vmul.f32 0.2, %v1473_v25 }
 0x6e9   :  { %v1734_v6 = vpop.permute.xlu1 %1733 }
 0x6ea   :  { %v1479_v3 = vsel %vm1475_vm5, %v1473_v25, %v1477_v5  ;;  %v1742_v38 = vmul.f32 %v1734_v6, %v1264_v14 }
 0x6eb   :  { %v4470_v55 = vsel %vm1274_vm6, %v1479_v3, -1e+30 }
 0x6ec   :  { %v1483_v58 = vsel %vm247_vm1, %v4470_v55, -inf  ;;  %v1747_v43 = vsel %vm247_vm1, %v1742_v38, 0.0 }
 0x6ed   :  { %1484 = vmax.xlane.f32.xlu0 %v1483_v58  ;;  %v1748_v62 = vadd.f32 %v1747_v43, %v1746_v53 }
 0x6ef   :  { %v1750_v15 = vadd.f32 %v1749_v0, %v1748_v62 }
 0x6f1   :  { %1487 = vmax.xlane.f32.xlu0 %v1486_v52  ;;  %v1751_v32 = vrot.slane %v1750_v15, 4 }
 0x6f3   :  { %v1752_v34 = vadd.f32 %v1751_v32, %v1750_v15 }
 0x6f5   :  { %1626 = vmax.xlane.f32.xlu0 %v1625_v26  ;;  %v1753_v56 = vrot.slane %v1752_v34, 2 }
 0x6f7   :  { %v1754_v63 = vadd.f32 %v1753_v56, %v1752_v34 }
 0x6f9   :  { %v1755_v35 = vrot.slane %v1754_v63, 1 }
 0x6fb   :  { %v1756_v50 = vadd.f32 %v1755_v35, %v1754_v63 }
 0x6fd   :  { %v1757_v60 = vadd.f32 %v1756_v50, %v1720_v59  ;;  %v1758_v2 = vadd.f32 %v1756_v50, %v1723_v27 }
 0x6ff   :  { %v1761_v51 = vmul.f32 0.2, %v1757_v60  ;;  %vm1759_vm12 = vcmp.gt.f32.partialorder %v1757_v60, 0.0  ;;  %v1762_v22 = vmul.f32 0.2, %v1758_v2  ;;  %vm1760_vm3 = vcmp.gt.f32.partialorder %v1758_v2, 0.0 }
 0x701   :  { %v1763_v9 = vsel %vm1759_vm12, %v1757_v60, %v1761_v51  ;;  %v1764_v25 = vsel %vm1760_vm3, %v1758_v2, %v1762_v22 }
 0x702   :  { %v1765_v45 = vsel %vm1274_vm6, %v1763_v9, -1e+30  ;;  %v1766_v5 = vsel %vm1275_vm10, %v1764_v25, -1e+30 }
 0x703   :  { %v1770_v44 = vsel %vm247_vm1, %v1766_v5, -inf }
 0x71a   :  { %v1581_v14 = vpop.xlane.xlu1 %1580 }
 0x71b   :  { %v1616_v37 = vadd.f32 %v1614_v48, %v1581_v14  ;;  %v1767_v48 = vsel %vm247_vm1, %v1765_v45, -inf }
 0x71d   :  { %vm1618_vm13 = vcmp.gt.f32.partialorder %v1616_v37, 0.0  ;;  %v1620_v17 = vmul.f32 0.2, %v1616_v37 }
 0x71f   :  { %v1622_v49 = vsel %vm1618_vm13, %v1616_v37, %v1620_v17 }
 0x720   :  { %v1624_v36 = vsel %vm1275_vm10, %v1622_v49, -1e+30 }
 0x721   :  { %v1628_v54 = vsel %vm247_vm1, %v1624_v36, -inf }
 0x722   :  { %1629 = vmax.xlane.f32.xlu0 %v1628_v54 }
 0x726   :  { %1768 = vmax.xlane.f32.xlu0 %v1767_v48 }
 0x727   :  { %v1343_v4 = vpop.xlane.xlu0 %1342 }
 0x728   :  { %v1347_v3 = vsub.f32 %v4442_v61, %v1343_v4 }
 0x72a   :  { %v1349_v58 = vmul.f32 1.442695, %v1347_v3  ;;  %1771 = vmax.xlane.f32.xlu0 %v1770_v44 }
 0x72b   :  { %v1346_v6 = vpop.xlane.xlu0 %1345 }
 0x72c   :  { %3519 = vpow2.f32 %v1349_v58  ;;  %v1348_v7 = vsub.f32 %v4448_v8, %v1346_v6 }
 0x72e   :  { %v1351_v57 = vmul.f32 1.442695, %v1348_v7 }
 0x730   :  { %3521 = vpow2.f32 %v1351_v57 }
 0x736   :  { %v3520_v39 = vpop.eup %3519 }
 0x737   :  { %v4505_v38 = vsel %vm1274_vm6, %v3520_v39, 0.0 }
 0x738   :  { %v1355_v52 = vsel %vm247_vm1, %v4505_v38, 0.0 }
 0x739   :  { %1356 = vadd.xlane.f32.xlu0 %v1355_v52 }
 0x73a   :  { %v3522_v61 = vpop.eup %3521 }
 0x73b   :  { %v4511_v41 = vsel %vm1275_vm10, %v3522_v61, 0.0 }
 0x73c   :  { %v1358_v47 = vsel %vm247_vm1, %v4511_v41, 0.0 }
 0x73d   :  { %1359 = vadd.xlane.f32.xlu0 %v1358_v47 }
 0x77a   :  { %v1485_v8 = vpop.xlane.xlu0 %1484 }
 0x77b   :  { %v1489_v43 = vsub.f32 %v4470_v55, %v1485_v8 }
 0x77d   :  { %v1491_v26 = vmul.f32 1.442695, %v1489_v43 }
 0x77e   :  { %v1488_v53 = vpop.xlane.xlu0 %1487 }
 0x77f   :  { %3523 = vpow2.f32 %v1491_v26  ;;  %v1490_v24 = vsub.f32 %v4476_v33, %v1488_v53 }
 0x781   :  { %v1493_v62 = vmul.f32 1.442695, %v1490_v24 }
 0x782   :  { %v1627_v0 = vpop.xlane.xlu0 %1626 }
 0x783   :  { %3525 = vpow2.f32 %v1493_v62  ;;  %v1631_v15 = vsub.f32 %v4484_v46, %v1627_v0 }
 0x785   :  { %v1633_v32 = vmul.f32 1.442695, %v1631_v15 }
 0x787   :  { %3527 = vpow2.f32 %v1633_v32 }
 0x789   :  { %v3524_v34 = vpop.eup %3523 }
 0x78a   :  { %v4524_v56 = vsel %vm1274_vm6, %v3524_v34, 0.0 }
 0x78b   :  { %v1497_v55 = vsel %vm247_vm1, %v4524_v56, 0.0 }
 0x78c   :  { %1498 = vadd.xlane.f32.xlu0 %v1497_v55 }
 0x78d   :  { %v3526_v63 = vpop.eup %3525 }
 0x78e   :  { %v1496_v33 = vsel %vm1275_vm10, %v3526_v63, 0.0 }
 0x78f   :  { %v1500_v35 = vsel %vm247_vm1, %v1496_v33, 0.0 }
 0x790   :  { %1501 = vadd.xlane.f32.xlu0 %v1500_v35 }
 0x791   :  { %v3528_v50 = vpop.eup %3527 }
 0x792   :  { %v4533_v46 = vsel %vm1274_vm6, %v3528_v50, 0.0 }
 0x793   :  { %v1639_v59 = vsel %vm247_vm1, %v4533_v46, 0.0 }
 0x794   :  { %1640 = vadd.xlane.f32.xlu0 %v1639_v59 }
 0x7af   :  { %v1630_v60 = vpop.xlane.xlu0 %1629 }
 0x7b0   :  { %v1632_v27 = vsub.f32 %v1624_v36, %v1630_v60 }
 0x7b2   :  { %v1635_v14 = vmul.f32 1.442695, %v1632_v27 }
 0x7b3   :  { %v1769_v37 = vpop.xlane.xlu0 %1768 }
 0x7b4   :  { %3529 = vpow2.f32 %v1635_v14  ;;  %v1773_v51 = vsub.f32 %v1765_v45, %v1769_v37 }
 0x7b6   :  { %v1775_v2 = vmul.f32 1.442695, %v1773_v51 }
 0x7b7   :  { %v1772_v17 = vpop.xlane.xlu0 %1771 }
 0x7b8   :  { %3531 = vpow2.f32 %v1775_v2  ;;  %v1774_v49 = vsub.f32 %v1766_v5, %v1772_v17 }
 0x7ba   :  { %v1777_v9 = vmul.f32 1.442695, %v1774_v49 }
 0x7bc   :  { %3533 = vpow2.f32 %v1777_v9  ;;  %v3427_v9 = vld [vmem:[%s4915_s11] sm:$0xff]  }
 0x7bd   :  { %3291 = vmatpush3.bf16.msra.mxu1 %v3427_v9 }
 0x7be   :  { %v3530_v22 = vpop.eup %3529  ;;  %3292 = vmatprep.subr.bf16.mxu1 %v3604_v12 }
 0x7bf   :  { %v4539_v54 = vsel %vm1275_vm10, %v3530_v22, 0.0  ;;  %v3429_v22 = vld [vmem:[%s4915_s11 + $0x10] sm:$0xff]  }
 0x7c0   :  { %v1642_v25 = vsel %vm247_vm1, %v4539_v54, 0.0 }
 0x7c1   :  { %1643 = vadd.xlane.f32.xlu0 %v1642_v25  ;;  %v3431_v25 = vld [vmem:[%s4915_s11 + $0x20] sm:$0xff]  }
 0x7c2   :  { %v3532_v36 = vpop.eup %3531 }
 0x7c3   :  { %v4545_v48 = vsel %vm1274_vm6, %v3532_v36, 0.0  ;;  %v3432_v36 = vld [vmem:[%s4915_s11 + $0x28] sm:$0xff]  }
 0x7c4   :  { %v1781_v45 = vsel %vm247_vm1, %v4545_v48, 0.0 }
 0x7c5   :  { %1782 = vadd.xlane.f32.xlu0 %v1781_v45  ;;  %v3434_v45 = vld [vmem:[%s4915_s11 + $0x38] sm:$0xff]  }
 0x7c6   :  { %v3534_v5 = vpop.eup %3533  ;;  %v1357_v4 = vpop.xlane.xlu0 %1356 }
 0x7c7   :  { %vm1361_vm2 = vcmp.gt.f32.partialorder %v1357_v4, 0.0  ;;  %v4551_v3 = vsel %vm1275_vm10, %v3534_v5, 0.0  ;;  %v4620_v5 = vld [vmem:[%s4917_s13] sm:$0xf] }
 0x7c8   :  { %v1363_v44 = vsel %vm1361_vm2, %v1357_v4, 1.0  ;;  %v1784_v58 = vsel %vm247_vm1, %v4551_v3, 0.0  ;;  %v2236_v4 = vrot.slane %v4620_v5, %v3785_v20  ;;  %v2005_v20 = vld [vmem:[%s4916_s12] sm:$0xff] }
 0x7c9   :  { %1785 = vadd.xlane.f32.xlu0 %v1784_v58  ;;  %3535 = vrcp.f32 %v1363_v44  ;;  %v2349_v44 = vrot.slane %v4620_v5, %v3782_v19  ;;  %v2006_v58 = vld [vmem:[%s4916_s12 + $0x8] sm:$0xff]  ;;  %v2007_v19 = vld [vmem:[%s4916_s12 + $0x10] sm:$0xff] }
 0x7ca   :  { %v1360_v6 = vpop.xlane.xlu0 %1359  ;;  %2238 = vrot.lane.b32.xlu1 %v2236_v4, %s3601_s0 }
 0x7cb   :  { %vm1362_vm6 = vcmp.gt.f32.partialorder %v1360_v6, 0.0 }
 0x7cc   :  { %v1364_v18 = vsel %vm1362_vm6, %v1360_v6, 1.0  ;;  %v4645_v6 = vld [vmem:[%s4916_s12 + $0x18] sm:$0xff] }
 0x7cd   :  { %3537 = vrcp.f32 %v1364_v18 }
 0x7ce   :  { %2351 = vrot.lane.b32.xlu1 %v2349_v44, %s3602_s29 }
 0x7d2   :  { %2021 = vperm.xlu1 %3409, %v2005_v20  }
 0x7d3   :  { %v3536_v7 = vpop.eup %3535 }
 0x7d4   :  { %v1366_v39 = vmul.f32 %v3536_v7, %v4505_v38 }
 0x7d6   :  { %2031 = vperm.xlu1 %3409, %v2007_v19  }
 0x7d7   :  { %v3538_v57 = vpop.eup %3537 }
 0x7d8   :  { %v1368_v52 = vmul.f32 %v3538_v57, %v4511_v41 }
 0x7da   :  { %v1369_v61 = vpack.c.bf16 %v1368_v52, %v1366_v39  ;;  %2036 = vperm.xlu1 %3409, %v4645_v6  }
 0x7dc   :  { %3263 = vmatmul.mubr.msk.bf16.vlgmr.msra.gmra.mrb[16].mxu0 %vm247_vm1, %v1369_v61 }
 0x7dd   :  { %3267 = vmatpush3.bf16.msra.mxu0 %v4382_v1  ;;  %3270 = vmatprep.mubr.msk.bf16.mxu0 %vm3605_vm8, %v3604_v12 }
 0x7de   :  { %3268 = vmatprep.subr.bf16.mxu0 %v3604_v12  ;;  %3412 = vset.pattern.permute.xlu1 %v3599_v23 }
 0x7df   :  { %2141 = vperm.xlu1 %3412, %v2006_v58  }
 0x7e1   :  { %3269 = vmatpush3.bf16.msra.mxu0 %v4379_v42 }
 0x7e2   :  { %3274 = vmatprep.subr.bf16.mxu0 %v3604_v12 }
 0x7e3   :  { %2145 = vperm.xlu1 %3412, %v2007_v19  }
 0x7e7   :  { %3414 = vset.pattern.permute.xlu1 %v3603_v30 }
 0x7e8   :  { %2363 = vperm.xlu1 %3414, %v2005_v20  }
 0x7ec   :  { %2367 = vperm.xlu1 %3414, %v2006_v58  }
 0x819   :  { %v1499_v28 = vpop.xlane.xlu0 %1498 }
 0x81a   :  { %vm1503_vm10 = vcmp.gt.f32.partialorder %v1499_v28, 0.0 }
 0x81b   :  { %v1505_v47 = vsel %vm1503_vm10, %v1499_v28, 1.0 }
 0x81c   :  { %3539 = vrcp.f32 %v1505_v47 }
 0x81d   :  { %v1502_v38 = vpop.xlane.xlu0 %1501 }
 0x81e   :  { %vm1504_vm4 = vcmp.gt.f32.partialorder %v1502_v38, 0.0 }
 0x81f   :  { %v1506_v41 = vsel %vm1504_vm4, %v1502_v38, 1.0 }
 0x820   :  { %3541 = vrcp.f32 %v1506_v41 }
 0x821   :  { %v1641_v62 = vpop.xlane.xlu0 %1640 }
 0x822   :  { %vm1645_vm5 = vcmp.gt.f32.partialorder %v1641_v62, 0.0 }
 0x823   :  { %v1647_v0 = vsel %vm1645_vm5, %v1641_v62, 1.0 }
 0x824   :  { %3543 = vrcp.f32 %v1647_v0 }
 0x826   :  { %v3540_v8 = vpop.eup %3539 }
 0x827   :  { %v1508_v26 = vmul.f32 %v3540_v8, %v4524_v56 }
 0x82a   :  { %v3542_v43 = vpop.eup %3541 }
 0x82b   :  { %v1510_v53 = vmul.f32 %v3542_v43, %v1496_v33  ;;  %v3047_v43 = vld [vmem:[%s4957_s2] ss:$0 sm:$0xff] }
 0x82d   :  { %v1511_v24 = vpack.c.bf16 %v1510_v53, %v1508_v26 }
 0x82e   :  { %v3544_v33 = vpop.eup %3543 }
 0x82f   :  { %3271 = vmatmul.mubr.msk.bf16.vlgmr.msra.gmra.mrb[20].mxu0 %vm247_vm1, %v1511_v24  ;;  %v1650_v50 = vmul.f32 %v3544_v33, %v4533_v46 }
 0x830   :  { %3275 = vmatpush3.bf16.msra.mxu0 %v4382_v1  ;;  %3278 = vmatprep.mubr.msk.bf16.mxu0 %vm3605_vm8, %v3604_v12 }
 0x831   :  { %3276 = vmatprep.subr.bf16.mxu0 %v3604_v12 }
 0x834   :  { %3277 = vmatpush3.bf16.msra.mxu0 %v4379_v42 }
 0x835   :  { %3282 = vmatprep.subr.bf16.mxu0 %v3604_v12 }
 0x84e   :  { %v1644_v15 = vpop.xlane.xlu0 %1643 }
 0x84f   :  { %vm1646_vm11 = vcmp.gt.f32.partialorder %v1644_v15, 0.0 }
 0x850   :  { %v1648_v32 = vsel %vm1646_vm11, %v1644_v15, 1.0 }
 0x851   :  { %3545 = vrcp.f32 %v1648_v32 }
 0x852   :  { %v1783_v34 = vpop.xlane.xlu0 %1782 }
 0x853   :  { %vm1787_vm12 = vcmp.gt.f32.partialorder %v1783_v34, 0.0 }
 0x854   :  { %v1789_v56 = vsel %vm1787_vm12, %v1783_v34, 1.0 }
 0x855   :  { %3547 = vrcp.f32 %v1789_v56 }
 0x856   :  { %v1786_v55 = vpop.xlane.xlu0 %1785 }
 0x857   :  { %vm1788_vm13 = vcmp.gt.f32.partialorder %v1786_v55, 0.0 }
 0x858   :  { %v1790_v63 = vsel %vm1788_vm13, %v1786_v55, 1.0 }
 0x859   :  { %3549 = vrcp.f32 %v1790_v63 }
 0x85b   :  { %v3546_v35 = vpop.eup %3545 }
 0x85c   :  { %v1652_v59 = vmul.f32 %v3546_v35, %v4539_v54  ;;  %v3430_v54 = vld [vmem:[%s4915_s11 + $0x18] sm:$0xff]  }
 0x85e   :  { %v1653_v60 = vpack.c.bf16 %v1652_v59, %v1650_v50 }
 0x85f   :  { %v3548_v27 = vpop.eup %3547 }
 0x860   :  { %3279 = vmatmul.mubr.msk.bf16.vlgmr.msra.gmra.mrb[24].mxu0 %vm247_vm1, %v1653_v60  ;;  %v1792_v37 = vmul.f32 %v3548_v27, %v4545_v48  ;;  %v3433_v48 = vld [vmem:[%s4915_s11 + $0x30] sm:$0xff]  }
 0x861   :  { %3283 = vmatpush3.bf16.msra.mxu0 %v4382_v1  ;;  %3286 = vmatprep.mubr.msk.bf16.mxu0 %vm3605_vm8, %v3604_v12 }
 0x862   :  { %3284 = vmatprep.subr.bf16.mxu0 %v3604_v12 }
 0x863   :  { %v3550_v14 = vpop.eup %3549 }
 0x864   :  { %v1794_v51 = vmul.f32 %v3550_v14, %v4551_v3  ;;  %v2123_v3 = vrot.slane %v4620_v5, %v3773_v16 }
 0x865   :  { %3285 = vmatpush3.bf16.msra.mxu0 %v4379_v42  ;;  %v3428_v42 = vld [vmem:[%s4915_s11 + $0x8] sm:$0xff]  }
 0x866   :  { %v1795_v46 = vpack.c.bf16 %v1794_v51, %v1792_v37  ;;  %3310 = vmatprep.subr.bf16.mxu0 %v3604_v12  ;;  %3293 = vmatpush3.bf16.msra.mxu1 %v3428_v42  ;;  %v2239_v51 = vpop.permute.xlu1 %2238 }
 0x867   :  { %3294 = vmatprep.subr.bf16.mxu1 %v3604_v12  ;;  %2125 = vrot.lane.b32.xlu0 %v2123_v3, %s3600_s9 }
 0x868   :  { %3287 = vmatmul.mubr.msk.bf16.vlgmr.msra.gmra.mrb[28].mxu0 %vm247_vm1, %v1795_v46 }
 0x869   :  { %3312 = vmatprep.mubr.msk.bf16.mxu0 %vm3605_vm8, %v3604_v12 }
 0x86a   :  { %3295 = vmatpush3.bf16.msra.mxu1 %v3429_v22  ;;  %v2352_v9 = vpop.permute.xlu1 %2351 }
 0x86b   :  { %3296 = vmatprep.subr.bf16.mxu1 %v3604_v12  ;;  %2026 = vperm.xlu0 %3410, %v2006_v58  }
 0x86e   :  { %3297 = vmatpush3.bf16.msra.mxu1 %v3430_v54 }
 0x86f   :  { %3298 = vmatprep.subr.bf16.mxu1 %v3604_v12  ;;  %3411 = vset.pattern.permute.xlu0 %v3599_v23 }
 0x870   :  { %2137 = vperm.xlu0 %3411, %v2005_v20  }
 0x872   :  { %3299 = vmatpush3.bf16.msra.mxu1 %v3431_v25 }
 0x873   :  { %3300 = vmatprep.subr.bf16.mxu1 %v3604_v12 }
 0x874   :  { %2149 = vperm.xlu0 %3411, %v4645_v6  }
 0x876   :  { %3301 = vmatpush3.bf16.msra.mxu1 %v3432_v36  ;;  %v2014_v36 = vrot.slane %v4620_v5, %v3825_v31 }
 0x877   :  { %3302 = vmatprep.subr.bf16.mxu1 %v3604_v12 }
 0x878   :  { %3413 = vset.pattern.permute.xlu0 %v3598_v21 }
 0x879   :  { %2250 = vperm.xlu0 %3413, %v2005_v20  }
 0x87a   :  { %3303 = vmatpush3.bf16.msra.mxu1 %v3433_v48 }
 0x87b   :  { %3304 = vmatprep.subr.bf16.mxu1 %v3604_v12 }
 0x87d   :  { %2254 = vperm.xlu0 %3413, %v2006_v58  }
 0x87e   :  { %3305 = vmatpush3.bf16.msra.mxu1 %v3434_v45 }
 0x87f   :  { %3334 = vmatprep.subr.bf16.mxu1 %v3604_v12 }
 0x881   :  { %2258 = vperm.xlu0 %3413, %v2007_v19  }
 0x885   :  { %2262 = vperm.xlu0 %3413, %v4645_v6  }
 0x889   :  { %3415 = vset.pattern.permute.xlu0 %v3603_v30 }
 0x88a   :  { %2371 = vperm.xlu0 %3415, %v2007_v19  }
 0x8af   :  { %v1407_v1 = vpop.f32.mrb[16].mxu0 }
 0x8b0   :  { %v3264_v2 = vpop.f32.mrb[17].mxu0  ;;  %v1414_v18 = vsel %vm432_vm14, %v1407_v1, 0.0 }
 0x8b1   :  { %v1410_v17 = vpop.f32.mrb[18].mxu0 }
 0x8b2   :  { %v3265_v49 = vpop.f32.mrb[19].mxu0  ;;  %v1415_v57 = vsel %vm432_vm14, %v1410_v17, 0.0 }
 0x8d9   :  { %v2126_v46 = vpop.permute.xlu0 %2125 }
 0x8ea   :  { %v2027_v4 = vpop.permute.xlu0 %2026 }
 0x8ef   :  { %v2138_v3 = vpop.permute.xlu0 %2137 }
 0x8f3   :  { %v2150_v44 = vpop.permute.xlu0 %2149 }
 0x8f8   :  { %v4685_v58 = vpop.permute.xlu0 %2250 }
 0x8fc   :  { %v4687_v20 = vpop.permute.xlu0 %2254 }
 0x900   :  { %v4689_v19 = vpop.permute.xlu0 %2258 }
 0x902   :  { %v1549_v21 = vpop.f32.mrb[20].mxu0 }
 0x903   :  { %v1556_v23 = vsel %vm4331_vm15, %v1549_v21, %v1414_v18  ;;  %v3272_v7 = vpop.f32.mrb[21].mxu0 }
 0x904   :  { %v1552_v39 = vpop.f32.mrb[22].mxu0  ;;  %v4691_v18 = vpop.permute.xlu0 %2262 }
 0x905   :  { %v1557_v52 = vsel %vm4331_vm15, %v1552_v39, %v1415_v57  ;;  %v3273_v61 = vpop.f32.mrb[23].mxu0  ;;  %v2022_v7 = vpop.permute.xlu1 %2021 }
 0x909   :  { %v4693_v21 = vpop.permute.xlu0 %2371  ;;  %v2032_v57 = vpop.permute.xlu1 %2031 }
 0x90d   :  { %v2037_v39 = vpop.permute.xlu1 %2036 }
 0x933   :  { %v1691_v28 = vpop.f32.mrb[24].mxu0 }
 0x934   :  { %v1698_v30 = vsel %vm4353_vm7, %v1691_v28, %v1556_v23  ;;  %v3280_v47 = vpop.f32.mrb[25].mxu0 }
 0x935   :  { %v1694_v38 = vpop.f32.mrb[26].mxu0 }
 0x936   :  { %v1699_v41 = vsel %vm4353_vm7, %v1694_v38, %v1557_v52  ;;  %v3281_v8 = vpop.f32.mrb[27].mxu0  ;;  %v2142_v52 = vpop.permute.xlu1 %2141 }
 0x93a   :  { %v2146_v61 = vpop.permute.xlu1 %2145 }
 0x93b   :  { %v1833_v26 = vpop.f32.mrb[28].mxu0 }
 0x93c   :  { %v1840_v53 = vsel %vm1076_vm9, %v1833_v26, %v1698_v30  ;;  %v3288_v24 = vpop.f32.mrb[29].mxu0 }
 0x93d   :  { %v1848_v62 = vadd.f32 %v3047_v43, %v1840_v53  ;;  %v1836_v0 = vpop.f32.mrb[30].mxu0 }
 0x93e   :  { %v1841_v15 = vsel %vm1076_vm9, %v1836_v0, %v1699_v41  ;;  %v3289_v32 = vpop.f32.mrb[31].mxu0  ;;  %v4699_v47 = vpop.permute.xlu1 %2363 }
 0x93f   :  { %v1852_v34 = vmin.f32 %v1848_v62, 0.0  ;;  %v1849_v56 = vadd.f32 %v3047_v43, %v1841_v15  ;;  %vm1850_vm3 = vcmp.gt.f32.partialorder %v1848_v62, 0.0 }
 0x941   :  { %v1854_v55 = vmul.f32 1.442695, %v1852_v34  ;;  %v1853_v63 = vmin.f32 %v1849_v56, 0.0  ;;  %vm1851_vm2 = vcmp.gt.f32.partialorder %v1849_v56, 0.0 }
 0x942   :  { %v4701_v38 = vpop.permute.xlu1 %2367 }
 0x943   :  { %3551 = vpow2.f32 %v1854_v55  ;;  %v1856_v33 = vmul.f32 1.442695, %v1853_v63 }
 0x945   :  { %3553 = vpow2.f32 %v1856_v33 }
 0x94d   :  { %v3552_v35 = vpop.eup %3551 }
 0x94e   :  { %v3048_v50 = vadd.f32 -1.0, %v3552_v35 }
 0x94f   :  { %v3554_v59 = vpop.eup %3553 }
 0x950   :  { %v3049_v60 = vadd.f32 -1.0, %v3554_v59  ;;  %v1860_v27 = vsel %vm1850_vm3, %v1848_v62, %v3048_v50 }
 0x952   :  { %v1861_v14 = vsel %vm1851_vm2, %v1849_v56, %v3049_v60 }
 0x953   :  { %v1862_v37 = vpack.c.bf16 %v1861_v14, %v1860_v27 }
 0x955   :  { %3307 = vmatmul.mubr.bf16.vlgmr.msra.gmra.mrb[12].mxu1 %v1862_v37 }
 0x956   :  { %3350 = vmatprep.mubr.msk.bf16.mxu1 %vm3605_vm8, %v3604_v12 }
 0xa28   :  { %v1961_v1 = vpop.f32.mrb[12].mxu1 }
 0xa29   :  { %v3308_v2 = vpop.f32.mrb[13].mxu1  ;;  %v2241_v17 = vmul.f32 %v2239_v51, %v1961_v1  ;;  %v2128_v49 = vmul.f32 %v2126_v46, %v1961_v1  ;;  %v2354_v25 = vmul.f32 %v2352_v9, %v1961_v1  ;;  %v2015_v48 = vmul.f32 %v2014_v36, %v1961_v1  ;;  %v2001_v51 = vld [vmem:[%s4919_s15] sm:$0x3] }
 0xa2a   :  { %v1964_v42 = vpop.f32.mrb[14].mxu1 }
 0xa2b   :  { %v4675_v22 = vpack.c.bf16 %v1964_v42, %v1961_v1  ;;  %2243 = vrot.lane.b32.xlu1 %v2241_v17, %s3601_s0  ;;  %2130 = vrot.lane.b32.xlu0 %v2128_v49, %s3602_s29  ;;  %v3309_v54 = vpop.f32.mrb[15].mxu1  ;;  %v2016_v45 = vsel %vm247_vm1, %v2015_v48, 0.0  ;;  %v2002_v49 = vunpack.c.0.s8 %v2001_v51 }
 0xa2d   :  { %3311 = vmatpush3.bf16.msra.mxu0 %v4675_v22 }
 0xa2e   :  { %3316 = vmatprep.subr.bf16.mxu0 %v3604_v12 }
 0xa2f   :  { %2356 = vrot.lane.b32.xlu0 %v2354_v25, %s3600_s9 }
 0xa4f   :  { %2017 = vadd.xlane.f32.xlu1 %v2016_v45 }
 0xa82   :  { %1968 = vxpose.xlu1.b32.start [1/2] (short) %v1961_v1, 128 }
 0xa86   :  { %1969 = vxpose.xlu1.b32.end [2/2] (short) %v1964_v42, 128 }
 0xa9d   :  { %v2131_v5 = vpop.permute.xlu0 %2130  ;;  %v2244_v41 = vpop.permute.xlu1 %2243 }
 0xa9e   :  { %v2133_v23 = vsel %vm247_vm1, %v2131_v5, 0.0  ;;  %v2246_v8 = vsel %vm247_vm1, %v2244_v41, 0.0  ;;  %v4714_v5 = vcvt.s32.f32 %v2002_v49 }
 0xa9f   :  { %2134 = vadd.xlane.f32.xlu0 %v2133_v23 }
 0xaa0   :  { %vm2004_vm6 = vcmp.gt.f32.partialorder %v4714_v5, 0.0 }
 0xaa1   :  { %v2357_v28 = vpop.permute.xlu0 %2356 }
 0xaa2   :  { %v2359_v30 = vsel %vm247_vm1, %v2357_v28, 0.0 }
 0xaa4   :  { %3416 = vset.pattern.permute.xlu1 %v3597_v10 }
 0xab5   :  { %2375 = vperm.xlu0 %3415, %v4645_v6  }
 0xad4   :  { %2360 = vadd.xlane.f32.xlu0 %v2359_v30 }
 0xadc   :  { %v2018_v43 = vpop.xlane.xlu1 %2017 }
 0xae5   :  { %2247 = vadd.xlane.f32.xlu1 %v2246_v8 }
 0xb02   :  { %v1984_v26 = vpop.trf.xlu1 }
 0xb03   :  { %v2039_v53 = vmul.f32 %v2022_v7, %v1984_v26 }
 0xb05   :  { %v2043_v15 = vsel %vm104_vm0, %v2039_v53, 0.0 }
 0xb06   :  { %v1985_v6 = vpop.trf.xlu1 }
 0xb07   :  { %v2040_v24 = vmul.f32 %v2027_v4, %v1985_v6 }
 0xb09   :  { %v2044_v62 = vsel %vm104_vm0, %v2040_v24, 0.0 }
 0xb0a   :  { %v1986_v0 = vpop.trf.xlu1  ;;  %v2045_v34 = vadd.f32 %v2044_v62, %v2043_v15 }
 0xb0b   :  { %v2041_v32 = vmul.f32 %v2032_v57, %v1986_v0 }
 0xb0d   :  { %v2046_v56 = vsel %vm104_vm0, %v2041_v32, 0.0 }
 0xb0e   :  { %v2047_v55 = vadd.f32 %v2046_v56, %v2045_v34  ;;  %v1987_v63 = vpop.trf.xlu1 }
 0xb0f   :  { %v2042_v33 = vmul.f32 %v2037_v39, %v1987_v63 }
 0xb11   :  { %v2048_v35 = vsel %vm104_vm0, %v2042_v33, 0.0 }
 0xb12   :  { %v2049_v50 = vadd.f32 %v2048_v35, %v2047_v55  ;;  %v1988_v59 = vpop.trf.xlu1 }
 0xb13   :  { %v2152_v1 = vmul.f32 %v2138_v3, %v1988_v59 }
 0xb14   :  { %v2050_v60 = vrot.slane %v2049_v50, 4 }
 0xb15   :  { %v2156_v25 = vsel %vm104_vm0, %v2152_v1, 0.0 }
 0xb16   :  { %v2051_v27 = vadd.f32 %v2050_v60, %v2049_v50  ;;  %v1989_v14 = vpop.trf.xlu1 }
 0xb17   :  { %v2153_v37 = vmul.f32 %v2142_v52, %v1989_v14 }
 0xb18   :  { %v2052_v46 = vrot.slane %v2051_v27, 2 }
 0xb19   :  { %v2157_v9 = vsel %vm104_vm0, %v2153_v37, 0.0 }
 0xb1a   :  { %v2053_v2 = vadd.f32 %v2052_v46, %v2051_v27  ;;  %v1990_v17 = vpop.trf.xlu1  ;;  %v2158_v45 = vadd.f32 %v2157_v9, %v2156_v25 }
 0xb1b   :  { %v2154_v42 = vmul.f32 %v2146_v61, %v1990_v17 }
 0xb1c   :  { %v2054_v54 = vrot.slane %v2053_v2, 1 }
 0xb1d   :  { %v2159_v36 = vsel %vm104_vm0, %v2154_v42, 0.0 }
 0xb1e   :  { %v2055_v48 = vadd.f32 %v2054_v54, %v2053_v2  ;;  %v1991_v4 = vpop.trf.xlu1  ;;  %v2160_v7 = vadd.f32 %v2159_v36, %v2158_v45 }
 0xb1f   :  { %v2155_v23 = vmul.f32 %v2150_v44, %v1991_v4 }
 0xb20   :  { %v2056_v57 = vadd.f32 %v2055_v48, %v2018_v43 }
 0xb21   :  { %v2161_v3 = vsel %vm104_vm0, %v2155_v23, 0.0 }
 0xb22   :  { %v2162_v39 = vadd.f32 %v2161_v3, %v2160_v7  ;;  %v1992_v52 = vpop.trf.xlu1  ;;  %vm2057_vm10 = vcmp.gt.f32.partialorder %v2056_v57, 0.0  ;;  %v2058_v61 = vmul.f32 0.2, %v2056_v57 }
 0xb23   :  { %v2265_v2 = vmul.f32 %v4685_v58, %v1992_v52 }
 0xb24   :  { %v2163_v28 = vrot.slane %v2162_v39, 4  ;;  %v2059_v30 = vsel %vm2057_vm10, %v2056_v57, %v2058_v61 }
 0xb25   :  { %v4720_v41 = vsel %vm2004_vm6, %v2059_v30, -1e+30 }
 0xb26   :  { %v2164_v8 = vadd.f32 %v2163_v28, %v2162_v39  ;;  %v2061_v44 = vsel %vm104_vm0, %v4720_v41, -inf  ;;  %v1993_v26 = vpop.trf.xlu1 }
 0xb27   :  { %2062 = vmax.xlane.f32.xlu0 %v2061_v44  ;;  %v2266_v51 = vmul.f32 %v4687_v20, %v1993_v26  ;;  %v2269_v20 = vsel %vm104_vm0, %v2265_v2, 0.0 }
 0xb28   :  { %v2165_v43 = vrot.slane %v2164_v8, 2 }
 0xb29   :  { %v2270_v42 = vsel %vm104_vm0, %v2266_v51, 0.0 }
 0xb2a   :  { %v2166_v6 = vadd.f32 %v2165_v43, %v2164_v8  ;;  %v1994_v24 = vpop.trf.xlu1  ;;  %v2271_v36 = vadd.f32 %v2270_v42, %v2269_v20 }
 0xb2b   :  { %v2267_v17 = vmul.f32 %v4689_v19, %v1994_v24 }
 0xb2c   :  { %v2167_v53 = vrot.slane %v2166_v6, 1  ;;  %v2135_v0 = vpop.xlane.xlu0 %2134 }
 0xb2d   :  { %v2272_v25 = vsel %vm104_vm0, %v2267_v17, 0.0 }
 0xb2e   :  { %v2168_v62 = vadd.f32 %v2167_v53, %v2166_v6  ;;  %v1995_v34 = vpop.trf.xlu1  ;;  %v2273_v48 = vadd.f32 %v2272_v25, %v2271_v36 }
 0xb30   :  { %v2169_v15 = vadd.f32 %v2168_v62, %v2135_v0 }
 0xb32   :  { %vm2170_vm4 = vcmp.gt.f32.partialorder %v2169_v15, 0.0  ;;  %v2171_v32 = vmul.f32 0.2, %v2169_v15  ;;  %v1996_v33 = vpop.trf.xlu1 }
 0xb33   :  { %v2378_v27 = vmul.f32 %v4699_v47, %v1996_v33  ;;  %v2268_v47 = vmul.f32 %v4691_v18, %v1995_v34 }
 0xb34   :  { %v2172_v56 = vsel %vm2170_vm4, %v2169_v15, %v2171_v32  ;;  %v2376_v37 = vpop.permute.xlu0 %2375 }
 0xb35   :  { %v4726_v55 = vsel %vm2004_vm6, %v2172_v56, -1e+30  ;;  %v2382_v49 = vsel %vm104_vm0, %v2378_v27, 0.0  ;;  %v2274_v19 = vsel %vm104_vm0, %v2268_v47, 0.0 }
 0xb36   :  { %v2174_v63 = vsel %vm104_vm0, %v4726_v55, -inf  ;;  %v1997_v35 = vpop.trf.xlu1  ;;  %v2275_v45 = vadd.f32 %v2274_v19, %v2273_v48 }
 0xb37   :  { %2175 = vmax.xlane.f32.xlu0 %v2174_v63  ;;  %v2379_v59 = vmul.f32 %v4701_v38, %v1997_v35 }
 0xb38   :  { %v2276_v23 = vrot.slane %v2275_v45, 4 }
 0xb39   :  { %v2383_v46 = vsel %vm104_vm0, %v2379_v59, 0.0 }
 0xb3a   :  { %v1998_v50 = vpop.trf.xlu1  ;;  %v2384_v38 = vadd.f32 %v2383_v46, %v2382_v49  ;;  %v2277_v57 = vadd.f32 %v2276_v23, %v2275_v45 }
 0xb3b   :  { %v2380_v14 = vmul.f32 %v4693_v21, %v1998_v50 }
 0xb3c   :  { %v2278_v18 = vrot.slane %v2277_v57, 2 }
 0xb3d   :  { %v2385_v9 = vsel %vm104_vm0, %v2380_v14, 0.0 }
 0xb3e   :  { %v1999_v60 = vpop.trf.xlu1  ;;  %v2386_v54 = vadd.f32 %v2385_v9, %v2384_v38  ;;  %v2279_v61 = vadd.f32 %v2278_v18, %v2277_v57 }
 0xb3f   :  { %v2381_v1 = vmul.f32 %v2376_v37, %v1999_v60 }
 0xb40   :  { %v2280_v8 = vrot.slane %v2279_v61, 1 }
 0xb41   :  { %v2387_v21 = vsel %vm104_vm0, %v2381_v1, 0.0 }
 0xb42   :  { %v2388_v58 = vadd.f32 %v2387_v21, %v2386_v54  ;;  %v2281_v26 = vadd.f32 %v2280_v8, %v2279_v61 }
 0xb44   :  { %v2389_v4 = vrot.slane %v2388_v58, 4 }
 0xb46   :  { %v2390_v7 = vadd.f32 %v2389_v4, %v2388_v58 }
 0xb48   :  { %v2391_v3 = vrot.slane %v2390_v7, 2 }
 0xb4a   :  { %v2392_v39 = vadd.f32 %v2391_v3, %v2390_v7 }
 0xb4c   :  { %v2393_v52 = vrot.slane %v2392_v39, 1 }
 0xb4e   :  { %v2394_v30 = vadd.f32 %v2393_v52, %v2392_v39 }
 0xb61   :  { %v2361_v28 = vpop.xlane.xlu0 %2360 }
 0xb62   :  { %v2395_v44 = vadd.f32 %v2394_v30, %v2361_v28 }
 0xb64   :  { %v2397_v6 = vmul.f32 0.2, %v2395_v44  ;;  %vm2396_vm5 = vcmp.gt.f32.partialorder %v2395_v44, 0.0 }
 0xb66   :  { %v2398_v0 = vsel %vm2396_vm5, %v2395_v44, %v2397_v6  ;;  %v3438_v6 = vld [vmem:[%s4920_s16 + $0x18] sm:$0xff]  }
 0xb67   :  { %v2399_v34 = vsel %vm2004_vm6, %v2398_v0, -1e+30  ;;  %v3442_v0 = vld [vmem:[%s4920_s16 + $0x38] sm:$0xff]  }
 0xb68   :  { %v2400_v56 = vsel %vm104_vm0, %v2399_v34, -inf }
 0xb72   :  { %v2248_v43 = vpop.xlane.xlu1 %2247 }
 0xb73   :  { %v2282_v53 = vadd.f32 %v2281_v26, %v2248_v43  ;;  %v3435_v26 = vld [vmem:[%s4920_s16] sm:$0xff]   ;;  %v3436_v43 = vld [vmem:[%s4920_s16 + $0x8] sm:$0xff]  }
 0xb74   :  { %3335 = vmatpush3.bf16.msra.mxu1 %v3435_v26  ;;  %v2857_v26 = vld [vmem:[%s4925_s21 + $0x8] sm:$0xff] }
 0xb75   :  { %vm2283_vm11 = vcmp.gt.f32.partialorder %v2282_v53, 0.0  ;;  %v2284_v24 = vmul.f32 0.2, %v2282_v53  ;;  %3336 = vmatprep.subr.bf16.mxu1 %v3604_v12 }
 0xb77   :  { %v2285_v62 = vsel %vm2283_vm11, %v2282_v53, %v2284_v24  ;;  %v3439_v53 = vld [vmem:[%s4920_s16 + $0x20] sm:$0xff]   ;;  %v3440_v24 = vld [vmem:[%s4920_s16 + $0x28] sm:$0xff]  }
 0xb78   :  { %v2286_v15 = vsel %vm2004_vm6, %v2285_v62, -1e+30  ;;  %3337 = vmatpush3.bf16.msra.mxu1 %v3436_v43  ;;  %v3441_v62 = vld [vmem:[%s4920_s16 + $0x30] sm:$0xff]  }
 0xb79   :  { %v2287_v32 = vsel %vm104_vm0, %v2286_v15, -inf  ;;  %3338 = vmatprep.subr.bf16.mxu1 %v3604_v12  ;;  %v2858_v43 = vld [vmem:[%s4925_s21 + $0x10] sm:$0xff] }
 0xb7a   :  { %2288 = vmax.xlane.f32.xlu0 %v2287_v32 }
 0xb7e   :  { %2401 = vmax.xlane.f32.xlu0 %v2400_v56 }
 0xbb4   :  { %v2063_v63 = vpop.xlane.xlu0 %2062 }
 0xbb5   :  { %v2064_v33 = vsub.f32 %v4720_v41, %v2063_v63 }
 0xbb7   :  { %v2065_v35 = vmul.f32 1.442695, %v2064_v33 }
 0xbb9   :  { %3555 = vpow2.f32 %v2065_v35 }
 0xbc3   :  { %v3556_v50 = vpop.eup %3555 }
 0xbc4   :  { %v2176_v59 = vpop.xlane.xlu0 %2175  ;;  %v2067_v60 = vsel %vm2004_vm6, %v3556_v50, 0.0 }
 0xbc5   :  { %v2177_v27 = vsub.f32 %v4726_v55, %v2176_v59  ;;  %v2068_v14 = vsel %vm104_vm0, %v2067_v60, 0.0 }
 0xbc6   :  { %2069 = vadd.xlane.f32.xlu0 %v2068_v14 }
 0xbc7   :  { %v2178_v37 = vmul.f32 1.442695, %v2177_v27 }
 0xbc9   :  { %3557 = vpow2.f32 %v2178_v37 }
 0xbd3   :  { %v3558_v51 = vpop.eup %3557 }
 0xbd4   :  { %v2180_v46 = vsel %vm2004_vm6, %v3558_v51, 0.0 }
 0xbd5   :  { %v2181_v41 = vsel %vm104_vm0, %v2180_v46, 0.0 }
 0xbd6   :  { %2182 = vadd.xlane.f32.xlu0 %v2181_v41  ;;  %v3062_v41 = vld [vmem:[%s4918_s14] ss:$0 sm:$0xff] }
 0xc07   :  { %v2289_v1 = vpop.xlane.xlu0 %2288 }
 0xc08   :  { %v2290_v2 = vsub.f32 %v2286_v15, %v2289_v1 }
 0xc0a   :  { %v2291_v17 = vmul.f32 1.442695, %v2290_v2 }
 0xc0b   :  { %v2402_v49 = vpop.xlane.xlu0 %2401 }
 0xc0c   :  { %3559 = vpow2.f32 %v2291_v17  ;;  %v2403_v9 = vsub.f32 %v2399_v34, %v2402_v49 }
 0xc0e   :  { %v2404_v38 = vmul.f32 1.442695, %v2403_v9 }
 0xc10   :  { %3561 = vpow2.f32 %v2404_v38 }
 0xc16   :  { %v3560_v55 = vpop.eup %3559 }
 0xc17   :  { %v2293_v42 = vsel %vm2004_vm6, %v3560_v55, 0.0 }
 0xc18   :  { %v2294_v47 = vsel %vm104_vm0, %v2293_v42, 0.0 }
 0xc19   :  { %2295 = vadd.xlane.f32.xlu0 %v2294_v47 }
 0xc1a   :  { %v3562_v21 = vpop.eup %3561 }
 0xc1b   :  { %v2406_v54 = vsel %vm2004_vm6, %v3562_v21, 0.0 }
 0xc1c   :  { %v2407_v20 = vsel %vm104_vm0, %v2406_v54, 0.0 }
 0xc1d   :  { %2408 = vadd.xlane.f32.xlu0 %v2407_v20 }
 0xc53   :  { %v2070_v25 = vpop.xlane.xlu0 %2069 }
 0xc54   :  { %vm2071_vm12 = vcmp.gt.f32.partialorder %v2070_v25, 0.0 }
 0xc55   :  { %v2072_v36 = vsel %vm2071_vm12, %v2070_v25, 1.0 }
 0xc56   :  { %3563 = vrcp.f32 %v2072_v36 }
 0xc60   :  { %v3564_v58 = vpop.eup %3563 }
 0xc61   :  { %v2074_v19 = vmul.f32 %v3564_v58, %v2067_v60 }
 0xc63   :  { %v2183_v48 = vpop.xlane.xlu0 %2182  ;;  %v2075_v45 = vpack.c.bf16 %v2074_v19, %v2074_v19  ;;  %v2618_v19 = vld [vmem:[%s4928_s24] sm:$0x3] }
 0xc64   :  { %vm2184_vm13 = vcmp.gt.f32.partialorder %v2183_v48, 0.0 }
 0xc65   :  { %v2185_v4 = vsel %vm2184_vm13, %v2183_v48, 1.0  ;;  %3313 = vmatmul.mubr.msk.bf16.vlgmr.msra.gmra.mrb[32].mxu0 %vm104_vm0, %v2075_v45  ;;  %v2624_v48 = vrot.slane %v2618_v19, %v3825_v31 }
 0xc66   :  { %3565 = vrcp.f32 %v2185_v4  ;;  %3317 = vmatpush3.bf16.msra.mxu0 %v4675_v22  ;;  %3318 = vmatprep.mubr.msk.bf16.mxu0 %vm3605_vm8, %v3604_v12 }
 0xc67   :  { %3322 = vmatprep.subr.bf16.mxu0 %v3604_v12 }
 0xc70   :  { %v3566_v5 = vpop.eup %3565 }
 0xc71   :  { %v2187_v23 = vmul.f32 %v3566_v5, %v2180_v46 }
 0xc73   :  { %v2188_v7 = vpack.c.bf16 %v2187_v23, %v2187_v23  ;;  %v2631_v23 = vrot.slane %v2618_v19, %v3773_v16  ;;  %v2759_v16 = vld [vmem:[%s4923_s19 + $0x10] sm:$0xff]  ;;  %v3446_v19 = vld [vmem:[%s4924_s20 + $0x8] sm:$0xff]  }
 0xc75   :  { %3319 = vmatmul.mubr.msk.bf16.vlgmr.msra.gmra.mrb[36].mxu0 %vm104_vm0, %v2188_v7 }
 0xc76   :  { %3323 = vmatpush3.bf16.msra.mxu0 %v4675_v22  ;;  %3324 = vmatprep.mubr.msk.bf16.mxu0 %vm3605_vm8, %v3604_v12 }
 0xc77   :  { %3328 = vmatprep.subr.bf16.mxu0 %v3604_v12 }
 0xca6   :  { %v2296_v57 = vpop.xlane.xlu0 %2295 }
 0xca7   :  { %vm2297_vm3 = vcmp.gt.f32.partialorder %v2296_v57, 0.0 }
 0xca8   :  { %v2298_v3 = vsel %vm2297_vm3, %v2296_v57, 1.0 }
 0xca9   :  { %3567 = vrcp.f32 %v2298_v3 }
 0xcaa   :  { %v2409_v39 = vpop.xlane.xlu0 %2408 }
 0xcab   :  { %vm2410_vm2 = vcmp.gt.f32.partialorder %v2409_v39, 0.0 }
 0xcac   :  { %v2411_v18 = vsel %vm2410_vm2, %v2409_v39, 1.0 }
 0xcad   :  { %3569 = vrcp.f32 %v2411_v18 }
 0xcb3   :  { %v3568_v52 = vpop.eup %3567 }
 0xcb4   :  { %v2300_v61 = vmul.f32 %v3568_v52, %v2293_v42 }
 0xcb6   :  { %v2301_v28 = vpack.c.bf16 %v2300_v61, %v2300_v61 }
 0xcb7   :  { %v3570_v30 = vpop.eup %3569 }
 0xcb8   :  { %3325 = vmatmul.mubr.msk.bf16.vlgmr.msra.gmra.mrb[40].mxu0 %vm104_vm0, %v2301_v28  ;;  %v2413_v8 = vmul.f32 %v3570_v30, %v2406_v54  ;;  %v3064_v54 = vld [vmem:[%s4921_s17] ss:$0 sm:$0xff] }
 0xcb9   :  { %3329 = vmatpush3.bf16.msra.mxu0 %v4675_v22  ;;  %3330 = vmatprep.mubr.msk.bf16.mxu0 %vm3605_vm8, %v3604_v12  ;;  %v3437_v22 = vld [vmem:[%s4920_s16 + $0x10] sm:$0xff]   ;;  %vm2635_vm8 = vcmask 64512  }
 0xcba   :  { %v2414_v44 = vpack.c.bf16 %v2413_v8, %v2413_v8  ;;  %3339 = vmatpush3.bf16.msra.mxu1 %v3437_v22  ;;  %v2760_v8 = vld [vmem:[%s4923_s19 + $0x18] sm:$0xff] }
 0xcbb   :  { %3340 = vmatprep.subr.bf16.mxu1 %v3604_v12  ;;  %v2859_v22 = vld [vmem:[%s4925_s21 + $0x18] sm:$0xff] }
 0xcbe   :  { %3341 = vmatpush3.bf16.msra.mxu1 %v3438_v6  ;;  %v2949_v6 = vld [vmem:[%s4926_s22] sm:$0xff] }
 0xcbf   :  { %3342 = vmatprep.subr.bf16.mxu1 %v3604_v12 }
 0xcc0   :  { %3331 = vmatmul.mubr.msk.bf16.vlgmr.msra.gmra.mrb[44].mxu0 %vm104_vm0, %v2414_v44  ;;  %v2856_v44 = vld [vmem:[%s4925_s21] sm:$0xff] }
 0xcc2   :  { %3343 = vmatpush3.bf16.msra.mxu1 %v3439_v53  ;;  %v2950_v53 = vld [vmem:[%s4926_s22 + $0x8] sm:$0xff] }
 0xcc3   :  { %3344 = vmatprep.subr.bf16.mxu1 %v3604_v12 }
 0xcc6   :  { %3345 = vmatpush3.bf16.msra.mxu1 %v3440_v24  ;;  %v2951_v24 = vld [vmem:[%s4926_s22 + $0x10] sm:$0xff] }
 0xcc7   :  { %3346 = vmatprep.subr.bf16.mxu1 %v3604_v12 }
 0xcca   :  { %3347 = vmatpush3.bf16.msra.mxu1 %v3441_v62  ;;  %v2952_v62 = vld [vmem:[%s4926_s22 + $0x18] sm:$0xff] }
 0xccb   :  { %3348 = vmatprep.subr.bf16.mxu1 %v3604_v12 }
 0xcce   :  { %3349 = vmatpush3.bf16.msra.mxu1 %v3442_v0  ;;  %v2990_v0 = vld [vmem:[#allocation2] sm:$0x1] }
 0xd38   :  { %v2113_v15 = vpop.f32.mrb[32].mxu0 }
 0xd39   :  { %v3314_v32 = vpop.f32.mrb[33].mxu0  ;;  %v2119_v63 = vsel %vm432_vm14, %v2113_v15, 0.0 }
 0xd3a   :  { %v2116_v34 = vpop.f32.mrb[34].mxu0 }
 0xd3b   :  { %v3315_v56 = vpop.f32.mrb[35].mxu0 }
 0xd48   :  { %v2226_v33 = vpop.f32.mrb[36].mxu0 }
 0xd49   :  { %v2232_v35 = vsel %vm4331_vm15, %v2226_v33, %v2119_v63  ;;  %v3320_v50 = vpop.f32.mrb[37].mxu0  ;;  %vm2625_vm15 = vcmp.eq.s32.totalorder %v3763_v11, %v2624_v48 }
 0xd4a   :  { %v2229_v59 = vpop.f32.mrb[38].mxu0  ;;  %v2626_v45 = vsel %vm2625_vm15, 1.0, %v3604_v12 }
 0xd4b   :  { %v3321_v60 = vpop.f32.mrb[39].mxu0  ;;  %v2627_v4 = vpack.c.bf16 %v2626_v45, %v2626_v45 }
 0xd8b   :  { %v2339_v27 = vpop.f32.mrb[40].mxu0 }
 0xd8c   :  { %v2345_v14 = vsel %vm4353_vm7, %v2339_v27, %v2232_v35  ;;  %v3326_v37 = vpop.f32.mrb[41].mxu0  ;;  %vm2642_vm7 = vcmask 1043456  }
 0xd8d   :  { %v2342_v51 = vpop.f32.mrb[42].mxu0  ;;  %3382 = vmatprep.subr.msk.bf16.mxu0 %vm2642_vm7, %v2627_v4  ;;  %v2644_v5 = vsel %vm2642_vm7, %v2627_v4, 0 }
 0xd8e   :  { %v3327_v46 = vpop.f32.mrb[43].mxu0  ;;  %3355 = vmatpush3.bf16.msra.mxu0 %v2644_v5 }
 0xd8f   :  { %v3444_v46 = vld [vmem:[%s4922_s18 + $0x8] sm:$0xff]  }
 0xd93   :  { %v2452_v1 = vpop.f32.mrb[44].mxu0 }
 0xd94   :  { %v2458_v2 = vsel %vm1076_vm9, %v2452_v1, %v2345_v14  ;;  %v3332_v40 = vpop.f32.mrb[45].mxu0  ;;  %vm2632_vm9 = vcmp.eq.s32.totalorder %v3763_v11, %v2631_v23  ;;  %v3443_v11 = vld [vmem:[%s4922_s18] sm:$0xff]  }
 0xd95   :  { %v2465_v17 = vadd.f32 %v3062_v41, %v2458_v2  ;;  %v2455_v49 = vpop.f32.mrb[46].mxu0  ;;  %v2633_v7 = vsel %vm2632_vm9, 1.0, %v3604_v12  ;;  %v2758_v12 = vld [vmem:[%s4923_s19 + $0x8] sm:$0xff]  ;;  %v3445_v41 = vld [vmem:[%s4924_s20] sm:$0xff]   ;;  %s3606_s20 = smov [#allocation3]  }
 0xd96   :  { %v3333_v9 = vpop.f32.mrb[47].mxu0  ;;  %v2634_v57 = vpack.c.bf16 %v2633_v7, %v2633_v7  ;;  %s3009_s15 = sshll.u32 %s3606_s20, 4  ;;  %s3010_s15 = int_to_ptr.vmem [resolvable:$true] %s3009_s15 }
 0xd97   :  { %v2467_v38 = vmin.f32 %v2465_v17, 0.0  ;;  %vm2466_vm14 = vcmp.gt.f32.partialorder %v2465_v17, 0.0  ;;  %s3573_s29 = scalar_lea.vmem %s3010_s15, 16  ;;  %s3577_s6 = scalar_lea.vmem %s3010_s15, 32 }
 0xd98   :  { %3383 = vmatprep.subr.msk.bf16.mxu0 %vm2642_vm7, %v2634_v57  ;;  %v2696_v3 = vsel %vm2642_vm7, %v2634_v57, 0  ;;  %p3574_p0 = scmp.ne.s32.totalorder %s3010_s15, %s3573_s29  ;;  %p3578_p1 = scmp.lt.s32.totalorder %s3010_s15, %s3010_s15 }
 0xd99   :  { %v2468_v55 = vmul.f32 1.442695, %v2467_v38  ;;  %p3579_p2 = scmp.lt.s32.totalorder %s3577_s6, %s3573_s29 }
 0xd9b   :  { %3571 = vpow2.f32 %v2468_v55  ;;  %p3580_p3 = por %p3579_p2, %p3578_p1 }
 0xd9d   :  { %p3581_p4 = pnand %p3580_p3, %p3574_p0 }
 0xda5   :  { %v3572_v13 = vpop.eup %3571 }
 0xda6   :  { %v3063_v42 = vadd.f32 -1.0, %v3572_v13 }
 0xda8   :  { %v2471_v47 = vsel %vm2466_vm14, %v2465_v17, %v3063_v42 }
 0xda9   :  { %v2472_v21 = vpack.c.bf16 %v2471_v47, %v2471_v47 }
 0xdab   :  { %3351 = vmatmul.mubr.bf16.vlgmr.msra.gmra.mrb[16].mxu1 %v2472_v21 }
 0xe7e   :  { %v2578_v20 = vpop.f32.mrb[16].mxu1 }
 0xe7f   :  { %v2579_v29 = vadd.f32 %v3064_v54, %v2578_v20  ;;  %v3352_v25 = vpop.f32.mrb[17].mxu1 }
 0xe80   :  { %v2581_v36 = vpop.f32.mrb[18].mxu1 }
 0xe81   :  { %2584 = vxpose.xlu0.b32.start.end [1/1] (short) (narrow) %v2579_v29, 32  ;;  %v3353_v58 = vpop.f32.mrb[19].mxu1 }
 0xeaa   :  { %3417 = vset.pattern.permute.xlu0 %v3597_v10  ;;  %v2757_v10 = vld [vmem:[%s4923_s19] sm:$0xff] }
 0xeab   :  { %2763 = vperm.xlu1 %3416, %v2757_v10  }
 0xeaf   :  { %2773 = vperm.xlu1 %3416, %v2759_v16  }
 0xeb3   :  { %2778 = vperm.xlu1 %3416, %v2760_v8  }
 0xeb6   :  { %2768 = vperm.xlu0 %3417, %v2758_v12  }
 0xeb7   :  { %2862 = vperm.xlu1 %3416, %v2856_v44  }
 0xebb   :  { %2867 = vperm.xlu1 %3416, %v2857_v26  }
 0xebf   :  { %2872 = vperm.xlu1 %3416, %v2858_v43  }
 0xec3   :  { %2877 = vperm.xlu1 %3416, %v2859_v22  }
 0xec7   :  { %2955 = vperm.xlu1 %3416, %v2949_v6  }
 0xecb   :  { %2960 = vperm.xlu1 %3416, %v2950_v53  }
 0xecf   :  { %2965 = vperm.xlu1 %3416, %v2951_v24  }
 0xed3   :  { %2970 = vperm.xlu1 %3416, %v2952_v62  }
 0xed7   :  { %2993 = vperm.xlu1 %3416, %v2990_v0  }
 0xf01   :  { %v2600_v39 = vpop.trf.xlu0 }
 0xf05   :  { %v2601_v18 = vpop.trf.xlu0 }
 0xf06   :  { %v2616_v52 = vpack.c.bf16 %v2601_v18, %v2600_v39 }
 0xf08   :  { %3356 = vmatprep.mubr.msk.bf16.mxu0 %vm2635_vm8, %v2616_v52 }
 0xf09   :  { %v2602_v61 = vpop.trf.xlu0 }
 0xf0d   :  { %v2603_v28 = vpop.trf.xlu0 }
 0xf0e   :  { %v2617_v30 = vpack.c.bf16 %v2603_v28, %v2602_v61 }
 0xf10   :  { %3357 = vmatmul.mubr.msk.bf16.vlgmr.msra.gmra.mrb[48].mxu0 %vm2635_vm8, %v2617_v30 }
 0xf11   :  { %3361 = vmatpush3.bf16.msra.mxu0 %v2696_v3  ;;  %3362 = vmatprep.mubr.msk.bf16.mxu0 %vm2635_vm8, %v2616_v52 }
 0xf18   :  { %3363 = vmatmul.mubr.msk.bf16.vlgmr.msra.gmra.mrb[52].mxu0 %vm2635_vm8, %v2617_v30 }
 0xf19   :  { %3370 = vmatprep.mubr.msk.bf16.mxu0 %vm247_vm1, %v3443_v11 }
 0xf2a   :  { %v2764_v1 = vpop.permute.xlu1 %2763 }
 0xf2e   :  { %v2774_v2 = vpop.permute.xlu1 %2773 }
 0xf32   :  { %v2779_v38 = vpop.permute.xlu1 %2778 }
 0xf35   :  { %v2769_v9 = vpop.permute.xlu0 %2768 }
 0xf36   :  { %v2863_v48 = vpop.permute.xlu1 %2862 }
 0xf3a   :  { %v2868_v45 = vpop.permute.xlu1 %2867 }
 0xf3e   :  { %v2873_v4 = vpop.permute.xlu1 %2872 }
 0xf42   :  { %v2878_v5 = vpop.permute.xlu1 %2877 }
 0xf46   :  { %v2956_v23 = vpop.permute.xlu1 %2955 }
 0xf4a   :  { %v2961_v7 = vpop.permute.xlu1 %2960 }
 0xf4e   :  { %v2966_v61 = vpop.permute.xlu1 %2965 }
 0xf52   :  { %v2971_v22 = vpop.permute.xlu1 %2970 }
 0xfe3   :  { %v3358_v15 = vpop.f32.mrb[48].mxu0 }
 0xfe4   :  { %v2680_v32 = vpop.f32.mrb[49].mxu0 }
 0xfe5   :  { %v3359_v34 = vpop.f32.mrb[50].mxu0 }
 0xfe6   :  { %v2683_v56 = vpop.f32.mrb[51].mxu0 }
 0xfeb   :  { %v3364_v63 = vpop.f32.mrb[52].mxu0 }
 0xfec   :  { %v2749_v33 = vmul.f32 %v3364_v63, %v3358_v15  ;;  %v2732_v35 = vpop.f32.mrb[53].mxu0 }
 0xfed   :  { %v2747_v50 = vmul.f32 %v2732_v35, %v2680_v32  ;;  %v3365_v59 = vpop.f32.mrb[54].mxu0 }
 0xfee   :  { %v2750_v60 = vmul.f32 %v3365_v59, %v3359_v34  ;;  %v2735_v27 = vpop.f32.mrb[55].mxu0 }
 0xfef   :  { %v2748_v14 = vmul.f32 %v2735_v27, %v2683_v56 }
 0xff0   :  { %v2752_v37 = vpack.c.bf16 %v2750_v60, %v2749_v33 }
 0xff1   :  { %v2751_v51 = vpack.c.bf16 %v2748_v14, %v2747_v50  ;;  %v2994_v50 = vpop.permute.xlu1 %2993 }
 0xff2   :  { %v2999_v60 = vrot.slane %v2994_v50, %v3825_v31 }
 0xff3   :  { %3366 = vmatprep.subr.bf16.mxu0 %v2751_v51 }
 0xff4   :  { %3367 = vmatpush3.bf16.msra.mxu0 %v2751_v51 }
 0xff5   :  { %3368 = vmatprep.subr.bf16.mxu0 %v2752_v37 }
 0xff8   :  { %3369 = vmatpush3.bf16.msra.mxu0 %v2752_v37 }
 0xffb   :  { %3371 = vmatmul.mubr.msk.bf16.vlgmr.msra.gmra.mrb[56].mxu0 %vm247_vm1, %v3444_v46 }
 0xffc   :  { %3378 = vmatprep.mubr.msk.bf16.mxu0 %vm247_vm1, %v3445_v41 }
0x10ce   :  { %v3372_v40 = vpop.f32.mrb[56].mxu0 }
0x10cf   :  { %v2840_v17 = vadd.f32 %v3372_v40, %v2774_v2  ;;  %v2831_v49 = vpop.f32.mrb[57].mxu0 }
0x10d0   :  { %v2832_v55 = vadd.f32 %v2831_v49, %v2764_v1  ;;  %v3373_v13 = vpop.f32.mrb[58].mxu0 }
0x10d1   :  { %v2843_v42 = vadd.f32 %v3373_v13, %v2779_v38  ;;  %v2834_v47 = vpop.f32.mrb[59].mxu0  ;;  %v2848_v54 = vmax.f32 %v2840_v17, 0.0 }
0x10d2   :  { %v2835_v21 = vadd.f32 %v2834_v47, %v2769_v9  ;;  %v2846_v29 = vmax.f32 %v2832_v55, 0.0 }
0x10d3   :  { %v2849_v20 = vmax.f32 %v2843_v42, 0.0 }
0x10d4   :  { %v2847_v25 = vmax.f32 %v2835_v21, 0.0 }
0x10d5   :  { %v2855_v36 = vpack.c.bf16 %v2849_v20, %v2848_v54 }
0x10d6   :  { %v2854_v58 = vpack.c.bf16 %v2847_v25, %v2846_v29 }
0x10d8   :  { %3374 = vmatprep.subr.bf16.mxu0 %v2854_v58 }
0x10d9   :  { %3375 = vmatpush3.bf16.msra.mxu0 %v2854_v58 }
0x10da   :  { %3376 = vmatprep.subr.bf16.mxu0 %v2855_v36 }
0x10dd   :  { %3377 = vmatpush3.bf16.msra.mxu0 %v2855_v36 }
0x10e0   :  { %3379 = vmatmul.mubr.msk.bf16.vlgmr.msra.gmra.mrb[60].mxu0 %vm247_vm1, %v3446_v19  ;;  %vm3001_vm1 = vcmask 122880  }
0x11b3   :  { %v3380_v57 = vpop.f32.mrb[60].mxu0 }
0x11b4   :  { %v2939_v3 = vadd.f32 %v3380_v57, %v2873_v4  ;;  %v2930_v39 = vpop.f32.mrb[61].mxu0 }
0x11b5   :  { %v2931_v18 = vadd.f32 %v2930_v39, %v2863_v48  ;;  %v3381_v52 = vpop.f32.mrb[62].mxu0 }
0x11b6   :  { %v2942_v28 = vadd.f32 %v3381_v52, %v2878_v5  ;;  %v2933_v30 = vpop.f32.mrb[63].mxu0  ;;  %v2947_v11 = vmax.f32 %v2939_v3, 0.0 }
0x11b7   :  { %v2945_v10 = vmax.f32 %v2931_v18, 0.0  ;;  %v2934_v16 = vadd.f32 %v2933_v30, %v2868_v45 }
0x11b8   :  { %v2948_v8 = vmax.f32 %v2942_v28, 0.0  ;;  %v2975_v26 = vmul.f32 %v2966_v61, %v2947_v11 }
0x11b9   :  { %v2973_v12 = vmul.f32 %v2956_v23, %v2945_v10  ;;  %v2946_v44 = vmax.f32 %v2934_v16, 0.0 }
0x11ba   :  { %v2976_v53 = vmul.f32 %v2971_v22, %v2948_v8  ;;  %v2980_v0 = vsel %vm104_vm0, %v2975_v26, 0.0 }
0x11bb   :  { %v2974_v43 = vmul.f32 %v2961_v7, %v2946_v44  ;;  %v2977_v6 = vsel %vm104_vm0, %v2973_v12, 0.0 }
0x11bc   :  { %v2982_v32 = vsel %vm104_vm0, %v2976_v53, 0.0 }
0x11bd   :  { %v2978_v24 = vsel %vm104_vm0, %v2974_v43, 0.0 }
0x11be   :  { %v2979_v62 = vadd.f32 %v2978_v24, %v2977_v6 }
0x11c0   :  { %v2981_v15 = vadd.f32 %v2980_v0, %v2979_v62 }
0x11c2   :  { %v2983_v34 = vadd.f32 %v2982_v32, %v2981_v15 }
0x11c4   :  { %v2984_v56 = vrot.slane %v2983_v34, 4 }
0x11c6   :  { %v2985_v63 = vadd.f32 %v2984_v56, %v2983_v34 }
0x11c8   :  { %v2986_v33 = vrot.slane %v2985_v63, 2 }
0x11ca   :  { %v2987_v35 = vadd.f32 %v2986_v33, %v2985_v63 }
0x11cc   :  { %v2988_v59 = vrot.slane %v2987_v35, 1 }
0x11ce   :  { %v2989_v27 = vadd.f32 %v2988_v59, %v2987_v35 }
0x11d0   :  { %v3000_v14 = vadd.f32 %v2999_v60, %v2989_v27 }
0x11d2   :  { %3002 = vst.msk [vmem:[#allocation3] sm:$0x1] %vm3001_vm1, %v3000_v14 }
0x11d3   :  { %3584 = shalt.err (!%p3581_p4)
}
0x11d4   :  { %s3585_s3 = scalar_lea.hbm %s4929_s25, 16 }
0x11d5   :  { %p3586_p5 = scmp.ne.s32.totalorder %s4929_s25, %s3585_s3  ;;  %p3589_p6 = scmp.lt.u32.totalorder %s3585_s3, %s4929_s25 }
0x11d7   :  { %p3591_p7 = pnand %p3589_p6, %p3586_p5 }
0x11d9   :  { %3594 = shalt.err (!%p3591_p7)
}
0x11da   :  { %3012 = dma.vmem_to_hbm [thread:$0]  %s3010_s15, 16, %s4929_s25, [#allocation4]  }
0x11db   :  { %3595 = dma.done.wait [#allocation4], 16  }
0x11dc   :  { %3596 = vsyncadd [#allocation4], 4294967280 }
0x11dd   :  { %3016 = vsyncpa [#allocation4], 1 }

</bundles_post_ra>
